<compile_context>
chip_gen: v7x
topology: tpu7x:2x2x1
jax: 0.10.0
libtpu: 0.0.40
codegen_flags: <defaults>
</compile_context>

<pallas_src>
import functools

import jax
import jax.numpy as jnp
from jax import lax
from jax.experimental import pallas as pl
from jax.experimental.pallas import tpu as pltpu


PARTS = 2            # use_parts=2 in the reference Baseline
EPS = 1e-5
OUT_LANES = 128      # merged lane-dense output width: [feats | padded logits]
K_PAD = 128          # packed contraction width for the 3x3 conv


# ---------------------------------------------------------------------------
# Fused kernel: one grid step == one sample
#   conv3x3 (one K-packed matmul) -> IBN-a + ReLU -> conv1x1 + ReLU
#   -> 2-part contiguous avg pool -> BNNeck (folded) -> classifier
# ---------------------------------------------------------------------------
def _encoder_fused_kernel(xc_ref, w1_ref, g_in_ref, b_in_ref, s_bn_ref,
                          t_bn_ref, w2_ref, s_nk_ref, t_nk_ref, wcls_ref,
                          out_ref, *, h, w):
    hw = h * w

    # ---- 3x3 conv (stride 1, SAME, no bias): ONE K-packed MXU matmul ------
    # xc is the im2col slab (hw, 128) bf16 (9*cin real K columns, rest zero);
    # w1 is the matching (128, c1) bf16 operand.  Accumulate in f32.
    y = jnp.dot(xc_ref[...], w1_ref[...],
                preferred_element_type=jnp.float32)            # (hw, c1) f32

    # ---- IBN-a + ReLU (single-pass stats: var = E[y^2] - mu^2) ------------
    # InstanceNorm half: per-sample stats over all h*w positions (no mask —
    # the im2col grid has no garbage rows).  BatchNorm half uses eval running
    # stats folded to scale/shift.  Params are zero-padded per half, so the
    # two branches simply add.
    inv_cnt = 1.0 / float(hw)
    mu = jnp.sum(y, axis=0, keepdims=True) * inv_cnt
    ey2 = jnp.sum(y * y, axis=0, keepdims=True) * inv_cnt
    var = jnp.maximum(ey2 - mu * mu, 0.0)
    ibn = ((y - mu) * lax.rsqrt(var + EPS) * g_in_ref[...] + b_in_ref[...]
           + y * s_bn_ref[...] + t_bn_ref[...])
    h1 = jnp.maximum(ibn, 0.0)                                 # (hw, c1) f32

    # ---- 1x1 conv expansion + ReLU (bf16 MXU operands, f32 accum) ---------
    h2 = jnp.maximum(
        jnp.dot(h1.astype(jnp.bfloat16), w2_ref[...],
                preferred_element_type=jnp.float32), 0.0)      # (hw, c2) f32

    # ---- 2-part average pooling: contiguous sublane-range sums ------------
    rows_u = (h // 2) * w               # upper part rows (sublane-aligned)
    rows_l = hw - rows_u                # lower part rows (handles odd h)
    p0 = jnp.sum(h2[:rows_u, :], axis=0, keepdims=True) * (1.0 / float(rows_u))
    p1 = jnp.sum(h2[rows_u:, :], axis=0, keepdims=True) * (1.0 / float(rows_l))
    pooled = jnp.concatenate([p0, p1], axis=0)                 # (2, c2)

    # ---- BNNeck (eval, folded scale/shift, bias frozen 0) + classifier ----
    neck = pooled * s_nk_ref[...] + t_nk_ref[...]
    logits = jnp.dot(neck, wcls_ref[...],
                     preferred_element_type=jnp.float32)       # (2, 128-c2)

    # Lane-dense merged output slab: [feats | logits (zero-padded cols)].
    out_ref[...] = jnp.concatenate([pooled, logits], axis=1)   # (2, 128)


# ---------------------------------------------------------------------------
# Parameter construction (deterministic, synthetic; eval-mode running stats)
# ---------------------------------------------------------------------------
def init_params(key, c_in=3, c1=32, c2=64, num_classes=8):
    k1, k2, k3 = jax.random.split(key, 3)
    half = c1 // 2
    return {
        "w_conv1": 0.05 * jax.random.normal(k1, (9, c_in, c1), jnp.float32),
        "w_conv2": 0.05 * jax.random.normal(k2, (c1, c2), jnp.float32),
        "ibn_g_in": jnp.ones((half,), jnp.float32),
        "ibn_b_in": jnp.zeros((half,), jnp.float32),
        "ibn_g_bn": jnp.ones((half,), jnp.float32),
        "ibn_b_bn": jnp.zeros((half,), jnp.float32),
        "ibn_rm_bn": jnp.zeros((half,), jnp.float32),   # BN running mean
        "ibn_rv_bn": jnp.ones((half,), jnp.float32),    # BN running var
        "neck_g": jnp.ones((c2,), jnp.float32),
        "neck_b": jnp.zeros((c2,), jnp.float32),        # BNNeck bias frozen 0
        "neck_rm": jnp.zeros((c2,), jnp.float32),
        "neck_rv": jnp.ones((c2,), jnp.float32),
        "w_cls": 0.05 * jax.random.normal(k3, (c2, num_classes), jnp.float32),
    }


# ---------------------------------------------------------------------------
# Encoder forward (accepts PyTorch-style NCHW input)
# ---------------------------------------------------------------------------
@jax.jit
def encoder_forward(x_nchw, params):
    x = jnp.transpose(x_nchw, (0, 2, 3, 1)).astype(jnp.float32)   # -> NHWC
    n, h, w, cin = x.shape
    c1 = params["w_conv1"].shape[2]
    c2 = params["w_conv2"].shape[1]
    nc = params["w_cls"].shape[1]
    half = c1 // 2
    hw = h * w

    # ---- im2col slab (n, h*w, 128) bf16: 9*cin real K columns, rest zero --
    k_real = 9 * cin
    xpad = jnp.pad(x, ((0, 0), (1, 1), (1, 1), (0, 0)))
    taps = [lax.slice(xpad, (0, dy, dx, 0), (n, dy + h, dx + w, cin))
            for dy in range(3) for dx in range(3)]
    xc = jnp.concatenate(taps, axis=-1).reshape(n, hw, k_real)
    xc = jnp.pad(xc, ((0, 0), (0, 0), (0, K_PAD - k_real))).astype(jnp.bfloat16)

    # ---- conv1 weight: single 2-D K-packed (128, c1) bf16 operand ---------
    w1 = params["w_conv1"].reshape(k_real, c1)
    w1 = jnp.pad(w1, ((0, K_PAD - k_real), (0, 0))).astype(jnp.bfloat16)

    # ---- IBN-a params: zero-padded halves so IN-half + BN-half just add ---
    zh = jnp.zeros((half,), jnp.float32)
    g_in = jnp.concatenate([params["ibn_g_in"], zh]).reshape(1, c1)
    b_in = jnp.concatenate([params["ibn_b_in"], zh]).reshape(1, c1)
    s_bn_h = params["ibn_g_bn"] * lax.rsqrt(params["ibn_rv_bn"] + EPS)
    t_bn_h = params["ibn_b_bn"] - params["ibn_rm_bn"] * s_bn_h
    s_bn = jnp.concatenate([zh, s_bn_h]).reshape(1, c1)
    t_bn = jnp.concatenate([zh, t_bn_h]).reshape(1, c1)

    # ---- BNNeck folded (eval running stats, bias frozen at 0) -------------
    s_nk_v = params["neck_g"] * lax.rsqrt(params["neck_rv"] + EPS)
    t_nk_v = params["neck_b"] - params["neck_rm"] * s_nk_v
    s_nk = s_nk_v.reshape(1, c2)
    t_nk = t_nk_v.reshape(1, c2)

    # ---- classifier weight padded so [feats | logits] fills 128 lanes -----
    assert c2 + nc <= OUT_LANES
    wcls = jnp.pad(params["w_cls"], ((0, 0), (0, OUT_LANES - c2 - nc)))

    w2 = params["w_conv2"].astype(jnp.bfloat16)

    kernel = functools.partial(_encoder_fused_kernel, h=h, w=w)
    out = pl.pallas_call(
        kernel,
        out_shape=jax.ShapeDtypeStruct((n, PARTS, OUT_LANES), jnp.float32),
        grid_spec=pltpu.PrefetchScalarGridSpec(
            num_scalar_prefetch=0,
            grid=(n,),
            in_specs=[
                pl.BlockSpec((None, hw, K_PAD), lambda b: (b, 0, 0)),
                pl.BlockSpec((K_PAD, c1), lambda b: (0, 0)),
                pl.BlockSpec((1, c1), lambda b: (0, 0)),
                pl.BlockSpec((1, c1), lambda b: (0, 0)),
                pl.BlockSpec((1, c1), lambda b: (0, 0)),
                pl.BlockSpec((1, c1), lambda b: (0, 0)),
                pl.BlockSpec((c1, c2), lambda b: (0, 0)),
                pl.BlockSpec((1, c2), lambda b: (0, 0)),
                pl.BlockSpec((1, c2), lambda b: (0, 0)),
                pl.BlockSpec((c2, OUT_LANES - c2), lambda b: (0, 0)),
            ],
            out_specs=pl.BlockSpec((None, PARTS, OUT_LANES),
                                   lambda b: (b, 0, 0)),
        ),
        compiler_params=pltpu.CompilerParams(
            dimension_semantics=("parallel",)),
    )(xc, w1, g_in, b_in, s_bn, t_bn, w2, s_nk, t_nk, wcls)

    feats = out[:, :, :c2]
    logits = out[:, :, c2:c2 + nc]
    return logits, feats


if __name__ == "__main__":
    key = jax.random.PRNGKey(0)
    kx, kp = jax.random.split(key)
    # PyTorch-style NCHW input
    x = jax.random.normal(kx, (2, 3, 32, 32), dtype=jnp.float32)
    params = init_params(kp, c_in=3, c1=32, c2=64, num_classes=8)

    logits, feats = encoder_forward(x, params)
    jax.block_until_ready((logits, feats))

    assert logits.shape == (2, 2, 8)
    assert feats.shape == (2, 2, 64)
    assert jnp.all(jnp.isfinite(logits)) and jnp.all(jnp.isfinite(feats))
    print("KERNEL_OK")
</pallas_src>

<mosaic_0001>
module attributes {stable_mosaic.version = 11 : i64} {
  func.func @_encoder_fused_kernel(%arg0: i32, %arg1: memref<1x1024x128xbf16, #tpu.memory_space<vmem>>, %arg2: memref<128x32xbf16, #tpu.memory_space<vmem>>, %arg3: memref<1x32xf32, #tpu.memory_space<vmem>>, %arg4: memref<1x32xf32, #tpu.memory_space<vmem>>, %arg5: memref<1x32xf32, #tpu.memory_space<vmem>>, %arg6: memref<1x32xf32, #tpu.memory_space<vmem>>, %arg7: memref<32x64xbf16, #tpu.memory_space<vmem>>, %arg8: memref<1x64xf32, #tpu.memory_space<vmem>>, %arg9: memref<1x64xf32, #tpu.memory_space<vmem>>, %arg10: memref<64x64xf32, #tpu.memory_space<vmem>>, %arg11: memref<1x2x128xf32, #tpu.memory_space<vmem>>) attributes {dimension_semantics = [#tpu.dimension_semantics<parallel>], iteration_bounds = array<i64: 2>, scalar_prefetch = 0 : i64, scratch_operands = 0 : i64, tpu.core_type = #tpu.core_type<tc>, window_params = [{transform_indices = @transform_0, window_bounds = array<i64: 1, 1024, 128>}, {pipeline_mode = #tpu.pipeline_mode<synchronous>, transform_indices = @transform_1, window_bounds = array<i64: 128, 32>}, {pipeline_mode = #tpu.pipeline_mode<synchronous>, transform_indices = @transform_2, window_bounds = array<i64: 1, 32>}, {pipeline_mode = #tpu.pipeline_mode<synchronous>, transform_indices = @transform_3, window_bounds = array<i64: 1, 32>}, {pipeline_mode = #tpu.pipeline_mode<synchronous>, transform_indices = @transform_4, window_bounds = array<i64: 1, 32>}, {pipeline_mode = #tpu.pipeline_mode<synchronous>, transform_indices = @transform_5, window_bounds = array<i64: 1, 32>}, {pipeline_mode = #tpu.pipeline_mode<synchronous>, transform_indices = @transform_6, window_bounds = array<i64: 32, 64>}, {pipeline_mode = #tpu.pipeline_mode<synchronous>, transform_indices = @transform_7, window_bounds = array<i64: 1, 64>}, {pipeline_mode = #tpu.pipeline_mode<synchronous>, transform_indices = @transform_8, window_bounds = array<i64: 1, 64>}, {pipeline_mode = #tpu.pipeline_mode<synchronous>, transform_indices = @transform_9, window_bounds = array<i64: 64, 64>}, {transform_indices = @transform_10, window_bounds = array<i64: 1, 2, 128>}]} {
    %c0 = arith.constant 0 : index
    %c0_0 = arith.constant 0 : index
    %c0_1 = arith.constant 0 : index
    %0 = vector.load %arg1[%c0, %c0_0, %c0_1] : memref<1x1024x128xbf16, #tpu.memory_space<vmem>>, vector<1x1024x128xbf16>
    %1 = vector.shape_cast %0 : vector<1x1024x128xbf16> to vector<1024x128xbf16>
    %c0_2 = arith.constant 0 : index
    %c0_3 = arith.constant 0 : index
    %2 = vector.load %arg2[%c0_2, %c0_3] : memref<128x32xbf16, #tpu.memory_space<vmem>>, vector<128x32xbf16>
    %cst = arith.constant dense<0.000000e+00> : vector<1024x32xf32>
    %3 = tpu.matmul %1, %2, %cst {dimension_numbers = #tpu.dot_dimension_numbers<[1], [0], [0], [1], [0, 0, 1, 1], [], []>} : vector<1024x128xbf16>, vector<128x32xbf16>, vector<1024x32xf32> -> vector<1024x32xf32>
    %cst_4 = arith.constant dense<0.000000e+00> : vector<32xf32>
    %4 = vector.multi_reduction <add>, %3, %cst_4 [0] : vector<1024x32xf32> to vector<32xf32>
    %5 = vector.shape_cast %4 : vector<32xf32> to vector<1x32xf32>
    %cst_5 = arith.constant 9.765625E-4 : f32
    %6 = vector.broadcast %cst_5 : f32 to vector<1x32xf32>
    %7 = arith.mulf %5, %6 : vector<1x32xf32>
    %8 = arith.mulf %3, %3 : vector<1024x32xf32>
    %cst_6 = arith.constant dense<0.000000e+00> : vector<32xf32>
    %9 = vector.multi_reduction <add>, %8, %cst_6 [0] : vector<1024x32xf32> to vector<32xf32>
    %10 = vector.shape_cast %9 : vector<32xf32> to vector<1x32xf32>
    %cst_7 = arith.constant 9.765625E-4 : f32
    %11 = vector.broadcast %cst_7 : f32 to vector<1x32xf32>
    %12 = arith.mulf %10, %11 : vector<1x32xf32>
    %13 = arith.mulf %7, %7 : vector<1x32xf32>
    %14 = arith.subf %12, %13 : vector<1x32xf32>
    %cst_8 = arith.constant 0.000000e+00 : f32
    %15 = vector.broadcast %cst_8 : f32 to vector<1x32xf32>
    %16 = arith.maximumf %14, %15 : vector<1x32xf32>
    %17 = vector.broadcast %7 : vector<1x32xf32> to vector<1024x32xf32>
    %18 = arith.subf %3, %17 : vector<1024x32xf32>
    %cst_9 = arith.constant 9.99999974E-6 : f32
    %19 = vector.broadcast %cst_9 : f32 to vector<1x32xf32>
    %20 = arith.addf %16, %19 : vector<1x32xf32>
    %21 = math.rsqrt %20 : vector<1x32xf32>
    %22 = vector.broadcast %21 : vector<1x32xf32> to vector<1024x32xf32>
    %23 = arith.mulf %18, %22 : vector<1024x32xf32>
    %c0_10 = arith.constant 0 : index
    %c0_11 = arith.constant 0 : index
    %24 = vector.load %arg3[%c0_10, %c0_11] : memref<1x32xf32, #tpu.memory_space<vmem>>, vector<1x32xf32>
    %25 = vector.broadcast %24 : vector<1x32xf32> to vector<1024x32xf32>
    %26 = arith.mulf %23, %25 : vector<1024x32xf32>
    %c0_12 = arith.constant 0 : index
    %c0_13 = arith.constant 0 : index
    %27 = vector.load %arg4[%c0_12, %c0_13] : memref<1x32xf32, #tpu.memory_space<vmem>>, vector<1x32xf32>
    %28 = vector.broadcast %27 : vector<1x32xf32> to vector<1024x32xf32>
    %29 = arith.addf %26, %28 : vector<1024x32xf32>
    %c0_14 = arith.constant 0 : index
    %c0_15 = arith.constant 0 : index
    %30 = vector.load %arg5[%c0_14, %c0_15] : memref<1x32xf32, #tpu.memory_space<vmem>>, vector<1x32xf32>
    %31 = vector.broadcast %30 : vector<1x32xf32> to vector<1024x32xf32>
    %32 = arith.mulf %3, %31 : vector<1024x32xf32>
    %33 = arith.addf %29, %32 : vector<1024x32xf32>
    %c0_16 = arith.constant 0 : index
    %c0_17 = arith.constant 0 : index
    %34 = vector.load %arg6[%c0_16, %c0_17] : memref<1x32xf32, #tpu.memory_space<vmem>>, vector<1x32xf32>
    %35 = vector.broadcast %34 : vector<1x32xf32> to vector<1024x32xf32>
    %36 = arith.addf %33, %35 : vector<1024x32xf32>
    %cst_18 = arith.constant 0.000000e+00 : f32
    %37 = vector.broadcast %cst_18 : f32 to vector<1024x32xf32>
    %38 = arith.maximumf %36, %37 : vector<1024x32xf32>
    %39 = arith.truncf %38 : vector<1024x32xf32> to vector<1024x32xbf16>
    %c0_19 = arith.constant 0 : index
    %c0_20 = arith.constant 0 : index
    %40 = vector.load %arg7[%c0_19, %c0_20] : memref<32x64xbf16, #tpu.memory_space<vmem>>, vector<32x64xbf16>
    %cst_21 = arith.constant dense<0.000000e+00> : vector<1024x64xf32>
    %41 = tpu.matmul %39, %40, %cst_21 {dimension_numbers = #tpu.dot_dimension_numbers<[1], [0], [0], [1], [0, 0, 1, 1], [], []>} : vector<1024x32xbf16>, vector<32x64xbf16>, vector<1024x64xf32> -> vector<1024x64xf32>
    %cst_22 = arith.constant 0.000000e+00 : f32
    %42 = vector.broadcast %cst_22 : f32 to vector<1024x64xf32>
    %43 = arith.maximumf %41, %42 : vector<1024x64xf32>
    %44 = vector.extract_strided_slice %43 {offsets = [0, 0], sizes = [512, 64], strides = [1, 1]} : vector<1024x64xf32> to vector<512x64xf32>
    %cst_23 = arith.constant dense<0.000000e+00> : vector<64xf32>
    %45 = vector.multi_reduction <add>, %44, %cst_23 [0] : vector<512x64xf32> to vector<64xf32>
    %46 = vector.shape_cast %45 : vector<64xf32> to vector<1x64xf32>
    %cst_24 = arith.constant 0.001953125 : f32
    %47 = vector.broadcast %cst_24 : f32 to vector<1x64xf32>
    %48 = arith.mulf %46, %47 : vector<1x64xf32>
    %49 = vector.extract_strided_slice %43 {offsets = [512, 0], sizes = [512, 64], strides = [1, 1]} : vector<1024x64xf32> to vector<512x64xf32>
    %cst_25 = arith.constant dense<0.000000e+00> : vector<64xf32>
    %50 = vector.multi_reduction <add>, %49, %cst_25 [0] : vector<512x64xf32> to vector<64xf32>
    %51 = vector.shape_cast %50 : vector<64xf32> to vector<1x64xf32>
    %cst_26 = arith.constant 0.001953125 : f32
    %52 = vector.broadcast %cst_26 : f32 to vector<1x64xf32>
    %53 = arith.mulf %51, %52 : vector<1x64xf32>
    %54 = tpu.concatenate %48, %53 in 0 : vector<1x64xf32>, vector<1x64xf32> -> vector<2x64xf32>
    %c0_27 = arith.constant 0 : index
    %c0_28 = arith.constant 0 : index
    %55 = vector.load %arg8[%c0_27, %c0_28] : memref<1x64xf32, #tpu.memory_space<vmem>>, vector<1x64xf32>
    %56 = vector.broadcast %55 : vector<1x64xf32> to vector<2x64xf32>
    %57 = arith.mulf %54, %56 : vector<2x64xf32>
    %c0_29 = arith.constant 0 : index
    %c0_30 = arith.constant 0 : index
    %58 = vector.load %arg9[%c0_29, %c0_30] : memref<1x64xf32, #tpu.memory_space<vmem>>, vector<1x64xf32>
    %59 = vector.broadcast %58 : vector<1x64xf32> to vector<2x64xf32>
    %60 = arith.addf %57, %59 : vector<2x64xf32>
    %c0_31 = arith.constant 0 : index
    %c0_32 = arith.constant 0 : index
    %61 = vector.load %arg10[%c0_31, %c0_32] : memref<64x64xf32, #tpu.memory_space<vmem>>, vector<64x64xf32>
    %cst_33 = arith.constant dense<0.000000e+00> : vector<2x64xf32>
    %62 = tpu.matmul %60, %61, %cst_33 {dimension_numbers = #tpu.dot_dimension_numbers<[1], [0], [0], [1], [0, 0, 1, 1], [], []>} : vector<2x64xf32>, vector<64x64xf32>, vector<2x64xf32> -> vector<2x64xf32>
    %63 = tpu.concatenate %54, %62 in 1 : vector<2x64xf32>, vector<2x64xf32> -> vector<2x128xf32>
    %c0_34 = arith.constant 0 : index
    %c0_35 = arith.constant 0 : index
    %c0_36 = arith.constant 0 : index
    %64 = vector.load %arg11[%c0_34, %c0_35, %c0_36] : memref<1x2x128xf32, #tpu.memory_space<vmem>>, vector<1x2x128xf32>
    %65 = vector.shape_cast %64 : vector<1x2x128xf32> to vector<2x128xf32>
    %66 = vector.shape_cast %63 : vector<2x128xf32> to vector<1x2x128xf32>
    tpu.vector_store %arg11[%c0_34, %c0_35, %c0_36], %66 {strides = array<i32>} : memref<1x2x128xf32, #tpu.memory_space<vmem>>, vector<1x2x128xf32>,
    return
  }
  func.func @transform_0(%arg0: i32) -> (i32, i32, i32) {
    %c0_i32 = arith.constant 0 : i32
    %c0_i32_0 = arith.constant 0 : i32
    %c0_i32_1 = arith.constant 0 : i32
    return %arg0, %c0_i32, %c0_i32_0 : i32, i32, i32
  }
  func.func @transform_1(%arg0: i32) -> (i32, i32) {
    %c0_i32 = arith.constant 0 : i32
    %c0_i32_0 = arith.constant 0 : i32
    %c0_i32_1 = arith.constant 0 : i32
    return %c0_i32, %c0_i32_0 : i32, i32
  }
  func.func @transform_2(%arg0: i32) -> (i32, i32) {
    %c0_i32 = arith.constant 0 : i32
    %c0_i32_0 = arith.constant 0 : i32
    %c0_i32_1 = arith.constant 0 : i32
    return %c0_i32, %c0_i32_0 : i32, i32
  }
  func.func @transform_3(%arg0: i32) -> (i32, i32) {
    %c0_i32 = arith.constant 0 : i32
    %c0_i32_0 = arith.constant 0 : i32
    %c0_i32_1 = arith.constant 0 : i32
    return %c0_i32, %c0_i32_0 : i32, i32
  }
  func.func @transform_4(%arg0: i32) -> (i32, i32) {
    %c0_i32 = arith.constant 0 : i32
    %c0_i32_0 = arith.constant 0 : i32
    %c0_i32_1 = arith.constant 0 : i32
    return %c0_i32, %c0_i32_0 : i32, i32
  }
  func.func @transform_5(%arg0: i32) -> (i32, i32) {
    %c0_i32 = arith.constant 0 : i32
    %c0_i32_0 = arith.constant 0 : i32
    %c0_i32_1 = arith.constant 0 : i32
    return %c0_i32, %c0_i32_0 : i32, i32
  }
  func.func @transform_6(%arg0: i32) -> (i32, i32) {
    %c0_i32 = arith.constant 0 : i32
    %c0_i32_0 = arith.constant 0 : i32
    %c0_i32_1 = arith.constant 0 : i32
    return %c0_i32, %c0_i32_0 : i32, i32
  }
  func.func @transform_7(%arg0: i32) -> (i32, i32) {
    %c0_i32 = arith.constant 0 : i32
    %c0_i32_0 = arith.constant 0 : i32
    %c0_i32_1 = arith.constant 0 : i32
    return %c0_i32, %c0_i32_0 : i32, i32
  }
  func.func @transform_8(%arg0: i32) -> (i32, i32) {
    %c0_i32 = arith.constant 0 : i32
    %c0_i32_0 = arith.constant 0 : i32
    %c0_i32_1 = arith.constant 0 : i32
    return %c0_i32, %c0_i32_0 : i32, i32
  }
  func.func @transform_9(%arg0: i32) -> (i32, i32) {
    %c0_i32 = arith.constant 0 : i32
    %c0_i32_0 = arith.constant 0 : i32
    %c0_i32_1 = arith.constant 0 : i32
    return %c0_i32, %c0_i32_0 : i32, i32
  }
  func.func @transform_10(%arg0: i32) -> (i32, i32, i32) {
    %c0_i32 = arith.constant 0 : i32
    %c0_i32_0 = arith.constant 0 : i32
    %c0_i32_1 = arith.constant 0 : i32
    return %arg0, %c0_i32, %c0_i32_0 : i32, i32, i32
  }
}

</mosaic_0001>

<bundles_post_ra>
// kernel: encoder_forward.1
= control target key start
LH: loop header
LB: loop body
LE: loop exit
PB: predicated region body
PF: predicated region fallthrough
CT: control target
= control target key end

     0   :  { %s5329_s13 = smov 0   ;;  %s10467_s0 = inlined_call_operand.vmem [shape: bf16[2,1024,128], index: 0, kind: input, shape index: {}]   ;;  %s10468_s1 = inlined_call_operand.vmem [shape: bf16[128,32], index: 1, kind: input, shape index: {}]   ;;  %s10469_s2 = inlined_call_operand.vmem [shape: f32[1,32], index: 2, kind: input, shape index: {}]   ;;  %s10470_s3 = inlined_call_operand.vmem [shape: f32[1,32], index: 3, kind: input, shape index: {}]   ;;  %s10471_s4 = inlined_call_operand.vmem [shape: f32[1,32], index: 4, kind: input, shape index: {}]   ;;  %s10472_s5 = inlined_call_operand.vmem [shape: f32[1,32], index: 5, kind: input, shape index: {}]   ;;  %s10473_s6 = inlined_call_operand.vmem [shape: bf16[32,64], index: 6, kind: input, shape index: {}]   ;;  %s10474_s7 = inlined_call_operand.vmem [shape: f32[1,64], index: 7, kind: input, shape index: {}]   ;;  %s10475_s8 = inlined_call_operand.vmem [shape: f32[1,64], index: 8, kind: input, shape index: {}]   ;;  %s10476_s9 = inlined_call_operand.vmem [shape: f32[64,64], index: 9, kind: input, shape index: {}]   ;;  %s10477_s10 = inlined_call_operand.vmem [shape: f32[2,2,128], index: 10, kind: output, shape index: {}]  }
   0x1 LB: > { %s4562_s14 = sadd.s32 4294967295, %s5268_s13   ;;  %p4566_p0 = scmp.ge.s32.totalorder %s5268_s13, 1  ;;  %s5268_s13 = sphi %s5329_s13, %s20_s13  }
   0x2   : > { %p312_p1 = scmp.lt.s32.totalorder %s5268_s13, 3 }
   0x4   : > { %p313_p2 = pnand %p4566_p0, %p312_p1 }
   0x6   : > { %316 = sbr.rel (%p313_p2) target bundleno = 1732 (0x6c4), region = 60 }
   0xd   : > { %v5184_v0 = vld [vmem:[%s10468_s1] sm:$0xff]   ;;  %p349_p3 = scmp.lt.s32.totalorder %s4562_s14, 1  ;;  %v5185_v1 = vld [vmem:[%s10468_s1 + $0x8] sm:$0xff]   ;;  %v5186_v2 = vld [vmem:[%s10468_s1 + $0x10] sm:$0xff]   ;;  %vm1480_vm0 = vcmask 261120   ;;  %vm4135_vm1 = vcmask 523264  }
   0xe   : > { %4865 = vmatprep.subr.bf16.mxu0 %v5184_v0  ;;  %v5187_v3 = vld [vmem:[%s10468_s1 + $0x18] sm:$0xff]   ;;  %v5188_v5 = vld [vmem:[%s10468_s1 + $0x20] sm:$0xff]   ;;  %v5189_v6 = vld [vmem:[%s10468_s1 + $0x28] sm:$0xff]   ;;  %vm5271_vm2 = vmmov 0   ;;  %vm4404_vm3 = vcmask 1040384   ;;  %s5273_s17 = smov 64  }
   0xf   : > { %s12139_s14 = smov (!%p349_p3, %s4562_s14), 1  ;;  %4866 = vmatpush3.bf16.msra.mxu0 %v5184_v0  ;;  %v5190_v7 = vld [vmem:[%s10468_s1 + $0x30] sm:$0xff]   ;;  %v5191_v8 = vld [vmem:[%s10468_s1 + $0x38] sm:$0xff]  }
  0x10   : > { %4867 = vmatprep.subr.bf16.mxu0 %v5185_v1  ;;  %s4717_s21 = sshll.u32 %s12139_s14, 9  ;;  %s4569_s18 = sshll.u32 %s12139_s14, 1 }
  0x11   : > { %s5352_s24 = scalar_lea.vmem %s10467_s0, %s4717_s21  ;;  %s357_s21 = scalar_lea.vmem %s10477_s10, %s4569_s18 }
  0x12   : > { %v5192_v4 = vld [vmem:[%s5352_s24] sm:$0xff]   ;;  %v5193_v9 = vld [vmem:[%s5352_s24 + $0x8] sm:$0xff]   ;;  %v5194_v10 = vld [vmem:[%s5352_s24 + $0x10] sm:$0xff]  }
  0x13   : > { %4868 = vmatpush3.bf16.msra.mxu0 %v5185_v1  ;;  %4881 = vmatprep.mubr.bf16.mxu0 %v5192_v4  ;;  %v5195_v11 = vld [vmem:[%s5352_s24 + $0x18] sm:$0xff]   ;;  %v5196_v12 = vld [vmem:[%s5352_s24 + $0x20] sm:$0xff]   ;;  %v5197_v13 = vld [vmem:[%s5352_s24 + $0x28] sm:$0xff]  }
  0x14   : > { %4869 = vmatprep.subr.bf16.mxu0 %v5186_v2  ;;  %v5198_v14 = vld [vmem:[%s5352_s24 + $0x30] sm:$0xff]   ;;  %v5199_v15 = vld [vmem:[%s5352_s24 + $0x38] sm:$0xff]   ;;  %v5200_v16 = vld [vmem:[%s5352_s24 + $0x40] sm:$0xff]  }
  0x15   : > { %v5201_v17 = vld [vmem:[%s5352_s24 + $0x48] sm:$0xff]   ;;  %v5202_v18 = vld [vmem:[%s5352_s24 + $0x50] sm:$0xff]   ;;  %v5203_v19 = vld [vmem:[%s5352_s24 + $0x58] sm:$0xff]  }
  0x16   : > { %v5204_v20 = vld [vmem:[%s5352_s24 + $0x60] sm:$0xff]   ;;  %v5205_v21 = vld [vmem:[%s5352_s24 + $0x68] sm:$0xff]   ;;  %v5206_v22 = vld [vmem:[%s5352_s24 + $0x70] sm:$0xff]  }
  0x17   : > { %4870 = vmatpush3.bf16.msra.mxu0 %v5186_v2  ;;  %v5207_v23 = vld [vmem:[%s5352_s24 + $0x78] sm:$0xff]   ;;  %v5208_v24 = vld [vmem:[%s5352_s24 + $0x80] sm:$0xff]   ;;  %v5209_v25 = vld [vmem:[%s5352_s24 + $0x88] sm:$0xff]  }
  0x18   : > { %4871 = vmatprep.subr.bf16.mxu0 %v5187_v3  ;;  %v5210_v26 = vld [vmem:[%s5352_s24 + $0x90] sm:$0xff]   ;;  %v5211_v27 = vld [vmem:[%s5352_s24 + $0x98] sm:$0xff]   ;;  %v5212_v28 = vld [vmem:[%s5352_s24 + $0xa0] sm:$0xff]  }
  0x19   : > { %v5213_v29 = vld [vmem:[%s5352_s24 + $0xa8] sm:$0xff]   ;;  %v5214_v30 = vld [vmem:[%s5352_s24 + $0xb0] sm:$0xff]   ;;  %v5215_v31 = vld [vmem:[%s5352_s24 + $0xb8] sm:$0xff]  }
  0x1a   : > { %v5216_v32 = vld [vmem:[%s5352_s24 + $0xc0] sm:$0xff]   ;;  %v5217_v33 = vld [vmem:[%s5352_s24 + $0xc8] sm:$0xff]   ;;  %v5218_v34 = vld [vmem:[%s5352_s24 + $0xd0] sm:$0xff]  }
  0x1b   : > { %4872 = vmatpush3.bf16.msra.mxu0 %v5187_v3  ;;  %v5219_v35 = vld [vmem:[%s5352_s24 + $0xd8] sm:$0xff]   ;;  %v5220_v36 = vld [vmem:[%s5352_s24 + $0xe0] sm:$0xff]   ;;  %v5221_v37 = vld [vmem:[%s5352_s24 + $0xe8] sm:$0xff]  }
  0x1c   : > { %4873 = vmatprep.subr.bf16.mxu0 %v5188_v5  ;;  %v5222_v38 = vld [vmem:[%s5352_s24 + $0xf0] sm:$0xff]   ;;  %v5223_v39 = vld [vmem:[%s5352_s24 + $0xf8] sm:$0xff]   ;;  %v5224_v40 = vld [vmem:[%s5352_s24 + $0x100] sm:$0xff]  }
  0x1d   : > { %v5225_v41 = vld [vmem:[%s5352_s24 + $0x108] sm:$0xff]   ;;  %v5226_v42 = vld [vmem:[%s5352_s24 + $0x110] sm:$0xff]   ;;  %v5227_v43 = vld [vmem:[%s5352_s24 + $0x118] sm:$0xff]  }
  0x1e   : > { %v5228_v44 = vld [vmem:[%s5352_s24 + $0x120] sm:$0xff]   ;;  %v5229_v45 = vld [vmem:[%s5352_s24 + $0x128] sm:$0xff]   ;;  %v5230_v46 = vld [vmem:[%s5352_s24 + $0x130] sm:$0xff]  }
  0x1f   : > { %4874 = vmatpush3.bf16.msra.mxu0 %v5188_v5  ;;  %v5231_v47 = vld [vmem:[%s5352_s24 + $0x138] sm:$0xff]   ;;  %v5232_v48 = vld [vmem:[%s5352_s24 + $0x140] sm:$0xff]   ;;  %v5233_v49 = vld [vmem:[%s5352_s24 + $0x148] sm:$0xff]  }
  0x20   : > { %4875 = vmatprep.subr.bf16.mxu0 %v5189_v6  ;;  %v5234_v50 = vld [vmem:[%s5352_s24 + $0x150] sm:$0xff]   ;;  %v5235_v51 = vld [vmem:[%s5352_s24 + $0x158] sm:$0xff]   ;;  %v5236_v52 = vld [vmem:[%s5352_s24 + $0x160] sm:$0xff]  }
  0x21   : > { %v5237_v53 = vld [vmem:[%s5352_s24 + $0x168] sm:$0xff]   ;;  %v5238_v54 = vld [vmem:[%s5352_s24 + $0x170] sm:$0xff]   ;;  %v5239_v55 = vld [vmem:[%s5352_s24 + $0x178] sm:$0xff]  }
  0x22   : > { %v5240_v56 = vld [vmem:[%s5352_s24 + $0x180] sm:$0xff]   ;;  %v5241_v57 = vld [vmem:[%s5352_s24 + $0x188] sm:$0xff]   ;;  %v5242_v58 = vld [vmem:[%s5352_s24 + $0x190] sm:$0xff]  }
  0x23   : > { %4876 = vmatpush3.bf16.msra.mxu0 %v5189_v6  ;;  %v5243_v59 = vld [vmem:[%s5352_s24 + $0x198] sm:$0xff]   ;;  %v5244_v60 = vld [vmem:[%s5352_s24 + $0x1a0] sm:$0xff]   ;;  %v5245_v61 = vld [vmem:[%s5352_s24 + $0x1a8] sm:$0xff]  }
  0x24   : > { %4877 = vmatprep.subr.bf16.mxu0 %v5190_v7  ;;  %v5246_v62 = vld [vmem:[%s5352_s24 + $0x1b0] sm:$0xff]   ;;  %v5247_v1 = vld [vmem:[%s5352_s24 + $0x1b8] sm:$0xff]   ;;  %v5248_v4 = vld [vmem:[%s5352_s24 + $0x1c0] sm:$0xff]  }
  0x27   : > { %4878 = vmatpush3.bf16.msra.mxu0 %v5190_v7 }
  0x28   : > { %4879 = vmatprep.subr.bf16.mxu0 %v5191_v8 }
  0x2b   : > { %4880 = vmatpush3.bf16.msra.mxu0 %v5191_v8 }
  0x2e   : > { %4882 = vmatmul.mubr.bf16.vlgmr.msra.gmra.mrb[0].mxu0 %v5193_v9 }
  0x2f   : > { %4885 = vmatprep.mubr.bf16.mxu0 %v5194_v10 }
  0x36   : > { %4886 = vmatmul.mubr.bf16.gmra.mrb[4].mxu0 %v5195_v11 }
  0x37   : > { %4889 = vmatprep.mubr.bf16.mxu0 %v5196_v12 }
  0x3e   : > { %4890 = vmatmul.mubr.bf16.gmra.mrb[8].mxu0 %v5197_v13 }
  0x3f   : > { %4893 = vmatprep.mubr.bf16.mxu0 %v5198_v14 }
  0x46   : > { %4894 = vmatmul.mubr.bf16.gmra.mrb[12].mxu0 %v5199_v15 }
  0x47   : > { %4897 = vmatprep.mubr.bf16.mxu0 %v5200_v16 }
  0x4e   : > { %4898 = vmatmul.mubr.bf16.gmra.mrb[16].mxu0 %v5201_v17 }
  0x4f   : > { %4901 = vmatprep.mubr.bf16.mxu0 %v5202_v18 }
  0x56   : > { %4902 = vmatmul.mubr.bf16.gmra.mrb[20].mxu0 %v5203_v19 }
  0x57   : > { %4905 = vmatprep.mubr.bf16.mxu0 %v5204_v20 }
  0x5e   : > { %4906 = vmatmul.mubr.bf16.gmra.mrb[24].mxu0 %v5205_v21 }
  0x5f   : > { %4909 = vmatprep.mubr.bf16.mxu0 %v5206_v22 }
  0x66   : > { %4910 = vmatmul.mubr.bf16.gmra.mrb[28].mxu0 %v5207_v23  ;;  %v5249_v23 = vld [vmem:[%s5352_s24 + $0x1c8] sm:$0xff]  }
  0x67   : > { %4913 = vmatprep.mubr.bf16.mxu0 %v5208_v24 }
  0x6e   : > { %4914 = vmatmul.mubr.bf16.gmra.mrb[32].mxu0 %v5209_v25 }
  0x6f   : > { %4917 = vmatprep.mubr.bf16.mxu0 %v5210_v26 }
  0x76   : > { %4918 = vmatmul.mubr.bf16.gmra.mrb[36].mxu0 %v5211_v27 }
  0x77   : > { %4921 = vmatprep.mubr.bf16.mxu0 %v5212_v28  ;;  %v5250_v28 = vld [vmem:[%s5352_s24 + $0x1d0] sm:$0xff]  }
  0x7e   : > { %4922 = vmatmul.mubr.bf16.gmra.mrb[40].mxu0 %v5213_v29 }
  0x7f   : > { %4925 = vmatprep.mubr.bf16.mxu0 %v5214_v30 }
  0x86   : > { %4926 = vmatmul.mubr.bf16.gmra.mrb[44].mxu0 %v5215_v31 }
  0x87   : > { %4929 = vmatprep.mubr.bf16.mxu0 %v5216_v32 }
  0x8e   : > { %4930 = vmatmul.mubr.bf16.gmra.mrb[48].mxu0 %v5217_v33 }
  0x8f   : > { %4933 = vmatprep.mubr.bf16.mxu0 %v5218_v34 }
  0x96   : > { %4934 = vmatmul.mubr.bf16.gmra.mrb[52].mxu0 %v5219_v35 }
  0x97   : > { %4937 = vmatprep.mubr.bf16.mxu0 %v5220_v36 }
  0x9e   : > { %4938 = vmatmul.mubr.bf16.gmra.mrb[56].mxu0 %v5221_v37 }
  0x9f   : > { %4941 = vmatprep.mubr.bf16.mxu0 %v5222_v38 }
  0xa6   : > { %4942 = vmatmul.mubr.bf16.gmra.mrb[60].mxu0 %v5223_v39 }
  0xa7   : > { %4945 = vmatprep.mubr.bf16.mxu0 %v5224_v40 }
  0xae   : > { %4946 = vmatmul.mubr.bf16.gmra.mrb[64].mxu0 %v5225_v41 }
  0xaf   : > { %4949 = vmatprep.mubr.bf16.mxu0 %v5226_v42 }
  0xb6   : > { %4950 = vmatmul.mubr.bf16.gmra.mrb[68].mxu0 %v5227_v43 }
  0xb7   : > { %4953 = vmatprep.mubr.bf16.mxu0 %v5228_v44 }
  0xbe   : > { %4954 = vmatmul.mubr.bf16.gmra.mrb[72].mxu0 %v5229_v45 }
  0xbf   : > { %4957 = vmatprep.mubr.bf16.mxu0 %v5230_v46 }
  0xc6   : > { %4958 = vmatmul.mubr.bf16.gmra.mrb[76].mxu0 %v5231_v47 }
  0xc7   : > { %4961 = vmatprep.mubr.bf16.mxu0 %v5232_v48  ;;  %v5251_v48 = vld [vmem:[%s5352_s24 + $0x1d8] sm:$0xff]  }
  0xce   : > { %4962 = vmatmul.mubr.bf16.gmra.mrb[80].mxu0 %v5233_v49 }
  0xcf   : > { %4965 = vmatprep.mubr.bf16.mxu0 %v5234_v50 }
  0xd6   : > { %4966 = vmatmul.mubr.bf16.gmra.mrb[84].mxu0 %v5235_v51 }
  0xd7   : > { %4969 = vmatprep.mubr.bf16.mxu0 %v5236_v52 }
  0xde   : > { %4970 = vmatmul.mubr.bf16.gmra.mrb[88].mxu0 %v5237_v53  ;;  %v5252_v53 = vld [vmem:[%s5352_s24 + $0x1e0] sm:$0xff]  }
  0xdf   : > { %4973 = vmatprep.mubr.bf16.mxu0 %v5238_v54 }
  0xe6   : > { %4974 = vmatmul.mubr.bf16.gmra.mrb[92].mxu0 %v5239_v55 }
  0xe7   : > { %4977 = vmatprep.mubr.bf16.mxu0 %v5240_v56 }
  0xee   : > { %4978 = vmatmul.mubr.bf16.gmra.mrb[96].mxu0 %v5241_v57 }
  0xef   : > { %4981 = vmatprep.mubr.bf16.mxu0 %v5242_v58 }
  0xf6   : > { %4982 = vmatmul.mubr.bf16.gmra.mrb[100].mxu0 %v5243_v59 }
  0xf7   : > { %4985 = vmatprep.mubr.bf16.mxu0 %v5244_v60 }
  0xfe   : > { %4986 = vmatmul.mubr.bf16.gmra.mrb[104].mxu0 %v5245_v61 }
  0xff   : > { %4989 = vmatprep.mubr.bf16.mxu0 %v5246_v62 }
 0x101   : > { %v5424_v63 = vpop.f32.mrb[0].mxu0 }
 0x102   : > { %v5426_v0 = vpop.f32.mrb[1].mxu0  ;;  %v1745_v6 = vmul.f32 %v5424_v63, %v5424_v63  ;;  %v1484_v11 = vsel %vm1480_vm0, %v5424_v63, 0.0 }
 0x103   : > { %10669 = vst [vmem:[#allocation2_spill] sm:$0xff] %v5426_v0  ;;  %v1743_v2 = vmul.f32 %v5426_v0, %v5426_v0  ;;  %v5431_v3 = vpop.f32.mrb[2].mxu0  ;;  %v1481_v7 = vsel %vm1480_vm0, %v5426_v0, 0.0 }
 0x104   : > { %10670 = vst [vmem:[#allocation3_spill] sm:$0xff] %v5431_v3  ;;  %v5434_v5 = vpop.f32.mrb[3].mxu0  ;;  %v1746_v13 = vmul.f32 %v5431_v3, %v5431_v3  ;;  %v1874_v17 = vsel %vm1480_vm0, %v1745_v6, 0.0  ;;  %v1486_v18 = vsel %vm1480_vm0, %v5431_v3, 0.0 }
 0x105   : > { %10671 = vst [vmem:[#allocation4_spill] sm:$0xff] %v5434_v5  ;;  %v1482_v8 = vsel %vm1480_vm0, %v5434_v5, 0.0  ;;  %v1744_v9 = vmul.f32 %v5434_v5, %v5434_v5  ;;  %v1871_v12 = vsel %vm1480_vm0, %v1743_v2, 0.0 }
 0x106   : > { %v1483_v10 = vadd.f32 %v1482_v8, %v1481_v7  ;;  %4990 = vmatmul.mubr.bf16.gmra.mrb[108].mxu0 %v5247_v1  ;;  %v1876_v24 = vsel %vm1480_vm0, %v1746_v13, 0.0 }
 0x107   : > { %v1872_v14 = vsel %vm1480_vm0, %v1744_v9, 0.0  ;;  %4993 = vmatprep.mubr.bf16.mxu0 %v5248_v4 }
 0x108   : > { %v1485_v15 = vadd.f32 %v1484_v11, %v1483_v10  ;;  %v1873_v16 = vadd.f32 %v1872_v14, %v1871_v12  ;;  %v5253_v14 = vld [vmem:[%s5352_s24 + $0x1e8] sm:$0xff]  }
 0x109   : > { %v5453_v19 = vpop.f32.mrb[4].mxu0 }
 0x10a   : > { %v1487_v20 = vadd.f32 %v1486_v18, %v1485_v15  ;;  %v1875_v21 = vadd.f32 %v1874_v17, %v1873_v16  ;;  %v5455_v22 = vpop.f32.mrb[5].mxu0  ;;  %v1749_v34 = vmul.f32 %v5453_v19, %v5453_v19  ;;  %v1492_v38 = vsel %vm1480_vm0, %v5453_v19, 0.0 }
 0x10b   : > { %v1488_v25 = vsel %vm1480_vm0, %v5455_v22, 0.0  ;;  %v1747_v26 = vmul.f32 %v5455_v22, %v5455_v22  ;;  %v5463_v27 = vpop.f32.mrb[6].mxu0 }
 0x10c   : > { %10672 = vst [vmem:[#allocation5_spill] sm:$0xff] %v5463_v27  ;;  %v1877_v29 = vadd.f32 %v1876_v24, %v1875_v21  ;;  %v1489_v30 = vadd.f32 %v1488_v25, %v1487_v20  ;;  %v5466_v31 = vpop.f32.mrb[7].mxu0  ;;  %v1750_v39 = vmul.f32 %v5463_v27, %v5463_v27  ;;  %v1494_v42 = vsel %vm1480_vm0, %v5463_v27, 0.0  ;;  %v5254_v20 = vld [vmem:[%s5352_s24 + $0x1f0] sm:$0xff]  }
 0x10d   : > { %v1878_v32 = vsel %vm1480_vm0, %v1747_v26, 0.0  ;;  %v1490_v33 = vsel %vm1480_vm0, %v5466_v31, 0.0  ;;  %v1748_v37 = vmul.f32 %v5466_v31, %v5466_v31  ;;  %v1882_v45 = vsel %vm1480_vm0, %v1749_v34, 0.0 }
 0x10e   : > { %v1879_v35 = vadd.f32 %v1878_v32, %v1877_v29  ;;  %v1491_v36 = vadd.f32 %v1490_v33, %v1489_v30  ;;  %4994 = vmatmul.mubr.bf16.gmra.mrb[112].mxu0 %v5249_v23  ;;  %v1884_v54 = vsel %vm1480_vm0, %v1750_v39, 0.0 }
 0x10f   : > { %4997 = vmatprep.mubr.bf16.mxu0 %v5250_v28  ;;  %v1880_v41 = vsel %vm1480_vm0, %v1748_v37, 0.0 }
 0x110   : > { %v1493_v40 = vadd.f32 %v1492_v38, %v1491_v36  ;;  %v1881_v43 = vadd.f32 %v1880_v41, %v1879_v35 }
 0x111   : > { %v5482_v44 = vpop.f32.mrb[8].mxu0 }
 0x112   : > { %10673 = vst [vmem:[#allocation6_spill] sm:$0xff] %v5482_v44  ;;  %v1495_v46 = vadd.f32 %v1494_v42, %v1493_v40  ;;  %v5485_v47 = vpop.f32.mrb[9].mxu0  ;;  %v1883_v49 = vadd.f32 %v1882_v45, %v1881_v43  ;;  %v1753_v60 = vmul.f32 %v5482_v44, %v5482_v44  ;;  %v1500_v1 = vsel %vm1480_vm0, %v5482_v44, 0.0  ;;  %v5255_v45 = vld [vmem:[%s5352_s24 + $0x1f8] sm:$0xff]  }
 0x113   : > { %10674 = vst [vmem:[#allocation7_spill] sm:$0xff] %v5485_v47  ;;  %v1496_v50 = vsel %vm1480_vm0, %v5485_v47, 0.0  ;;  %v1751_v51 = vmul.f32 %v5485_v47, %v5485_v47  ;;  %v5492_v52 = vpop.f32.mrb[10].mxu0 }
 0x114   : > { %v1497_v55 = vadd.f32 %v1496_v50, %v1495_v46  ;;  %v5496_v56 = vpop.f32.mrb[11].mxu0  ;;  %v1885_v57 = vadd.f32 %v1884_v54, %v1883_v49  ;;  %v1754_v4 = vmul.f32 %v5492_v52, %v5492_v52  ;;  %v1502_v8 = vsel %vm1480_vm0, %v5492_v52, 0.0 }
 0x115   : > { %v1886_v58 = vsel %vm1480_vm0, %v1751_v51, 0.0  ;;  %v1498_v59 = vsel %vm1480_vm0, %v5496_v56, 0.0  ;;  %v1752_v62 = vmul.f32 %v5496_v56, %v5496_v56  ;;  %v1890_v11 = vsel %vm1480_vm0, %v1753_v60, 0.0 }
 0x116   : > { %v1499_v61 = vadd.f32 %v1498_v59, %v1497_v55  ;;  %4998 = vmatmul.mubr.bf16.gmra.mrb[116].mxu0 %v5251_v48  ;;  %v1887_v2 = vadd.f32 %v1886_v58, %v1885_v57  ;;  %v1892_v21 = vsel %vm1480_vm0, %v1754_v4, 0.0 }
 0x117   : > { %5001 = vmatprep.mubr.bf16.mxu0 %v5252_v53  ;;  %v1888_v7 = vsel %vm1480_vm0, %v1752_v62, 0.0 }
 0x118   : > { %v1501_v6 = vadd.f32 %v1500_v1, %v1499_v61  ;;  %v1889_v9 = vadd.f32 %v1888_v7, %v1887_v2 }
 0x119   : > { %v5512_v10 = vpop.f32.mrb[12].mxu0 }
 0x11a   : > { %v1503_v12 = vadd.f32 %v1502_v8, %v1501_v6  ;;  %v5515_v13 = vpop.f32.mrb[13].mxu0  ;;  %v1891_v15 = vadd.f32 %v1890_v11, %v1889_v9  ;;  %v1757_v29 = vmul.f32 %v5512_v10, %v5512_v10  ;;  %v1508_v33 = vsel %vm1480_vm0, %v5512_v10, 0.0 }
 0x11b   : > { %10675 = vst [vmem:[#allocation8_spill] sm:$0xff] %v5515_v13  ;;  %v1504_v16 = vsel %vm1480_vm0, %v5515_v13, 0.0  ;;  %v1755_v17 = vmul.f32 %v5515_v13, %v5515_v13  ;;  %v5522_v18 = vpop.f32.mrb[14].mxu0 }
 0x11c   : > { %10676 = vst [vmem:[#allocation9_spill] sm:$0xff] %v5522_v18  ;;  %v1505_v23 = vadd.f32 %v1504_v16, %v1503_v12  ;;  %v5526_v24 = vpop.f32.mrb[15].mxu0  ;;  %v1893_v25 = vadd.f32 %v1892_v21, %v1891_v15  ;;  %v1758_v35 = vmul.f32 %v5522_v18, %v5522_v18  ;;  %v1510_v38 = vsel %vm1480_vm0, %v5522_v18, 0.0 }
 0x11d   : > { %10677 = vst [vmem:[#allocation10_spill] sm:$0xff] %v5526_v24  ;;  %v1894_v26 = vsel %vm1480_vm0, %v1755_v17, 0.0  ;;  %v1506_v28 = vsel %vm1480_vm0, %v5526_v24, 0.0  ;;  %v1756_v32 = vmul.f32 %v5526_v24, %v5526_v24  ;;  %v1898_v41 = vsel %vm1480_vm0, %v1757_v29, 0.0 }
 0x11e   : > { %v1507_v30 = vadd.f32 %v1506_v28, %v1505_v23  ;;  %5002 = vmatmul.mubr.bf16.gmra.mrb[120].mxu0 %v5253_v14  ;;  %v1895_v34 = vadd.f32 %v1894_v26, %v1893_v25  ;;  %v1900_v51 = vsel %vm1480_vm0, %v1758_v35, 0.0 }
 0x11f   : > { %5005 = vmatprep.mubr.bf16.mxu0 %v5254_v20  ;;  %v1896_v37 = vsel %vm1480_vm0, %v1756_v32, 0.0 }
 0x120   : > { %v1509_v36 = vadd.f32 %v1508_v33, %v1507_v30  ;;  %v1897_v39 = vadd.f32 %v1896_v37, %v1895_v34 }
 0x121   : > { %v5542_v40 = vpop.f32.mrb[16].mxu0 }
 0x122   : > { %10678 = vst [vmem:[#allocation11_spill] sm:$0xff] %v5542_v40  ;;  %v1511_v42 = vadd.f32 %v1510_v38, %v1509_v36  ;;  %v5545_v43 = vpop.f32.mrb[17].mxu0  ;;  %v1899_v46 = vadd.f32 %v1898_v41, %v1897_v39  ;;  %v1761_v59 = vmul.f32 %v5542_v40, %v5542_v40  ;;  %v1516_v62 = vsel %vm1480_vm0, %v5542_v40, 0.0 }
 0x123   : > { %v1512_v48 = vsel %vm1480_vm0, %v5545_v43, 0.0  ;;  %v1759_v49 = vmul.f32 %v5545_v43, %v5545_v43  ;;  %v5552_v50 = vpop.f32.mrb[18].mxu0 }
 0x124   : > { %10679 = vst [vmem:[#allocation12_spill] sm:$0xff] %v5552_v50  ;;  %v1513_v53 = vadd.f32 %v1512_v48, %v1511_v42  ;;  %v5555_v54 = vpop.f32.mrb[19].mxu0  ;;  %v1901_v55 = vadd.f32 %v1900_v51, %v1899_v46  ;;  %v1762_v2 = vmul.f32 %v5552_v50, %v5552_v50  ;;  %v1518_v7 = vsel %vm1480_vm0, %v5552_v50, 0.0 }
 0x125   : > { %10680 = vst [vmem:[#allocation13_spill] sm:$0xff] %v5555_v54  ;;  %v1902_v57 = vsel %vm1480_vm0, %v1759_v49, 0.0  ;;  %v1514_v58 = vsel %vm1480_vm0, %v5555_v54, 0.0  ;;  %v1760_v61 = vmul.f32 %v5555_v54, %v5555_v54  ;;  %v1906_v11 = vsel %vm1480_vm0, %v1761_v59, 0.0 }
 0x126   : > { %v1515_v60 = vadd.f32 %v1514_v58, %v1513_v53  ;;  %5006 = vmatmul.mubr.bf16.gmra.mrb[124].mxu0 %v5255_v45  ;;  %v1903_v1 = vadd.f32 %v1902_v57, %v1901_v55  ;;  %v1908_v21 = vsel %vm1480_vm0, %v1762_v2, 0.0 }
 0x127   : > { %v1904_v6 = vsel %vm1480_vm0, %v1760_v61, 0.0 }
 0x128   : > { %v1517_v4 = vadd.f32 %v1516_v62, %v1515_v60  ;;  %v1905_v8 = vadd.f32 %v1904_v6, %v1903_v1 }
 0x129   : > { %v5571_v9 = vpop.f32.mrb[20].mxu0 }
 0x12a   : > { %10681 = vst [vmem:[#allocation14_spill] sm:$0xff] %v5571_v9  ;;  %v1519_v12 = vadd.f32 %v1518_v7, %v1517_v4  ;;  %v5574_v14 = vpop.f32.mrb[21].mxu0  ;;  %v1907_v15 = vadd.f32 %v1906_v11, %v1905_v8  ;;  %v1765_v30 = vmul.f32 %v5571_v9, %v5571_v9  ;;  %v1524_v34 = vsel %vm1480_vm0, %v5571_v9, 0.0 }
 0x12b   : > { %10682 = vst [vmem:[#allocation15_spill] sm:$0xff] %v5574_v14  ;;  %v1520_v16 = vsel %vm1480_vm0, %v5574_v14, 0.0  ;;  %v1763_v17 = vmul.f32 %v5574_v14, %v5574_v14  ;;  %v5580_v20 = vpop.f32.mrb[22].mxu0 }
 0x12c   : > { %10683 = vst [vmem:[#allocation16_spill] sm:$0xff] %v5580_v20  ;;  %v1521_v23 = vadd.f32 %v1520_v16, %v1519_v12  ;;  %v5583_v25 = vpop.f32.mrb[23].mxu0  ;;  %v1909_v26 = vadd.f32 %v1908_v21, %v1907_v15  ;;  %v1766_v36 = vmul.f32 %v5580_v20, %v5580_v20  ;;  %v1526_v39 = vsel %vm1480_vm0, %v5580_v20, 0.0 }
 0x12d   : > { %10684 = vst [vmem:[#allocation17_spill] sm:$0xff] %v5583_v25  ;;  %v1910_v28 = vsel %vm1480_vm0, %v1763_v17, 0.0  ;;  %v1522_v29 = vsel %vm1480_vm0, %v5583_v25, 0.0  ;;  %v1764_v33 = vmul.f32 %v5583_v25, %v5583_v25  ;;  %v1914_v45 = vsel %vm1480_vm0, %v1765_v30, 0.0 }
 0x12e   : > { %v1523_v32 = vadd.f32 %v1522_v29, %v1521_v23  ;;  %v1911_v35 = vadd.f32 %v1910_v28, %v1909_v26  ;;  %v1916_v57 = vsel %vm1480_vm0, %v1766_v36, 0.0 }
 0x12f   : > { %v1912_v38 = vsel %vm1480_vm0, %v1764_v33, 0.0 }
 0x130   : > { %v1525_v37 = vadd.f32 %v1524_v34, %v1523_v32  ;;  %v1913_v41 = vadd.f32 %v1912_v38, %v1911_v35 }
 0x131   : > { %v5599_v42 = vpop.f32.mrb[24].mxu0 }
 0x132   : > { %10685 = vst [vmem:[#allocation18_spill] sm:$0xff] %v5599_v42  ;;  %v1527_v46 = vadd.f32 %v1526_v39, %v1525_v37  ;;  %v5602_v48 = vpop.f32.mrb[25].mxu0  ;;  %v1915_v49 = vadd.f32 %v1914_v45, %v1913_v41  ;;  %v1769_v1 = vmul.f32 %v5599_v42, %v5599_v42  ;;  %v1532_v6 = vsel %vm1480_vm0, %v5599_v42, 0.0 }
 0x133   : > { %10686 = vst [vmem:[#allocation19_spill] sm:$0xff] %v5602_v48  ;;  %v1528_v51 = vsel %vm1480_vm0, %v5602_v48, 0.0  ;;  %v1767_v53 = vmul.f32 %v5602_v48, %v5602_v48  ;;  %v5608_v55 = vpop.f32.mrb[26].mxu0 }
 0x134   : > { %10687 = vst [vmem:[#allocation20_spill] sm:$0xff] %v5608_v55  ;;  %v1529_v58 = vadd.f32 %v1528_v51, %v1527_v46  ;;  %v5611_v59 = vpop.f32.mrb[27].mxu0  ;;  %v1917_v60 = vadd.f32 %v1916_v57, %v1915_v49  ;;  %v1770_v8 = vmul.f32 %v5608_v55, %v5608_v55  ;;  %v1534_v15 = vsel %vm1480_vm0, %v5608_v55, 0.0 }
 0x135   : > { %10688 = vst [vmem:[#allocation21_spill] sm:$0xff] %v5611_v59  ;;  %v1918_v61 = vsel %vm1480_vm0, %v1767_v53, 0.0  ;;  %v1530_v62 = vsel %vm1480_vm0, %v5611_v59, 0.0  ;;  %v1768_v4 = vmul.f32 %v5611_v59, %v5611_v59  ;;  %v1922_v21 = vsel %vm1480_vm0, %v1769_v1, 0.0 }
 0x136   : > { %v1531_v2 = vadd.f32 %v1530_v62, %v1529_v58  ;;  %v1919_v7 = vadd.f32 %v1918_v61, %v1917_v60  ;;  %v1924_v33 = vsel %vm1480_vm0, %v1770_v8, 0.0 }
 0x137   : > { %v1920_v12 = vsel %vm1480_vm0, %v1768_v4, 0.0 }
 0x138   : > { %v1533_v11 = vadd.f32 %v1532_v6, %v1531_v2  ;;  %v1921_v16 = vadd.f32 %v1920_v12, %v1919_v7 }
 0x139   : > { %v5627_v17 = vpop.f32.mrb[28].mxu0 }
 0x13a   : > { %10689 = vst [vmem:[#allocation22_spill] sm:$0xff] %v5627_v17  ;;  %v1535_v23 = vadd.f32 %v1534_v15, %v1533_v11  ;;  %v5630_v26 = vpop.f32.mrb[29].mxu0  ;;  %v1923_v28 = vadd.f32 %v1922_v21, %v1921_v16  ;;  %v1773_v39 = vmul.f32 %v5627_v17, %v5627_v17  ;;  %v1540_v46 = vsel %vm1480_vm0, %v5627_v17, 0.0 }
 0x13b   : > { %10690 = vst [vmem:[#allocation23_spill] sm:$0xff] %v5630_v26  ;;  %v1536_v29 = vsel %vm1480_vm0, %v5630_v26, 0.0  ;;  %v1771_v30 = vmul.f32 %v5630_v26, %v5630_v26  ;;  %v5636_v32 = vpop.f32.mrb[30].mxu0 }
 0x13c   : > { %10691 = vst [vmem:[#allocation24_spill] sm:$0xff] %v5636_v32  ;;  %v1537_v34 = vadd.f32 %v1536_v29, %v1535_v23  ;;  %v5639_v35 = vpop.f32.mrb[31].mxu0  ;;  %v1925_v36 = vadd.f32 %v1924_v33, %v1923_v28  ;;  %v1774_v51 = vmul.f32 %v5636_v32, %v5636_v32  ;;  %v1542_v58 = vsel %vm1480_vm0, %v5636_v32, 0.0 }
 0x13d   : > { %10692 = vst [vmem:[#allocation25_spill] sm:$0xff] %v5639_v35  ;;  %v1926_v37 = vsel %vm1480_vm0, %v1771_v30, 0.0  ;;  %v1538_v38 = vsel %vm1480_vm0, %v5639_v35, 0.0  ;;  %v1772_v45 = vmul.f32 %v5639_v35, %v5639_v35  ;;  %v1930_v62 = vsel %vm1480_vm0, %v1773_v39, 0.0 }
 0x13e   : > { %v1539_v41 = vadd.f32 %v1538_v38, %v1537_v34  ;;  %v1927_v49 = vadd.f32 %v1926_v37, %v1925_v36  ;;  %v1932_v11 = vsel %vm1480_vm0, %v1774_v51, 0.0 }
 0x13f   : > { %v1928_v57 = vsel %vm1480_vm0, %v1772_v45, 0.0 }
 0x140   : > { %v1541_v53 = vadd.f32 %v1540_v46, %v1539_v41  ;;  %v1929_v60 = vadd.f32 %v1928_v57, %v1927_v49 }
 0x141   : > { %v5655_v61 = vpop.f32.mrb[32].mxu0 }
 0x142   : > { %10693 = vst [vmem:[#allocation26_spill] sm:$0xff] %v5655_v61  ;;  %v1543_v1 = vadd.f32 %v1542_v58, %v1541_v53  ;;  %v5658_v2 = vpop.f32.mrb[33].mxu0  ;;  %v1931_v4 = vadd.f32 %v1930_v62, %v1929_v60  ;;  %v1777_v28 = vmul.f32 %v5655_v61, %v5655_v61  ;;  %v1548_v33 = vsel %vm1480_vm0, %v5655_v61, 0.0 }
 0x143   : > { %10694 = vst [vmem:[#allocation27_spill] sm:$0xff] %v5658_v2  ;;  %v1544_v6 = vsel %vm1480_vm0, %v5658_v2, 0.0  ;;  %v1775_v7 = vmul.f32 %v5658_v2, %v5658_v2  ;;  %v5664_v8 = vpop.f32.mrb[34].mxu0 }
 0x144   : > { %10695 = vst [vmem:[#allocation28_spill] sm:$0xff] %v5664_v8  ;;  %v1545_v12 = vadd.f32 %v1544_v6, %v1543_v1  ;;  %v5667_v15 = vpop.f32.mrb[35].mxu0  ;;  %v1933_v16 = vadd.f32 %v1932_v11, %v1931_v4  ;;  %v1778_v36 = vmul.f32 %v5664_v8, %v5664_v8  ;;  %v1550_v39 = vsel %vm1480_vm0, %v5664_v8, 0.0 }
 0x145   : > { %10696 = vst [vmem:[#allocation29_spill] sm:$0xff] %v5667_v15  ;;  %v1934_v21 = vsel %vm1480_vm0, %v1775_v7, 0.0  ;;  %v1546_v23 = vsel %vm1480_vm0, %v5667_v15, 0.0  ;;  %v1776_v30 = vmul.f32 %v5667_v15, %v5667_v15  ;;  %v1938_v46 = vsel %vm1480_vm0, %v1777_v28, 0.0 }
 0x146   : > { %v1547_v29 = vadd.f32 %v1546_v23, %v1545_v12  ;;  %v1935_v34 = vadd.f32 %v1934_v21, %v1933_v16  ;;  %v1940_v62 = vsel %vm1480_vm0, %v1778_v36, 0.0 }
 0x147   : > { %v1936_v38 = vsel %vm1480_vm0, %v1776_v30, 0.0 }
 0x148   : > { %v1549_v37 = vadd.f32 %v1548_v33, %v1547_v29  ;;  %v1937_v41 = vadd.f32 %v1936_v38, %v1935_v34 }
 0x149   : > { %v5683_v45 = vpop.f32.mrb[36].mxu0 }
 0x14a   : > { %10697 = vst [vmem:[#allocation30_spill] sm:$0xff] %v5683_v45  ;;  %v1551_v49 = vadd.f32 %v1550_v39, %v1549_v37  ;;  %v5686_v51 = vpop.f32.mrb[37].mxu0  ;;  %v1939_v53 = vadd.f32 %v1938_v46, %v1937_v41  ;;  %v1781_v12 = vmul.f32 %v5683_v45, %v5683_v45  ;;  %v1556_v23 = vsel %vm1480_vm0, %v5683_v45, 0.0 }
 0x14b   : > { %10698 = vst [vmem:[#allocation31_spill] sm:$0xff] %v5686_v51  ;;  %v1552_v57 = vsel %vm1480_vm0, %v5686_v51, 0.0  ;;  %v1779_v58 = vmul.f32 %v5686_v51, %v5686_v51  ;;  %v5692_v60 = vpop.f32.mrb[38].mxu0 }
 0x14c   : > { %10699 = vst [vmem:[#allocation32_spill] sm:$0xff] %v5692_v60  ;;  %v1553_v1 = vadd.f32 %v1552_v57, %v1551_v49  ;;  %v5695_v4 = vpop.f32.mrb[39].mxu0  ;;  %v1941_v6 = vadd.f32 %v1940_v62, %v1939_v53  ;;  %v1782_v29 = vmul.f32 %v5692_v60, %v5692_v60  ;;  %v1558_v34 = vsel %vm1480_vm0, %v5692_v60, 0.0 }
 0x14d   : > { %10700 = vst [vmem:[#allocation33_spill] sm:$0xff] %v5695_v4  ;;  %v1942_v7 = vsel %vm1480_vm0, %v1779_v58, 0.0  ;;  %v1554_v11 = vsel %vm1480_vm0, %v5695_v4, 0.0  ;;  %v1780_v21 = vmul.f32 %v5695_v4, %v5695_v4  ;;  %v1946_v38 = vsel %vm1480_vm0, %v1781_v12, 0.0 }
 0x14e   : > { %v1555_v16 = vadd.f32 %v1554_v11, %v1553_v1  ;;  %v1943_v28 = vadd.f32 %v1942_v7, %v1941_v6  ;;  %v1948_v58 = vsel %vm1480_vm0, %v1782_v29, 0.0 }
 0x14f   : > { %v1944_v33 = vsel %vm1480_vm0, %v1780_v21, 0.0 }
 0x150   : > { %v1557_v30 = vadd.f32 %v1556_v23, %v1555_v16  ;;  %v1945_v36 = vadd.f32 %v1944_v33, %v1943_v28 }
 0x151   : > { %v5711_v37 = vpop.f32.mrb[40].mxu0 }
 0x152   : > { %10701 = vst [vmem:[#allocation34_spill] sm:$0xff] %v5711_v37  ;;  %v1559_v39 = vadd.f32 %v1558_v34, %v1557_v30  ;;  %v5714_v41 = vpop.f32.mrb[41].mxu0  ;;  %v1947_v46 = vadd.f32 %v1946_v38, %v1945_v36  ;;  %v1785_v12 = vmul.f32 %v5711_v37, %v5711_v37  ;;  %v1564_v23 = vsel %vm1480_vm0, %v5711_v37, 0.0 }
 0x153   : > { %10702 = vst [vmem:[#allocation35_spill] sm:$0xff] %v5714_v41  ;;  %v1560_v49 = vsel %vm1480_vm0, %v5714_v41, 0.0  ;;  %v1783_v53 = vmul.f32 %v5714_v41, %v5714_v41  ;;  %v5720_v57 = vpop.f32.mrb[42].mxu0 }
 0x154   : > { %10703 = vst [vmem:[#allocation36_spill] sm:$0xff] %v5720_v57  ;;  %v1561_v62 = vadd.f32 %v1560_v49, %v1559_v39  ;;  %v5723_v1 = vpop.f32.mrb[43].mxu0  ;;  %v1949_v6 = vadd.f32 %v1948_v58, %v1947_v46  ;;  %v1786_v29 = vmul.f32 %v5720_v57, %v5720_v57  ;;  %v1566_v34 = vsel %vm1480_vm0, %v5720_v57, 0.0 }
 0x155   : > { %10704 = vst [vmem:[#allocation37_spill] sm:$0xff] %v5723_v1  ;;  %v1950_v7 = vsel %vm1480_vm0, %v1783_v53, 0.0  ;;  %v1562_v11 = vsel %vm1480_vm0, %v5723_v1, 0.0  ;;  %v1784_v21 = vmul.f32 %v5723_v1, %v5723_v1  ;;  %v1954_v39 = vsel %vm1480_vm0, %v1785_v12, 0.0 }
 0x156   : > { %v1563_v16 = vadd.f32 %v1562_v11, %v1561_v62  ;;  %v1951_v28 = vadd.f32 %v1950_v7, %v1949_v6  ;;  %v1956_v7 = vsel %vm1480_vm0, %v1786_v29, 0.0 }
 0x157   : > { %v1952_v33 = vsel %vm1480_vm0, %v1784_v21, 0.0 }
 0x158   : > { %v1565_v30 = vadd.f32 %v1564_v23, %v1563_v16  ;;  %v1953_v36 = vadd.f32 %v1952_v33, %v1951_v28 }
 0x159   : > { %v5739_v38 = vpop.f32.mrb[44].mxu0 }
 0x15a   : > { %10705 = vst [vmem:[#allocation38_spill] sm:$0xff] %v5739_v38  ;;  %v1567_v46 = vadd.f32 %v1566_v34, %v1565_v30  ;;  %v5742_v49 = vpop.f32.mrb[45].mxu0  ;;  %v1955_v53 = vadd.f32 %v1954_v39, %v1953_v36  ;;  %v1789_v28 = vmul.f32 %v5739_v38, %v5739_v38  ;;  %v1572_v34 = vsel %vm1480_vm0, %v5739_v38, 0.0 }
 0x15b   : > { %10706 = vst [vmem:[#allocation39_spill] sm:$0xff] %v5742_v49  ;;  %v1568_v58 = vsel %vm1480_vm0, %v5742_v49, 0.0  ;;  %v1787_v62 = vmul.f32 %v5742_v49, %v5742_v49  ;;  %v5748_v6 = vpop.f32.mrb[46].mxu0 }
 0x15c   : > { %10707 = vst [vmem:[#allocation40_spill] sm:$0xff] %v5748_v6  ;;  %v1569_v11 = vadd.f32 %v1568_v58, %v1567_v46  ;;  %v5751_v16 = vpop.f32.mrb[47].mxu0  ;;  %v1957_v21 = vadd.f32 %v1956_v7, %v1955_v53  ;;  %v1790_v36 = vmul.f32 %v5748_v6, %v5748_v6  ;;  %v1574_v53 = vsel %vm1480_vm0, %v5748_v6, 0.0 }
 0x15d   : > { %10708 = vst [vmem:[#allocation41_spill] sm:$0xff] %v5751_v16  ;;  %v1958_v12 = vsel %vm1480_vm0, %v1787_v62, 0.0  ;;  %v1570_v23 = vsel %vm1480_vm0, %v5751_v16, 0.0  ;;  %v1788_v33 = vmul.f32 %v5751_v16, %v5751_v16  ;;  %v1962_v7 = vsel %vm1480_vm0, %v1789_v28, 0.0 }
 0x15e   : > { %v1571_v30 = vadd.f32 %v1570_v23, %v1569_v11  ;;  %v1959_v29 = vadd.f32 %v1958_v12, %v1957_v21 }
 0x15f   : > { %v1960_v46 = vsel %vm1480_vm0, %v1788_v33, 0.0  ;;  %v1964_v33 = vsel %vm1480_vm0, %v1790_v36, 0.0 }
 0x160   : > { %v1573_v39 = vadd.f32 %v1572_v34, %v1571_v30  ;;  %v1961_v58 = vadd.f32 %v1960_v46, %v1959_v29 }
 0x161   : > { %v5767_v62 = vpop.f32.mrb[48].mxu0 }
 0x162   : > { %10709 = vst [vmem:[#allocation42_spill] sm:$0xff] %v5767_v62  ;;  %v1575_v11 = vadd.f32 %v1574_v53, %v1573_v39  ;;  %v5770_v23 = vpop.f32.mrb[49].mxu0  ;;  %v1963_v16 = vadd.f32 %v1962_v7, %v1961_v58  ;;  %v1793_v53 = vmul.f32 %v5767_v62, %v5767_v62 }
 0x163   : > { %10710 = vst [vmem:[#allocation43_spill] sm:$0xff] %v5770_v23  ;;  %v1576_v21 = vsel %vm1480_vm0, %v5770_v23, 0.0  ;;  %v1791_v12 = vmul.f32 %v5770_v23, %v5770_v23  ;;  %v5776_v30 = vpop.f32.mrb[50].mxu0  ;;  %v1580_v23 = vsel %vm1480_vm0, %v5767_v62, 0.0 }
 0x164   : > { %10711 = vst [vmem:[#allocation44_spill] sm:$0xff] %v5776_v30  ;;  %v1577_v34 = vadd.f32 %v1576_v21, %v1575_v11  ;;  %v5779_v29 = vpop.f32.mrb[51].mxu0  ;;  %v1965_v46 = vadd.f32 %v1964_v33, %v1963_v16  ;;  %v1794_v11 = vmul.f32 %v5776_v30, %v5776_v30 }
 0x165   : > { %10712 = vst [vmem:[#allocation45_spill] sm:$0xff] %v5779_v29  ;;  %v1966_v28 = vsel %vm1480_vm0, %v1791_v12, 0.0  ;;  %v1578_v39 = vsel %vm1480_vm0, %v5779_v29, 0.0  ;;  %v1792_v7 = vmul.f32 %v5779_v29, %v5779_v29  ;;  %v1582_v12 = vsel %vm1480_vm0, %v5776_v30, 0.0 }
 0x166   : > { %v1579_v58 = vadd.f32 %v1578_v39, %v1577_v34  ;;  %v1967_v36 = vadd.f32 %v1966_v28, %v1965_v46  ;;  %v1970_v34 = vsel %vm1480_vm0, %v1793_v53, 0.0 }
 0x167   : > { %v1968_v21 = vsel %vm1480_vm0, %v1792_v7, 0.0 }
 0x168   : > { %v1581_v16 = vadd.f32 %v1580_v23, %v1579_v58  ;;  %v1969_v33 = vadd.f32 %v1968_v21, %v1967_v36  ;;  %v1972_v58 = vsel %vm1480_vm0, %v1794_v11, 0.0 }
 0x169   : > { %v5795_v6 = vpop.f32.mrb[52].mxu0 }
 0x16a   : > { %10713 = vst [vmem:[#allocation46_spill] sm:$0xff] %v5795_v6  ;;  %v1583_v39 = vadd.f32 %v1582_v12, %v1581_v16  ;;  %v5798_v29 = vpop.f32.mrb[53].mxu0  ;;  %v1971_v49 = vadd.f32 %v1970_v34, %v1969_v33  ;;  %v1797_v12 = vmul.f32 %v5795_v6, %v5795_v6 }
 0x16b   : > { %10714 = vst [vmem:[#allocation47_spill] sm:$0xff] %v5798_v29  ;;  %v1584_v46 = vsel %vm1480_vm0, %v5798_v29, 0.0  ;;  %v1795_v23 = vmul.f32 %v5798_v29, %v5798_v29  ;;  %v5804_v28 = vpop.f32.mrb[54].mxu0  ;;  %v1588_v29 = vsel %vm1480_vm0, %v5795_v6, 0.0 }
 0x16c   : > { %10715 = vst [vmem:[#allocation48_spill] sm:$0xff] %v5804_v28  ;;  %v1585_v7 = vadd.f32 %v1584_v46, %v1583_v39  ;;  %v5807_v36 = vpop.f32.mrb[55].mxu0  ;;  %v1973_v21 = vadd.f32 %v1972_v58, %v1971_v49  ;;  %v1798_v39 = vmul.f32 %v5804_v28, %v5804_v28 }
 0x16d   : > { %10716 = vst [vmem:[#allocation49_spill] sm:$0xff] %v5807_v36  ;;  %v1974_v53 = vsel %vm1480_vm0, %v1795_v23, 0.0  ;;  %v1586_v16 = vsel %vm1480_vm0, %v5807_v36, 0.0  ;;  %v1796_v34 = vmul.f32 %v5807_v36, %v5807_v36  ;;  %v1590_v23 = vsel %vm1480_vm0, %v5804_v28, 0.0 }
 0x16e   : > { %v1587_v33 = vadd.f32 %v1586_v16, %v1585_v7  ;;  %v1975_v11 = vadd.f32 %v1974_v53, %v1973_v21  ;;  %v1978_v7 = vsel %vm1480_vm0, %v1797_v12, 0.0 }
 0x16f   : > { %v1976_v46 = vsel %vm1480_vm0, %v1796_v34, 0.0 }
 0x170   : > { %v1589_v49 = vadd.f32 %v1588_v29, %v1587_v33  ;;  %v1977_v58 = vadd.f32 %v1976_v46, %v1975_v11  ;;  %v1980_v33 = vsel %vm1480_vm0, %v1798_v39, 0.0 }
 0x171   : > { %v5823_v30 = vpop.f32.mrb[56].mxu0 }
 0x172   : > { %10717 = vst [vmem:[#allocation50_spill] sm:$0xff] %v5823_v30  ;;  %v1591_v16 = vadd.f32 %v1590_v23, %v1589_v49  ;;  %v5826_v36 = vpop.f32.mrb[57].mxu0  ;;  %v1979_v62 = vadd.f32 %v1978_v7, %v1977_v58  ;;  %v1801_v23 = vmul.f32 %v5823_v30, %v5823_v30 }
 0x173   : > { %10718 = vst [vmem:[#allocation51_spill] sm:$0xff] %v5826_v36  ;;  %v1592_v21 = vsel %vm1480_vm0, %v5826_v36, 0.0  ;;  %v1799_v29 = vmul.f32 %v5826_v36, %v5826_v36  ;;  %v5832_v53 = vpop.f32.mrb[58].mxu0  ;;  %v1596_v36 = vsel %vm1480_vm0, %v5823_v30, 0.0 }
 0x174   : > { %10719 = vst [vmem:[#allocation52_spill] sm:$0xff] %v5832_v53  ;;  %v1593_v34 = vadd.f32 %v1592_v21, %v1591_v16  ;;  %v5835_v11 = vpop.f32.mrb[59].mxu0  ;;  %v1981_v46 = vadd.f32 %v1980_v33, %v1979_v62  ;;  %v1802_v16 = vmul.f32 %v5832_v53, %v5832_v53 }
 0x175   : > { %10720 = vst [vmem:[#allocation53_spill] sm:$0xff] %v5835_v11  ;;  %v1982_v12 = vsel %vm1480_vm0, %v1799_v29, 0.0  ;;  %v1594_v49 = vsel %vm1480_vm0, %v5835_v11, 0.0  ;;  %v1800_v7 = vmul.f32 %v5835_v11, %v5835_v11  ;;  %v1598_v29 = vsel %vm1480_vm0, %v5832_v53, 0.0 }
 0x176   : > { %v1595_v58 = vadd.f32 %v1594_v49, %v1593_v34  ;;  %v1983_v39 = vadd.f32 %v1982_v12, %v1981_v46  ;;  %v1986_v34 = vsel %vm1480_vm0, %v1801_v23, 0.0 }
 0x177   : > { %v1984_v21 = vsel %vm1480_vm0, %v1800_v7, 0.0 }
 0x178   : > { %v1597_v62 = vadd.f32 %v1596_v36, %v1595_v58  ;;  %v1985_v33 = vadd.f32 %v1984_v21, %v1983_v39  ;;  %v1988_v58 = vsel %vm1480_vm0, %v1802_v16, 0.0 }
 0x179   : > { %v5851_v28 = vpop.f32.mrb[60].mxu0 }
 0x17a   : > { %10721 = vst [vmem:[#allocation54_spill] sm:$0xff] %v5851_v28  ;;  %v1599_v49 = vadd.f32 %v1598_v29, %v1597_v62  ;;  %v5854_v11 = vpop.f32.mrb[61].mxu0  ;;  %v1987_v6 = vadd.f32 %v1986_v34, %v1985_v33  ;;  %v1805_v29 = vmul.f32 %v5851_v28, %v5851_v28 }
 0x17b   : > { %10722 = vst [vmem:[#allocation55_spill] sm:$0xff] %v5854_v11  ;;  %v1600_v46 = vsel %vm1480_vm0, %v5854_v11, 0.0  ;;  %v1803_v36 = vmul.f32 %v5854_v11, %v5854_v11  ;;  %v5860_v12 = vpop.f32.mrb[62].mxu0  ;;  %v1604_v11 = vsel %vm1480_vm0, %v5851_v28, 0.0 }
 0x17c   : > { %10723 = vst [vmem:[#allocation56_spill] sm:$0xff] %v5860_v12  ;;  %v1601_v7 = vadd.f32 %v1600_v46, %v1599_v49  ;;  %v5863_v39 = vpop.f32.mrb[63].mxu0  ;;  %v1989_v21 = vadd.f32 %v1988_v58, %v1987_v6  ;;  %v1806_v49 = vmul.f32 %v5860_v12, %v5860_v12 }
 0x17d   : > { %10724 = vst [vmem:[#allocation57_spill] sm:$0xff] %v5863_v39  ;;  %v1990_v23 = vsel %vm1480_vm0, %v1803_v36, 0.0  ;;  %v1602_v62 = vsel %vm1480_vm0, %v5863_v39, 0.0  ;;  %v1804_v34 = vmul.f32 %v5863_v39, %v5863_v39  ;;  %v1606_v36 = vsel %vm1480_vm0, %v5860_v12, 0.0 }
 0x17e   : > { %v1603_v33 = vadd.f32 %v1602_v62, %v1601_v7  ;;  %v1991_v16 = vadd.f32 %v1990_v23, %v1989_v21  ;;  %v1994_v7 = vsel %vm1480_vm0, %v1805_v29, 0.0 }
 0x17f   : > { %v1992_v46 = vsel %vm1480_vm0, %v1804_v34, 0.0 }
 0x180   : > { %v1605_v6 = vadd.f32 %v1604_v11, %v1603_v33  ;;  %v1993_v58 = vadd.f32 %v1992_v46, %v1991_v16  ;;  %v1996_v33 = vsel %vm1480_vm0, %v1806_v49, 0.0 }
 0x181   : > { %v5879_v53 = vpop.f32.mrb[64].mxu0 }
 0x182   : > { %10725 = vst [vmem:[#allocation58_spill] sm:$0xff] %v5879_v53  ;;  %v1607_v62 = vadd.f32 %v1606_v36, %v1605_v6  ;;  %v5882_v39 = vpop.f32.mrb[65].mxu0  ;;  %v1995_v30 = vadd.f32 %v1994_v7, %v1993_v58  ;;  %v1809_v36 = vmul.f32 %v5879_v53, %v5879_v53 }
 0x183   : > { %10726 = vst [vmem:[#allocation59_spill] sm:$0xff] %v5882_v39  ;;  %v1608_v21 = vsel %vm1480_vm0, %v5882_v39, 0.0  ;;  %v1807_v11 = vmul.f32 %v5882_v39, %v5882_v39  ;;  %v5888_v23 = vpop.f32.mrb[66].mxu0  ;;  %v1612_v39 = vsel %vm1480_vm0, %v5879_v53, 0.0 }
 0x184   : > { %10727 = vst [vmem:[#allocation60_spill] sm:$0xff] %v5888_v23  ;;  %v1609_v34 = vadd.f32 %v1608_v21, %v1607_v62  ;;  %v5891_v16 = vpop.f32.mrb[67].mxu0  ;;  %v1997_v46 = vadd.f32 %v1996_v33, %v1995_v30  ;;  %v1810_v62 = vmul.f32 %v5888_v23, %v5888_v23 }
 0x185   : > { %10728 = vst [vmem:[#allocation61_spill] sm:$0xff] %v5891_v16  ;;  %v1998_v29 = vsel %vm1480_vm0, %v1807_v11, 0.0  ;;  %v1610_v6 = vsel %vm1480_vm0, %v5891_v16, 0.0  ;;  %v1808_v7 = vmul.f32 %v5891_v16, %v5891_v16  ;;  %v1614_v11 = vsel %vm1480_vm0, %v5888_v23, 0.0 }
 0x186   : > { %v1611_v58 = vadd.f32 %v1610_v6, %v1609_v34  ;;  %v1999_v49 = vadd.f32 %v1998_v29, %v1997_v46  ;;  %v2002_v34 = vsel %vm1480_vm0, %v1809_v36, 0.0 }
 0x187   : > { %v2000_v21 = vsel %vm1480_vm0, %v1808_v7, 0.0 }
 0x188   : > { %v1613_v30 = vadd.f32 %v1612_v39, %v1611_v58  ;;  %v2001_v33 = vadd.f32 %v2000_v21, %v1999_v49  ;;  %v2004_v58 = vsel %vm1480_vm0, %v1810_v62, 0.0 }
 0x189   : > { %v5907_v12 = vpop.f32.mrb[68].mxu0 }
 0x18a   : > { %10729 = vst [vmem:[#allocation62_spill] sm:$0xff] %v5907_v12  ;;  %v5910_v6 = vpop.f32.mrb[69].mxu0  ;;  %v1615_v16 = vadd.f32 %v1614_v11, %v1613_v30  ;;  %v2003_v28 = vadd.f32 %v2002_v34, %v2001_v33  ;;  %v1813_v11 = vmul.f32 %v5907_v12, %v5907_v12 }
 0x18b   : > { %10730 = vst [vmem:[#allocation63_spill] sm:$0xff] %v5910_v6  ;;  %v1616_v46 = vsel %vm1480_vm0, %v5910_v6, 0.0  ;;  %v1811_v39 = vmul.f32 %v5910_v6, %v5910_v6  ;;  %v5916_v29 = vpop.f32.mrb[70].mxu0  ;;  %v1620_v6 = vsel %vm1480_vm0, %v5907_v12, 0.0 }
 0x18c   : > { %10731 = vst [vmem:[#allocation64_spill] sm:$0xff] %v5916_v29  ;;  %v1617_v7 = vadd.f32 %v1616_v46, %v1615_v16  ;;  %v5919_v49 = vpop.f32.mrb[71].mxu0  ;;  %v2005_v21 = vadd.f32 %v2004_v58, %v2003_v28  ;;  %v1814_v16 = vmul.f32 %v5916_v29, %v5916_v29 }
 0x18d   : > { %10732 = vst [vmem:[#allocation65_spill] sm:$0xff] %v5919_v49  ;;  %v2006_v36 = vsel %vm1480_vm0, %v1811_v39, 0.0  ;;  %v1618_v30 = vsel %vm1480_vm0, %v5919_v49, 0.0  ;;  %v1812_v34 = vmul.f32 %v5919_v49, %v5919_v49  ;;  %v1622_v39 = vsel %vm1480_vm0, %v5916_v29, 0.0 }
 0x18e   : > { %v1619_v33 = vadd.f32 %v1618_v30, %v1617_v7  ;;  %v2007_v62 = vadd.f32 %v2006_v36, %v2005_v21  ;;  %v2010_v7 = vsel %vm1480_vm0, %v1813_v11, 0.0 }
 0x18f   : > { %v2008_v46 = vsel %vm1480_vm0, %v1812_v34, 0.0 }
 0x190   : > { %v1621_v28 = vadd.f32 %v1620_v6, %v1619_v33  ;;  %v2009_v58 = vadd.f32 %v2008_v46, %v2007_v62  ;;  %v2012_v33 = vsel %vm1480_vm0, %v1814_v16, 0.0 }
 0x191   : > { %v5935_v23 = vpop.f32.mrb[72].mxu0 }
 0x192   : > { %10733 = vst [vmem:[#allocation66_spill] sm:$0xff] %v5935_v23  ;;  %v5938_v30 = vpop.f32.mrb[73].mxu0  ;;  %v1623_v49 = vadd.f32 %v1622_v39, %v1621_v28  ;;  %v2011_v53 = vadd.f32 %v2010_v7, %v2009_v58  ;;  %v1817_v39 = vmul.f32 %v5935_v23, %v5935_v23 }
 0x193   : > { %10734 = vst [vmem:[#allocation67_spill] sm:$0xff] %v5938_v30  ;;  %v1624_v21 = vsel %vm1480_vm0, %v5938_v30, 0.0  ;;  %v1815_v6 = vmul.f32 %v5938_v30, %v5938_v30  ;;  %v5944_v36 = vpop.f32.mrb[74].mxu0  ;;  %v1628_v30 = vsel %vm1480_vm0, %v5935_v23, 0.0 }
 0x194   : > { %10735 = vst [vmem:[#allocation68_spill] sm:$0xff] %v5944_v36  ;;  %v1625_v34 = vadd.f32 %v1624_v21, %v1623_v49  ;;  %v5947_v62 = vpop.f32.mrb[75].mxu0  ;;  %v2013_v46 = vadd.f32 %v2012_v33, %v2011_v53  ;;  %v1818_v49 = vmul.f32 %v5944_v36, %v5944_v36 }
 0x195   : > { %10736 = vst [vmem:[#allocation69_spill] sm:$0xff] %v5947_v62  ;;  %v2014_v11 = vsel %vm1480_vm0, %v1815_v6, 0.0  ;;  %v1626_v28 = vsel %vm1480_vm0, %v5947_v62, 0.0  ;;  %v1816_v7 = vmul.f32 %v5947_v62, %v5947_v62  ;;  %v1630_v6 = vsel %vm1480_vm0, %v5944_v36, 0.0 }
 0x196   : > { %v1627_v58 = vadd.f32 %v1626_v28, %v1625_v34  ;;  %v2015_v16 = vadd.f32 %v2014_v11, %v2013_v46  ;;  %v2018_v34 = vsel %vm1480_vm0, %v1817_v39, 0.0 }
 0x197   : > { %v2016_v21 = vsel %vm1480_vm0, %v1816_v7, 0.0 }
 0x198   : > { %v1629_v53 = vadd.f32 %v1628_v30, %v1627_v58  ;;  %v2017_v33 = vadd.f32 %v2016_v21, %v2015_v16  ;;  %v2020_v58 = vsel %vm1480_vm0, %v1818_v49, 0.0 }
 0x199   : > { %v5963_v29 = vpop.f32.mrb[76].mxu0 }
 0x19a   : > { %10737 = vst [vmem:[#allocation70_spill] sm:$0xff] %v5963_v29  ;;  %v5966_v28 = vpop.f32.mrb[77].mxu0  ;;  %v1631_v62 = vadd.f32 %v1630_v6, %v1629_v53  ;;  %v2019_v12 = vadd.f32 %v2018_v34, %v2017_v33  ;;  %v1821_v6 = vmul.f32 %v5963_v29, %v5963_v29 }
 0x19b   : > { %10738 = vst [vmem:[#allocation71_spill] sm:$0xff] %v5966_v28  ;;  %v1632_v46 = vsel %vm1480_vm0, %v5966_v28, 0.0  ;;  %v1819_v30 = vmul.f32 %v5966_v28, %v5966_v28  ;;  %v5972_v11 = vpop.f32.mrb[78].mxu0  ;;  %v1636_v28 = vsel %vm1480_vm0, %v5963_v29, 0.0 }
 0x19c   : > { %10739 = vst [vmem:[#allocation72_spill] sm:$0xff] %v5972_v11  ;;  %v1633_v7 = vadd.f32 %v1632_v46, %v1631_v62  ;;  %v5975_v16 = vpop.f32.mrb[79].mxu0  ;;  %v2021_v21 = vadd.f32 %v2020_v58, %v2019_v12  ;;  %v1822_v62 = vmul.f32 %v5972_v11, %v5972_v11 }
 0x19d   : > { %10740 = vst [vmem:[#allocation73_spill] sm:$0xff] %v5975_v16  ;;  %v2022_v39 = vsel %vm1480_vm0, %v1819_v30, 0.0  ;;  %v1634_v53 = vsel %vm1480_vm0, %v5975_v16, 0.0  ;;  %v1820_v34 = vmul.f32 %v5975_v16, %v5975_v16  ;;  %v1638_v30 = vsel %vm1480_vm0, %v5972_v11, 0.0 }
 0x19e   : > { %v1635_v33 = vadd.f32 %v1634_v53, %v1633_v7  ;;  %v2023_v49 = vadd.f32 %v2022_v39, %v2021_v21  ;;  %v2026_v7 = vsel %vm1480_vm0, %v1821_v6, 0.0 }
 0x19f   : > { %v2024_v46 = vsel %vm1480_vm0, %v1820_v34, 0.0 }
 0x1a0   : > { %v1637_v12 = vadd.f32 %v1636_v28, %v1635_v33  ;;  %v2025_v58 = vadd.f32 %v2024_v46, %v2023_v49  ;;  %v2028_v33 = vsel %vm1480_vm0, %v1822_v62, 0.0 }
 0x1a1   : > { %v5991_v36 = vpop.f32.mrb[80].mxu0 }
 0x1a2   : > { %10741 = vst [vmem:[#allocation74_spill] sm:$0xff] %v5991_v36  ;;  %v5994_v53 = vpop.f32.mrb[81].mxu0  ;;  %v1639_v16 = vadd.f32 %v1638_v30, %v1637_v12  ;;  %v2027_v23 = vadd.f32 %v2026_v7, %v2025_v58  ;;  %v1825_v30 = vmul.f32 %v5991_v36, %v5991_v36 }
 0x1a3   : > { %10742 = vst [vmem:[#allocation75_spill] sm:$0xff] %v5994_v53  ;;  %v1640_v21 = vsel %vm1480_vm0, %v5994_v53, 0.0  ;;  %v1823_v28 = vmul.f32 %v5994_v53, %v5994_v53  ;;  %v6000_v39 = vpop.f32.mrb[82].mxu0  ;;  %v1644_v53 = vsel %vm1480_vm0, %v5991_v36, 0.0 }
 0x1a4   : > { %10743 = vst [vmem:[#allocation76_spill] sm:$0xff] %v6000_v39  ;;  %v1641_v34 = vadd.f32 %v1640_v21, %v1639_v16  ;;  %v6003_v49 = vpop.f32.mrb[83].mxu0  ;;  %v2029_v46 = vadd.f32 %v2028_v33, %v2027_v23  ;;  %v1826_v16 = vmul.f32 %v6000_v39, %v6000_v39 }
 0x1a5   : > { %10744 = vst [vmem:[#allocation77_spill] sm:$0xff] %v6003_v49  ;;  %v2030_v6 = vsel %vm1480_vm0, %v1823_v28, 0.0  ;;  %v1642_v12 = vsel %vm1480_vm0, %v6003_v49, 0.0  ;;  %v1824_v7 = vmul.f32 %v6003_v49, %v6003_v49  ;;  %v1646_v28 = vsel %vm1480_vm0, %v6000_v39, 0.0 }
 0x1a6   : > { %v1643_v58 = vadd.f32 %v1642_v12, %v1641_v34  ;;  %v2031_v62 = vadd.f32 %v2030_v6, %v2029_v46  ;;  %v2034_v34 = vsel %vm1480_vm0, %v1825_v30, 0.0 }
 0x1a7   : > { %v2032_v21 = vsel %vm1480_vm0, %v1824_v7, 0.0 }
 0x1a8   : > { %v1645_v23 = vadd.f32 %v1644_v53, %v1643_v58  ;;  %v2033_v33 = vadd.f32 %v2032_v21, %v2031_v62  ;;  %v2036_v58 = vsel %vm1480_vm0, %v1826_v16, 0.0 }
 0x1a9   : > { %v6019_v11 = vpop.f32.mrb[84].mxu0 }
 0x1aa   : > { %10745 = vst [vmem:[#allocation78_spill] sm:$0xff] %v6019_v11  ;;  %v6022_v12 = vpop.f32.mrb[85].mxu0  ;;  %v1647_v49 = vadd.f32 %v1646_v28, %v1645_v23  ;;  %v2035_v29 = vadd.f32 %v2034_v34, %v2033_v33  ;;  %v1829_v28 = vmul.f32 %v6019_v11, %v6019_v11 }
 0x1ab   : > { %10746 = vst [vmem:[#allocation79_spill] sm:$0xff] %v6022_v12  ;;  %v1648_v46 = vsel %vm1480_vm0, %v6022_v12, 0.0  ;;  %v1827_v53 = vmul.f32 %v6022_v12, %v6022_v12  ;;  %v6028_v6 = vpop.f32.mrb[86].mxu0  ;;  %v1652_v12 = vsel %vm1480_vm0, %v6019_v11, 0.0 }
 0x1ac   : > { %10747 = vst [vmem:[#allocation80_spill] sm:$0xff] %v6028_v6  ;;  %v1649_v7 = vadd.f32 %v1648_v46, %v1647_v49  ;;  %v6031_v62 = vpop.f32.mrb[87].mxu0  ;;  %v2037_v21 = vadd.f32 %v2036_v58, %v2035_v29  ;;  %v1830_v49 = vmul.f32 %v6028_v6, %v6028_v6 }
 0x1ad   : > { %10748 = vst [vmem:[#allocation81_spill] sm:$0xff] %v6031_v62  ;;  %v2038_v30 = vsel %vm1480_vm0, %v1827_v53, 0.0  ;;  %v1650_v23 = vsel %vm1480_vm0, %v6031_v62, 0.0  ;;  %v1828_v34 = vmul.f32 %v6031_v62, %v6031_v62  ;;  %v1654_v53 = vsel %vm1480_vm0, %v6028_v6, 0.0 }
 0x1ae   : > { %v1651_v33 = vadd.f32 %v1650_v23, %v1649_v7  ;;  %v2039_v16 = vadd.f32 %v2038_v30, %v2037_v21  ;;  %v2042_v7 = vsel %vm1480_vm0, %v1829_v28, 0.0 }
 0x1af   : > { %v2040_v46 = vsel %vm1480_vm0, %v1828_v34, 0.0 }
 0x1b0   : > { %v1653_v29 = vadd.f32 %v1652_v12, %v1651_v33  ;;  %v2041_v58 = vadd.f32 %v2040_v46, %v2039_v16  ;;  %v2044_v33 = vsel %vm1480_vm0, %v1830_v49, 0.0 }
 0x1b1   : > { %v6047_v39 = vpop.f32.mrb[88].mxu0 }
 0x1b2   : > { %10749 = vst [vmem:[#allocation82_spill] sm:$0xff] %v6047_v39  ;;  %v6050_v23 = vpop.f32.mrb[89].mxu0  ;;  %v1655_v62 = vadd.f32 %v1654_v53, %v1653_v29  ;;  %v2043_v36 = vadd.f32 %v2042_v7, %v2041_v58  ;;  %v1833_v53 = vmul.f32 %v6047_v39, %v6047_v39 }
 0x1b3   : > { %10750 = vst [vmem:[#allocation83_spill] sm:$0xff] %v6050_v23  ;;  %v1656_v21 = vsel %vm1480_vm0, %v6050_v23, 0.0  ;;  %v1831_v12 = vmul.f32 %v6050_v23, %v6050_v23  ;;  %v6056_v30 = vpop.f32.mrb[90].mxu0  ;;  %v1660_v23 = vsel %vm1480_vm0, %v6047_v39, 0.0 }
 0x1b4   : > { %10751 = vst [vmem:[#allocation84_spill] sm:$0xff] %v6056_v30  ;;  %v1657_v34 = vadd.f32 %v1656_v21, %v1655_v62  ;;  %v6059_v16 = vpop.f32.mrb[91].mxu0  ;;  %v2045_v46 = vadd.f32 %v2044_v33, %v2043_v36  ;;  %v1834_v62 = vmul.f32 %v6056_v30, %v6056_v30 }
 0x1b5   : > { %10752 = vst [vmem:[#allocation85_spill] sm:$0xff] %v6059_v16  ;;  %v2046_v28 = vsel %vm1480_vm0, %v1831_v12, 0.0  ;;  %v1658_v29 = vsel %vm1480_vm0, %v6059_v16, 0.0  ;;  %v1832_v7 = vmul.f32 %v6059_v16, %v6059_v16  ;;  %v1662_v12 = vsel %vm1480_vm0, %v6056_v30, 0.0 }
 0x1b6   : > { %v1659_v58 = vadd.f32 %v1658_v29, %v1657_v34  ;;  %v2047_v49 = vadd.f32 %v2046_v28, %v2045_v46  ;;  %v2050_v34 = vsel %vm1480_vm0, %v1833_v53, 0.0 }
 0x1b7   : > { %v2048_v21 = vsel %vm1480_vm0, %v1832_v7, 0.0 }
 0x1b8   : > { %v1661_v36 = vadd.f32 %v1660_v23, %v1659_v58  ;;  %v2049_v33 = vadd.f32 %v2048_v21, %v2047_v49  ;;  %v2052_v58 = vsel %vm1480_vm0, %v1834_v62, 0.0 }
 0x1b9   : > { %v6075_v6 = vpop.f32.mrb[92].mxu0 }
 0x1ba   : > { %10753 = vst [vmem:[#allocation86_spill] sm:$0xff] %v6075_v6  ;;  %v6078_v29 = vpop.f32.mrb[93].mxu0  ;;  %v1663_v16 = vadd.f32 %v1662_v12, %v1661_v36  ;;  %v2051_v11 = vadd.f32 %v2050_v34, %v2049_v33  ;;  %v1837_v12 = vmul.f32 %v6075_v6, %v6075_v6 }
 0x1bb   : > { %10754 = vst [vmem:[#allocation87_spill] sm:$0xff] %v6078_v29  ;;  %v1664_v46 = vsel %vm1480_vm0, %v6078_v29, 0.0  ;;  %v1835_v23 = vmul.f32 %v6078_v29, %v6078_v29  ;;  %v6084_v28 = vpop.f32.mrb[94].mxu0  ;;  %v1668_v29 = vsel %vm1480_vm0, %v6075_v6, 0.0 }
 0x1bc   : > { %10755 = vst [vmem:[#allocation88_spill] sm:$0xff] %v6084_v28  ;;  %v1665_v7 = vadd.f32 %v1664_v46, %v1663_v16  ;;  %v6087_v49 = vpop.f32.mrb[95].mxu0  ;;  %v2053_v21 = vadd.f32 %v2052_v58, %v2051_v11  ;;  %v1838_v16 = vmul.f32 %v6084_v28, %v6084_v28 }
 0x1bd   : > { %10756 = vst [vmem:[#allocation89_spill] sm:$0xff] %v6087_v49  ;;  %v2054_v53 = vsel %vm1480_vm0, %v1835_v23, 0.0  ;;  %v1666_v36 = vsel %vm1480_vm0, %v6087_v49, 0.0  ;;  %v1836_v34 = vmul.f32 %v6087_v49, %v6087_v49  ;;  %v1670_v23 = vsel %vm1480_vm0, %v6084_v28, 0.0 }
 0x1be   : > { %v1667_v33 = vadd.f32 %v1666_v36, %v1665_v7  ;;  %v2055_v62 = vadd.f32 %v2054_v53, %v2053_v21  ;;  %v2058_v7 = vsel %vm1480_vm0, %v1837_v12, 0.0 }
 0x1bf   : > { %v2056_v46 = vsel %vm1480_vm0, %v1836_v34, 0.0 }
 0x1c0   : > { %v1669_v11 = vadd.f32 %v1668_v29, %v1667_v33  ;;  %v2057_v58 = vadd.f32 %v2056_v46, %v2055_v62  ;;  %v2060_v33 = vsel %vm1480_vm0, %v1838_v16, 0.0 }
 0x1c1   : > { %v6103_v30 = vpop.f32.mrb[96].mxu0 }
 0x1c2   : > { %v6106_v36 = vpop.f32.mrb[97].mxu0  ;;  %v1671_v49 = vadd.f32 %v1670_v23, %v1669_v11  ;;  %v2059_v39 = vadd.f32 %v2058_v7, %v2057_v58  ;;  %v1841_v23 = vmul.f32 %v6103_v30, %v6103_v30 }
 0x1c3   : > { %10757 = vst [vmem:[#allocation90_spill] sm:$0xff] %v6106_v36  ;;  %v1672_v21 = vsel %vm1480_vm0, %v6106_v36, 0.0  ;;  %v1839_v29 = vmul.f32 %v6106_v36, %v6106_v36  ;;  %v6112_v53 = vpop.f32.mrb[98].mxu0  ;;  %v1676_v36 = vsel %vm1480_vm0, %v6103_v30, 0.0 }
 0x1c4   : > { %10758 = vst [vmem:[#allocation91_spill] sm:$0xff] %v6112_v53  ;;  %v1673_v34 = vadd.f32 %v1672_v21, %v1671_v49  ;;  %v6115_v62 = vpop.f32.mrb[99].mxu0  ;;  %v2061_v46 = vadd.f32 %v2060_v33, %v2059_v39  ;;  %v1842_v49 = vmul.f32 %v6112_v53, %v6112_v53 }
 0x1c5   : > { %10759 = vst [vmem:[#allocation92_spill] sm:$0xff] %v6115_v62  ;;  %v2062_v12 = vsel %vm1480_vm0, %v1839_v29, 0.0  ;;  %v1674_v11 = vsel %vm1480_vm0, %v6115_v62, 0.0  ;;  %v1840_v7 = vmul.f32 %v6115_v62, %v6115_v62  ;;  %v1678_v29 = vsel %vm1480_vm0, %v6112_v53, 0.0 }
 0x1c6   : > { %v1675_v58 = vadd.f32 %v1674_v11, %v1673_v34  ;;  %v2063_v16 = vadd.f32 %v2062_v12, %v2061_v46  ;;  %v2066_v34 = vsel %vm1480_vm0, %v1841_v23, 0.0  ;;  %v6139_v46 = vld [vmem:[%s10471_s4] ss:$0 sm:$0xff] }
 0x1c7   : > { %v2064_v21 = vsel %vm1480_vm0, %v1840_v7, 0.0 }
 0x1c8   : > { %v1677_v39 = vadd.f32 %v1676_v36, %v1675_v58  ;;  %v2065_v33 = vadd.f32 %v2064_v21, %v2063_v16  ;;  %v2068_v16 = vsel %vm1480_vm0, %v1842_v49, 0.0 }
 0x1c9   : > { %v6131_v28 = vpop.f32.mrb[100].mxu0 }
 0x1ca   : > { %10760 = vst [vmem:[#allocation93_spill] sm:$0xff] %v6131_v28  ;;  %v6134_v11 = vpop.f32.mrb[101].mxu0  ;;  %v1679_v62 = vadd.f32 %v1678_v29, %v1677_v39  ;;  %v2067_v12 = vadd.f32 %v2066_v34, %v2065_v33  ;;  %v6155_v33 = vmul.f32 %v5424_v63, %v6139_v46  ;;  %v1845_v34 = vmul.f32 %v6131_v28, %v6131_v28 }
 0x1cb   : > { %10761 = vst [vmem:[#allocation94_spill] sm:$0xff] %v6134_v11  ;;  %v1680_v36 = vsel %vm1480_vm0, %v6134_v11, 0.0  ;;  %v1843_v58 = vmul.f32 %v6134_v11, %v6134_v11  ;;  %v6145_v7 = vpop.f32.mrb[102].mxu0 }
 0x1cc   : > { %v1681_v23 = vadd.f32 %v1680_v36, %v1679_v62  ;;  %v6148_v21 = vpop.f32.mrb[103].mxu0  ;;  %v2069_v39 = vadd.f32 %v2068_v16, %v2067_v12  ;;  %10762 = vst [vmem:[#allocation95_spill] sm:$0xff] %v6155_v33  ;;  %v6163_v62 = vmul.f32 %v6139_v46, %v5426_v0  ;;  %v6167_v12 = vmul.f32 %v5431_v3, %v6139_v46  ;;  %v6995_v0 = vld [vmem:[%s10469_s2] ss:$0 sm:$0xff] }
 0x1cd   : > { %v2070_v29 = vsel %vm1480_vm0, %v1843_v58, 0.0  ;;  %v1682_v53 = vsel %vm1480_vm0, %v6148_v21, 0.0  ;;  %v1844_v49 = vmul.f32 %v6148_v21, %v6148_v21  ;;  %v1684_v36 = vsel %vm1480_vm0, %v6131_v28, 0.0 }
 0x1ce   : > { %v1683_v11 = vadd.f32 %v1682_v53, %v1681_v23  ;;  %10763 = vst [vmem:[#allocation96_spill] sm:$0xff] %v6163_v62  ;;  %10764 = vst [vmem:[#allocation97_spill] sm:$0xff] %v6167_v12  ;;  %v2071_v58 = vadd.f32 %v2070_v29, %v2069_v39  ;;  %v6173_v16 = vmul.f32 %v6139_v46, %v5434_v5  ;;  %v1686_v39 = vsel %vm1480_vm0, %v6145_v7, 0.0 }
 0x1cf   : > { %v1846_v53 = vmul.f32 %v6145_v7, %v6145_v7  ;;  %v2072_v33 = vsel %vm1480_vm0, %v1844_v49, 0.0  ;;  %v6180_v62 = vmul.f32 %v5453_v19, %v6139_v46  ;;  %v6184_v12 = vmul.f32 %v6139_v46, %v5455_v22 }
 0x1d0   : > { %10765 = vst [vmem:[#allocation98_spill] sm:$0xff] %v6173_v16  ;;  %v1685_v23 = vadd.f32 %v1684_v36, %v1683_v11  ;;  %v2073_v29 = vadd.f32 %v2072_v33, %v2071_v58  ;;  %v6192_v16 = vmul.f32 %v5463_v27, %v6139_v46  ;;  %v6196_v11 = vmul.f32 %v6139_v46, %v5466_v31 }
 0x1d1   : > { %10766 = vst [vmem:[#allocation99_spill] sm:$0xff] %v6180_v62  ;;  %10767 = vst [vmem:[#allocation100_spill] sm:$0xff] %v6184_v12  ;;  %v6188_v3 = vpop.f32.mrb[104].mxu0  ;;  %v2074_v49 = vsel %vm1480_vm0, %v1845_v34, 0.0  ;;  %v6203_v12 = vmul.f32 %v5482_v44, %v6139_v46  ;;  %v6217_v34 = vmul.f32 %v5492_v52, %v6139_v46 }
 0x1d2   : > { %10768 = vst [vmem:[#allocation101_spill] sm:$0xff] %v6192_v16  ;;  %10769 = vst [vmem:[#allocation102_spill] sm:$0xff] %v6196_v11  ;;  %v6199_v36 = vpop.f32.mrb[105].mxu0  ;;  %v1687_v62 = vadd.f32 %v1686_v39, %v1685_v23  ;;  %v2075_v33 = vadd.f32 %v2074_v49, %v2073_v29  ;;  %v6213_v11 = vmul.f32 %v6139_v46, %v5485_v47  ;;  %v2076_v23 = vsel %vm1480_vm0, %v1846_v53, 0.0 }
 0x1d3   : > { %10770 = vst [vmem:[#allocation103_spill] sm:$0xff] %v6203_v12  ;;  %v1688_v58 = vsel %vm1480_vm0, %v6199_v36, 0.0  ;;  %v1847_v16 = vmul.f32 %v6199_v36, %v6199_v36  ;;  %v6209_v27 = vpop.f32.mrb[106].mxu0  ;;  %10772 = vst [vmem:[#allocation105_spill] sm:$0xff] %v6217_v34  ;;  %v6224_v49 = vmul.f32 %v6139_v46, %v5496_v56  ;;  %v1849_v53 = vmul.f32 %v6188_v3, %v6188_v3 }
 0x1d4   : > { %10771 = vst [vmem:[#allocation104_spill] sm:$0xff] %v6213_v11  ;;  %v1689_v39 = vadd.f32 %v1688_v58, %v1687_v62  ;;  %v6220_v29 = vpop.f32.mrb[107].mxu0  ;;  %v2077_v12 = vadd.f32 %v2076_v23, %v2075_v33  ;;  %v6231_v11 = vmul.f32 %v5512_v10, %v6139_v46  ;;  %v6239_v34 = vmul.f32 %v6139_v46, %v5515_v13 }
 0x1d5   : > { %10773 = vst [vmem:[#allocation106_spill] sm:$0xff] %v6224_v49  ;;  %v2078_v44 = vsel %vm1480_vm0, %v1847_v16, 0.0  ;;  %v1690_v47 = vsel %vm1480_vm0, %v6220_v29, 0.0  ;;  %v1848_v58 = vmul.f32 %v6220_v29, %v6220_v29  ;;  %v6243_v16 = vmul.f32 %v5522_v18, %v6139_v46 }
 0x1d6   : > { %10774 = vst [vmem:[#allocation107_spill] sm:$0xff] %v6231_v11  ;;  %v1691_v62 = vadd.f32 %v1690_v47, %v1689_v39  ;;  %10775 = vst [vmem:[#allocation108_spill] sm:$0xff] %v6239_v34  ;;  %v1692_v33 = vsel %vm1480_vm0, %v6188_v3, 0.0  ;;  %v2079_v23 = vadd.f32 %v2078_v44, %v2077_v12  ;;  %v6249_v11 = vmul.f32 %v6139_v46, %v5526_v24  ;;  %v11019_v24 = vld [vmem:[#allocation82_spill] sm:$0xff] }
 0x1d7   : > { %10776 = vst [vmem:[#allocation109_spill] sm:$0xff] %v6243_v16  ;;  %v1850_v47 = vmul.f32 %v6209_v27, %v6209_v27  ;;  %v2080_v49 = vsel %vm1480_vm0, %v1848_v58, 0.0  ;;  %v6256_v34 = vmul.f32 %v5542_v40, %v6139_v46  ;;  %v6260_v16 = vmul.f32 %v6139_v46, %v5545_v43 }
 0x1d8   : > { %10777 = vst [vmem:[#allocation110_spill] sm:$0xff] %v6249_v11  ;;  %v1693_v39 = vadd.f32 %v1692_v33, %v1691_v62  ;;  %v1694_v44 = vsel %vm1480_vm0, %v6209_v27, 0.0  ;;  %v2081_v12 = vadd.f32 %v2080_v49, %v2079_v23  ;;  %v6268_v11 = vmul.f32 %v5552_v50, %v6139_v46 }
 0x1d9   : > { %10778 = vst [vmem:[#allocation111_spill] sm:$0xff] %v6256_v34  ;;  %10779 = vst [vmem:[#allocation112_spill] sm:$0xff] %v6260_v16  ;;  %v6264_v18 = vpop.f32.mrb[108].mxu0  ;;  %v6272_v62 = vmul.f32 %v6139_v46, %v5555_v54  ;;  %v2082_v58 = vsel %vm1480_vm0, %v1849_v53, 0.0  ;;  %v6279_v16 = vmul.f32 %v5571_v9, %v6139_v46  ;;  %v6293_v53 = vmul.f32 %v5580_v20, %v6139_v46  ;;  %v11010_v54 = vld [vmem:[#allocation70_spill] sm:$0xff]  ;;  %v11017_v20 = vld [vmem:[#allocation80_spill] sm:$0xff] }
 0x1da   : > { %10780 = vst [vmem:[#allocation113_spill] sm:$0xff] %v6268_v11  ;;  %v6275_v33 = vpop.f32.mrb[109].mxu0  ;;  %v1695_v34 = vadd.f32 %v1694_v44, %v1693_v39  ;;  %v2083_v49 = vadd.f32 %v2082_v58, %v2081_v12  ;;  %v2084_v39 = vsel %vm1480_vm0, %v1850_v47, 0.0  ;;  %v6300_v58 = vmul.f32 %v6139_v46, %v5583_v25 }
 0x1db   : > { %10781 = vst [vmem:[#allocation114_spill] sm:$0xff] %v6272_v62  ;;  %10782 = vst [vmem:[#allocation115_spill] sm:$0xff] %v6279_v16  ;;  %v1696_v23 = vsel %vm1480_vm0, %v6275_v33, 0.0  ;;  %v1851_v11 = vmul.f32 %v6275_v33, %v6275_v33  ;;  %v6285_v50 = vpop.f32.mrb[110].mxu0  ;;  %v6289_v62 = vmul.f32 %v6139_v46, %v5574_v14  ;;  %v1853_v47 = vmul.f32 %v6264_v18, %v6264_v18 }
 0x1dc   : > { %10784 = vst [vmem:[#allocation117_spill] sm:$0xff] %v6293_v53  ;;  %v1697_v44 = vadd.f32 %v1696_v23, %v1695_v34  ;;  %v6296_v12 = vpop.f32.mrb[111].mxu0  ;;  %10785 = vst [vmem:[#allocation118_spill] sm:$0xff] %v6300_v58  ;;  %v2085_v16 = vadd.f32 %v2084_v39, %v2083_v49  ;;  %v6315_v53 = vmul.f32 %v6139_v46, %v5602_v48  ;;  %v1700_v49 = vsel %vm1480_vm0, %v6264_v18, 0.0 }
 0x1dd   : > { %10783 = vst [vmem:[#allocation116_spill] sm:$0xff] %v6289_v62  ;;  %v2086_v9 = vsel %vm1480_vm0, %v1851_v11, 0.0  ;;  %v1698_v14 = vsel %vm1480_vm0, %v6296_v12, 0.0  ;;  %v6307_v62 = vmul.f32 %v5599_v42, %v6139_v46  ;;  %v1852_v23 = vmul.f32 %v6296_v12, %v6296_v12 }
 0x1de   : > { %v1699_v34 = vadd.f32 %v1698_v14, %v1697_v44  ;;  %10787 = vst [vmem:[#allocation120_spill] sm:$0xff] %v6315_v53  ;;  %v6319_v11 = vmul.f32 %v5608_v55, %v6139_v46  ;;  %v2087_v39 = vadd.f32 %v2086_v9, %v2085_v16  ;;  %v1854_v14 = vmul.f32 %v6285_v50, %v6285_v50 }
 0x1df   : > { %10786 = vst [vmem:[#allocation119_spill] sm:$0xff] %v6307_v62  ;;  %v6325_v62 = vmul.f32 %v6139_v46, %v5611_v59  ;;  %v2088_v58 = vsel %vm1480_vm0, %v1852_v23, 0.0  ;;  %v6332_v53 = vmul.f32 %v5627_v17, %v6139_v46  ;;  %v1702_v9 = vsel %vm1480_vm0, %v6285_v50, 0.0 }
 0x1e0   : > { %10788 = vst [vmem:[#allocation121_spill] sm:$0xff] %v6319_v11  ;;  %v1701_v44 = vadd.f32 %v1700_v49, %v1699_v34  ;;  %v6336_v11 = vmul.f32 %v6139_v46, %v5630_v26  ;;  %v2089_v16 = vadd.f32 %v2088_v58, %v2087_v39  ;;  %v6348_v34 = vmul.f32 %v6139_v46, %v5639_v35 }
 0x1e1   : > { %10789 = vst [vmem:[#allocation122_spill] sm:$0xff] %v6325_v62  ;;  %10790 = vst [vmem:[#allocation123_spill] sm:$0xff] %v6332_v53  ;;  %v6340_v55 = vpop.f32.mrb[112].mxu0  ;;  %v6344_v62 = vmul.f32 %v5636_v32, %v6139_v46  ;;  %v2090_v23 = vsel %vm1480_vm0, %v1853_v47, 0.0  ;;  %v6369_v47 = vmul.f32 %v5664_v8, %v6139_v46 }
 0x1e2   : > { %10791 = vst [vmem:[#allocation124_spill] sm:$0xff] %v6336_v11  ;;  %10793 = vst [vmem:[#allocation126_spill] sm:$0xff] %v6348_v34  ;;  %v6351_v49 = vpop.f32.mrb[113].mxu0  ;;  %v1703_v53 = vadd.f32 %v1702_v9, %v1701_v44  ;;  %v6355_v11 = vmul.f32 %v5655_v61, %v6139_v46  ;;  %v2091_v58 = vadd.f32 %v2090_v23, %v2089_v16  ;;  %v2092_v44 = vsel %vm1480_vm0, %v1854_v14, 0.0 }
 0x1e3   : > { %10792 = vst [vmem:[#allocation125_spill] sm:$0xff] %v6344_v62  ;;  %v1704_v39 = vsel %vm1480_vm0, %v6351_v49, 0.0  ;;  %v1855_v62 = vmul.f32 %v6351_v49, %v6351_v49  ;;  %v6361_v32 = vpop.f32.mrb[114].mxu0  ;;  %v6365_v34 = vmul.f32 %v6139_v46, %v5658_v2  ;;  %10796 = vst [vmem:[#allocation129_spill] sm:$0xff] %v6369_v47  ;;  %v6376_v23 = vmul.f32 %v6139_v46, %v5667_v15 }
 0x1e4   : > { %10794 = vst [vmem:[#allocation127_spill] sm:$0xff] %v6355_v11  ;;  %v1705_v9 = vadd.f32 %v1704_v39, %v1703_v53  ;;  %v6372_v16 = vpop.f32.mrb[115].mxu0  ;;  %v2093_v11 = vadd.f32 %v2092_v44, %v2091_v58  ;;  %v1857_v14 = vmul.f32 %v6340_v55, %v6340_v55  ;;  %v6391_v47 = vmul.f32 %v6139_v46, %v5686_v51 }
 0x1e5   : > { %10795 = vst [vmem:[#allocation128_spill] sm:$0xff] %v6365_v34  ;;  %10797 = vst [vmem:[#allocation130_spill] sm:$0xff] %v6376_v23  ;;  %v2094_v61 = vsel %vm1480_vm0, %v1855_v62, 0.0  ;;  %v1706_v2 = vsel %vm1480_vm0, %v6372_v16, 0.0  ;;  %v6383_v34 = vmul.f32 %v5683_v45, %v6139_v46  ;;  %v1856_v39 = vmul.f32 %v6372_v16, %v6372_v16 }
 0x1e6   : > { %v1707_v53 = vadd.f32 %v1706_v2, %v1705_v9  ;;  %10799 = vst [vmem:[#allocation132_spill] sm:$0xff] %v6391_v47  ;;  %v6395_v62 = vmul.f32 %v5692_v60, %v6139_v46  ;;  %v1708_v58 = vsel %vm1480_vm0, %v6340_v55, 0.0  ;;  %v2095_v44 = vadd.f32 %v2094_v61, %v2093_v11 }
 0x1e7   : > { %10798 = vst [vmem:[#allocation131_spill] sm:$0xff] %v6383_v34  ;;  %v6401_v34 = vmul.f32 %v6139_v46, %v5695_v4  ;;  %v1858_v2 = vmul.f32 %v6361_v32, %v6361_v32  ;;  %v2096_v23 = vsel %vm1480_vm0, %v1856_v39, 0.0  ;;  %v6408_v47 = vmul.f32 %v5711_v37, %v6139_v46  ;;  %v10807_v37 = vld [vmem:[#allocation39_spill] sm:$0xff] }
 0x1e8   : > { %10800 = vst [vmem:[#allocation133_spill] sm:$0xff] %v6395_v62  ;;  %v1709_v9 = vadd.f32 %v1708_v58, %v1707_v53  ;;  %v6412_v62 = vmul.f32 %v6139_v46, %v5714_v41  ;;  %v1710_v61 = vsel %vm1480_vm0, %v6361_v32, 0.0  ;;  %v2097_v11 = vadd.f32 %v2096_v23, %v2095_v44 }
 0x1e9   : > { %10801 = vst [vmem:[#allocation134_spill] sm:$0xff] %v6401_v34  ;;  %10802 = vst [vmem:[#allocation135_spill] sm:$0xff] %v6408_v47  ;;  %v6416_v60 = vpop.f32.mrb[116].mxu0  ;;  %v6420_v34 = vmul.f32 %v5720_v57, %v6139_v46  ;;  %v6424_v53 = vmul.f32 %v6139_v46, %v5723_v1  ;;  %v2098_v39 = vsel %vm1480_vm0, %v1857_v14, 0.0  ;;  %v10809_v14 = vld [vmem:[#allocation40_spill] sm:$0xff] }
 0x1ea   : > { %10803 = vst [vmem:[#allocation136_spill] sm:$0xff] %v6412_v62  ;;  %v6427_v58 = vpop.f32.mrb[117].mxu0  ;;  %v1711_v47 = vadd.f32 %v1710_v61, %v1709_v9  ;;  %v6431_v62 = vmul.f32 %v5739_v38, %v6139_v46  ;;  %v2099_v23 = vadd.f32 %v2098_v39, %v2097_v11  ;;  %v6445_v9 = vmul.f32 %v10809_v14, %v6139_v46  ;;  %v10811_v39 = vld [vmem:[#allocation41_spill] sm:$0xff] }
 0x1eb   : > { %10804 = vst [vmem:[#allocation137_spill] sm:$0xff] %v6420_v34  ;;  %10805 = vst [vmem:[#allocation138_spill] sm:$0xff] %v6424_v53  ;;  %v1712_v44 = vsel %vm1480_vm0, %v6427_v58, 0.0  ;;  %v1859_v34 = vmul.f32 %v6427_v58, %v6427_v58  ;;  %v6437_v57 = vpop.f32.mrb[118].mxu0  ;;  %v6441_v53 = vmul.f32 %v6139_v46, %v10807_v37  ;;  %v2100_v61 = vsel %vm1480_vm0, %v1858_v2, 0.0 }
 0x1ec   : > { %10806 = vst [vmem:[#allocation139_spill] sm:$0xff] %v6431_v62  ;;  %10810 = vst [vmem:[#allocation141_spill] sm:$0xff] %v6445_v9  ;;  %v1713_v62 = vadd.f32 %v1712_v44, %v1711_v47  ;;  %v6448_v11 = vpop.f32.mrb[119].mxu0  ;;  %v6452_v38 = vmul.f32 %v6139_v46, %v10811_v39  ;;  %v2101_v1 = vadd.f32 %v2100_v61, %v2099_v23  ;;  %v10815_v9 = vld [vmem:[#allocation43_spill] sm:$0xff]  ;;  %v1716_v61 = vsel %vm1480_vm0, %v6416_v60, 0.0 }
 0x1ed   : > { %10808 = vst [vmem:[#allocation140_spill] sm:$0xff] %v6441_v53  ;;  %v2102_v41 = vsel %vm1480_vm0, %v1859_v34, 0.0  ;;  %v1714_v37 = vsel %vm1480_vm0, %v6448_v11, 0.0  ;;  %v10813_v53 = vld [vmem:[#allocation42_spill] sm:$0xff]  ;;  %v1861_v2 = vmul.f32 %v6416_v60, %v6416_v60  ;;  %v1860_v44 = vmul.f32 %v6448_v11, %v6448_v11  ;;  %v10817_v34 = vld [vmem:[#allocation44_spill] sm:$0xff] }
 0x1ee   : > { %10812 = vst [vmem:[#allocation142_spill] sm:$0xff] %v6452_v38  ;;  %v6459_v45 = vmul.f32 %v10813_v53, %v6139_v46  ;;  %v1715_v47 = vadd.f32 %v1714_v37, %v1713_v62  ;;  %v6467_v38 = vmul.f32 %v6139_v46, %v10815_v9  ;;  %v6471_v23 = vmul.f32 %v10817_v34, %v6139_v46  ;;  %v10823_v34 = vld [vmem:[#allocation47_spill] sm:$0xff] }
 0x1ef   : > { %v2103_v53 = vadd.f32 %v2102_v41, %v2101_v1  ;;  %v1862_v37 = vmul.f32 %v6437_v57, %v6437_v57  ;;  %v2104_v39 = vsel %vm1480_vm0, %v1860_v44, 0.0  ;;  %v1718_v41 = vsel %vm1480_vm0, %v6437_v57, 0.0 }
 0x1f0   : > { %10814 = vst [vmem:[#allocation143_spill] sm:$0xff] %v6459_v45  ;;  %10816 = vst [vmem:[#allocation144_spill] sm:$0xff] %v6467_v38  ;;  %v10819_v45 = vld [vmem:[#allocation45_spill] sm:$0xff]  ;;  %v1717_v62 = vadd.f32 %v1716_v61, %v1715_v47  ;;  %v10821_v38 = vld [vmem:[#allocation46_spill] sm:$0xff]  ;;  %v2106_v61 = vsel %vm1480_vm0, %v1861_v2, 0.0 }
 0x1f1   : > { %10818 = vst [vmem:[#allocation145_spill] sm:$0xff] %v6471_v23  ;;  %v6477_v14 = vmul.f32 %v6139_v46, %v10819_v45  ;;  %v6484_v9 = vmul.f32 %v10821_v38, %v6139_v46  ;;  %v6488_v23 = vmul.f32 %v6139_v46, %v10823_v34  ;;  %v2105_v1 = vadd.f32 %v2104_v39, %v2103_v53  ;;  %v6492_v45 = vpop.f32.mrb[120].mxu0  ;;  %v10827_v47 = vld [vmem:[#allocation49_spill] sm:$0xff]  ;;  %v10833_v2 = vld [vmem:[#allocation52_spill] sm:$0xff] }
 0x1f2   : > { %v6500_v44 = vmul.f32 %v6139_v46, %v10827_v47  ;;  %v1719_v38 = vadd.f32 %v1718_v41, %v1717_v62  ;;  %v10831_v47 = vld [vmem:[#allocation51_spill] sm:$0xff]  ;;  %v6521_v62 = vmul.f32 %v10833_v2, %v6139_v46  ;;  %v2108_v41 = vsel %vm1480_vm0, %v1862_v37, 0.0 }
 0x1f3   : > { %10820 = vst [vmem:[#allocation146_spill] sm:$0xff] %v6477_v14  ;;  %10822 = vst [vmem:[#allocation147_spill] sm:$0xff] %v6484_v9  ;;  %v10825_v14 = vld [vmem:[#allocation48_spill] sm:$0xff]  ;;  %v6503_v9 = vpop.f32.mrb[121].mxu0  ;;  %v2107_v53 = vadd.f32 %v2106_v61, %v2105_v1  ;;  %v10836_v61 = vld [vmem:[#allocation53_spill] sm:$0xff]  ;;  %v1865_v37 = vmul.f32 %v6492_v45, %v6492_v45 }
 0x1f4   : > { %10824 = vst [vmem:[#allocation148_spill] sm:$0xff] %v6488_v23  ;;  %v6496_v4 = vmul.f32 %v10825_v14, %v6139_v46  ;;  %10828 = vst [vmem:[#allocation150_spill] sm:$0xff] %v6500_v44  ;;  %v10829_v23 = vld [vmem:[#allocation50_spill] sm:$0xff]  ;;  %v1720_v39 = vsel %vm1480_vm0, %v6503_v9, 0.0  ;;  %v6513_v14 = vpop.f32.mrb[122].mxu0  ;;  %v6517_v44 = vmul.f32 %v6139_v46, %v10831_v47 }
 0x1f5   : > { %v6507_v34 = vmul.f32 %v10829_v23, %v6139_v46  ;;  %10834 = vst [vmem:[#allocation153_spill] sm:$0xff] %v6521_v62  ;;  %v6524_v1 = vpop.f32.mrb[123].mxu0  ;;  %v6528_v23 = vmul.f32 %v6139_v46, %v10836_v61  ;;  %v2109_v51 = vadd.f32 %v2108_v41, %v2107_v53  ;;  %v10840_v62 = vld [vmem:[#allocation55_spill] sm:$0xff]  ;;  %v1724_v41 = vsel %vm1480_vm0, %v6492_v45, 0.0 }
 0x1f6   : > { %10826 = vst [vmem:[#allocation149_spill] sm:$0xff] %v6496_v4  ;;  %v1863_v4 = vmul.f32 %v6503_v9, %v6503_v9  ;;  %10832 = vst [vmem:[#allocation152_spill] sm:$0xff] %v6517_v44  ;;  %v1722_v47 = vsel %vm1480_vm0, %v6524_v1, 0.0  ;;  %v10838_v44 = vld [vmem:[#allocation54_spill] sm:$0xff] }
 0x1f7   : > { %10830 = vst [vmem:[#allocation151_spill] sm:$0xff] %v6507_v34  ;;  %v1721_v34 = vadd.f32 %v1720_v39, %v1719_v38  ;;  %10835 = vst [vmem:[#allocation154_spill] sm:$0xff] %v6524_v1  ;;  %v6535_v15 = vmul.f32 %v10838_v44, %v6139_v46  ;;  %v1864_v39 = vmul.f32 %v6524_v1, %v6524_v1 }
 0x1f8   : > { %10837 = vst [vmem:[#allocation155_spill] sm:$0xff] %v6528_v23  ;;  %v2110_v8 = vsel %vm1480_vm0, %v1863_v4, 0.0  ;;  %v6543_v23 = vmul.f32 %v6139_v46, %v10840_v62  ;;  %v10842_v4 = vld [vmem:[#allocation56_spill] sm:$0xff] }
 0x1f9   : > { %10839 = vst [vmem:[#allocation156_spill] sm:$0xff] %v6535_v15  ;;  %v1723_v38 = vadd.f32 %v1722_v47, %v1721_v34  ;;  %v6547_v53 = vmul.f32 %v10842_v4, %v6139_v46  ;;  %v2111_v44 = vadd.f32 %v2110_v8, %v2109_v51  ;;  %v10844_v15 = vld [vmem:[#allocation57_spill] sm:$0xff]  ;;  %v1866_v34 = vmul.f32 %v6513_v14, %v6513_v14  ;;  %v10848_v4 = vld [vmem:[#allocation59_spill] sm:$0xff] }
 0x1fa   : > { %10841 = vst [vmem:[#allocation157_spill] sm:$0xff] %v6543_v23  ;;  %v6553_v2 = vmul.f32 %v6139_v46, %v10844_v15  ;;  %v2112_v61 = vsel %vm1480_vm0, %v1864_v39, 0.0  ;;  %v10846_v23 = vld [vmem:[#allocation58_spill] sm:$0xff]  ;;  %v1726_v8 = vsel %vm1480_vm0, %v6513_v14, 0.0  ;;  %v6568_v15 = vpop.f32.mrb[124].mxu0 }
 0x1fb   : > { %10843 = vst [vmem:[#allocation158_spill] sm:$0xff] %v6547_v53  ;;  %v1725_v47 = vadd.f32 %v1724_v41, %v1723_v38  ;;  %v6560_v62 = vmul.f32 %v10846_v23, %v6139_v46  ;;  %v6564_v53 = vmul.f32 %v6139_v46, %v10848_v4  ;;  %v2113_v51 = vadd.f32 %v2112_v61, %v2111_v44  ;;  %v10853_v38 = vld [vmem:[#allocation61_spill] sm:$0xff] }
 0x1fc   : > { %10845 = vst [vmem:[#allocation159_spill] sm:$0xff] %v6553_v2  ;;  %10850 = vst [vmem:[#allocation162_spill] sm:$0xff] %v6568_v15  ;;  %v10851_v2 = vld [vmem:[#allocation60_spill] sm:$0xff]  ;;  %v6576_v39 = vmul.f32 %v6139_v46, %v10853_v38  ;;  %v2114_v41 = vsel %vm1480_vm0, %v1865_v37, 0.0  ;;  %v10858_v38 = vld [vmem:[#allocation63_spill] sm:$0xff]  ;;  %v1869_v42 = vmul.f32 %v6568_v15, %v6568_v15 }
 0x1fd   : > { %10847 = vst [vmem:[#allocation160_spill] sm:$0xff] %v6560_v62  ;;  %10849 = vst [vmem:[#allocation161_spill] sm:$0xff] %v6564_v53  ;;  %v6572_v17 = vmul.f32 %v10851_v2, %v6139_v46  ;;  %v6579_v62 = vpop.f32.mrb[125].mxu0  ;;  %v1727_v23 = vadd.f32 %v1726_v8, %v1725_v47  ;;  %v10855_v53 = vld [vmem:[#allocation62_spill] sm:$0xff]  ;;  %v2115_v44 = vadd.f32 %v2114_v41, %v2113_v51  ;;  %v10860_v37 = vld [vmem:[#allocation64_spill] sm:$0xff]  ;;  %v2116_v51 = vsel %vm1480_vm0, %v1866_v34, 0.0 }
 0x1fe   : > { %10854 = vst [vmem:[#allocation164_spill] sm:$0xff] %v6576_v39  ;;  %v6583_v4 = vmul.f32 %v10855_v53, %v6139_v46  ;;  %v1728_v61 = vsel %vm1480_vm0, %v6579_v62, 0.0  ;;  %v6589_v2 = vpop.f32.mrb[126].mxu0  ;;  %v6593_v39 = vmul.f32 %v6139_v46, %v10858_v38  ;;  %v6597_v47 = vmul.f32 %v10860_v37, %v6139_v46  ;;  %v10862_v8 = vld [vmem:[#allocation65_spill] sm:$0xff]  ;;  %v10864_v37 = vld [vmem:[#allocation66_spill] sm:$0xff]  ;;  %v10866_v38 = vld [vmem:[#allocation67_spill] sm:$0xff] }
 0x1ff   : > { %10852 = vst [vmem:[#allocation163_spill] sm:$0xff] %v6572_v17  ;;  %v1867_v17 = vmul.f32 %v6579_v62, %v6579_v62  ;;  %10857 = vst [vmem:[#allocation166_spill] sm:$0xff] %v6589_v2  ;;  %v6604_v41 = vpop.f32.mrb[127].mxu0  ;;  %v1729_v35 = vadd.f32 %v1728_v61, %v1727_v23  ;;  %v10868_v34 = vld [vmem:[#allocation68_spill] sm:$0xff]  ;;  %v10870_v23 = vld [vmem:[#allocation69_spill] sm:$0xff] }
 0x200   : > { %10856 = vst [vmem:[#allocation165_spill] sm:$0xff] %v6583_v4  ;;  %10859 = vst [vmem:[#allocation167_spill] sm:$0xff] %v6593_v39  ;;  %v6601_v4 = vmul.f32 %v6139_v46, %v10862_v8  ;;  %v1730_v26 = vsel %vm1480_vm0, %v6604_v41, 0.0  ;;  %v1868_v39 = vmul.f32 %v6604_v41, %v6604_v41  ;;  %v6621_v8 = vmul.f32 %v10868_v34, %v6139_v46  ;;  %v10878_v34 = vld [vmem:[#allocation73_spill] sm:$0xff] }
 0x201   : > { %10861 = vst [vmem:[#allocation168_spill] sm:$0xff] %v6597_v47  ;;  %v2118_v53 = vsel %vm1480_vm0, %v1867_v17, 0.0  ;;  %v6613_v47 = vmul.f32 %v10864_v37, %v6139_v46  ;;  %v2117_v17 = vadd.f32 %v2116_v51, %v2115_v44  ;;  %v6625_v61 = vmul.f32 %v6139_v46, %v10870_v23  ;;  %v11011_v23 = vld [vmem:[#allocation72_spill] sm:$0xff] }
 0x202   : > { %10863 = vst [vmem:[#allocation169_spill] sm:$0xff] %v6601_v4  ;;  %v6617_v4 = vmul.f32 %v6139_v46, %v10866_v38  ;;  %10869 = vst [vmem:[#allocation172_spill] sm:$0xff] %v6621_v8  ;;  %v1731_v59 = vadd.f32 %v1730_v26, %v1729_v35  ;;  %v2120_v37 = vsel %vm1480_vm0, %v1868_v39, 0.0  ;;  %v1732_v44 = vsel %vm1480_vm0, %v6568_v15, 0.0  ;;  %v10876_v8 = vld [vmem:[#allocation72_spill] sm:$0xff] }
 0x203   : > { %10865 = vst [vmem:[#allocation170_spill] sm:$0xff] %v6613_v47  ;;  %10871 = vst [vmem:[#allocation173_spill] sm:$0xff] %v6625_v61  ;;  %v10872_v47 = vld [vmem:[#allocation70_spill] sm:$0xff]  ;;  %v2119_v51 = vadd.f32 %v2118_v53, %v2117_v17  ;;  %v6642_v61 = vmul.f32 %v10876_v8, %v6139_v46  ;;  %v6646_v26 = vmul.f32 %v6139_v46, %v10878_v34  ;;  %v1734_v53 = vsel %vm1480_vm0, %v6589_v2, 0.0 }
 0x204   : > { %10867 = vst [vmem:[#allocation171_spill] sm:$0xff] %v6617_v4  ;;  %v6632_v48 = vmul.f32 %v10872_v47, %v6139_v46  ;;  %v10874_v4 = vld [vmem:[#allocation71_spill] sm:$0xff]  ;;  %v1870_v35 = vmul.f32 %v6589_v2, %v6589_v2  ;;  %v1733_v39 = vadd.f32 %v1732_v44, %v1731_v59  ;;  %v2122_v59 = vsel %vm1480_vm0, %v1869_v42, 0.0  ;;  %v10896_v42 = vld [vmem:[#allocation82_spill] sm:$0xff] }
 0x205   : > { %v6636_v38 = vmul.f32 %v6139_v46, %v10874_v4  ;;  %10877 = vst [vmem:[#allocation176_spill] sm:$0xff] %v6642_v61  ;;  %10879 = vst [vmem:[#allocation177_spill] sm:$0xff] %v6646_v26  ;;  %v2121_v17 = vadd.f32 %v2120_v37, %v2119_v51  ;;  %v10884_v61 = vld [vmem:[#allocation76_spill] sm:$0xff]  ;;  %v10886_v26 = vld [vmem:[#allocation77_spill] sm:$0xff] }
 0x206   : > { %10873 = vst [vmem:[#allocation174_spill] sm:$0xff] %v6632_v48  ;;  %v10880_v48 = vld [vmem:[#allocation74_spill] sm:$0xff]  ;;  %v6662_v8 = vmul.f32 %v10884_v61, %v6139_v46  ;;  %v6666_v34 = vmul.f32 %v6139_v46, %v10886_v26  ;;  %v1735_v44 = vadd.f32 %v1734_v53, %v1733_v39  ;;  %v10892_v37 = vld [vmem:[#allocation80_spill] sm:$0xff]  ;;  %v10894_v61 = vld [vmem:[#allocation81_spill] sm:$0xff]  ;;  %v6687_v39 = vmul.f32 %v10896_v42, %v6139_v46 }
 0x207   : > { %10875 = vst [vmem:[#allocation175_spill] sm:$0xff] %v6636_v38  ;;  %v6652_v47 = vmul.f32 %v10880_v48, %v6139_v46  ;;  %v10882_v38 = vld [vmem:[#allocation75_spill] sm:$0xff]  ;;  %v6679_v51 = vmul.f32 %v10892_v37, %v6139_v46  ;;  %v6683_v26 = vmul.f32 %v6139_v46, %v10894_v61  ;;  %v2124_v53 = vsel %vm1480_vm0, %v1870_v35, 0.0  ;;  %v10907_v42 = vld [vmem:[#allocation88_spill] sm:$0xff] }
 0x208   : > { %v6656_v4 = vmul.f32 %v6139_v46, %v10882_v38  ;;  %10885 = vst [vmem:[#allocation180_spill] sm:$0xff] %v6662_v8  ;;  %10887 = vst [vmem:[#allocation181_spill] sm:$0xff] %v6666_v34  ;;  %v2123_v8 = vadd.f32 %v2122_v59, %v2121_v17  ;;  %v10898_v34 = vld [vmem:[#allocation83_spill] sm:$0xff]  ;;  %v10902_v17 = vld [vmem:[#allocation85_spill] sm:$0xff] }
 0x209   : > { %10881 = vst [vmem:[#allocation178_spill] sm:$0xff] %v6652_v47  ;;  %v10888_v47 = vld [vmem:[#allocation78_spill] sm:$0xff]  ;;  %10893 = vst [vmem:[#allocation183_spill] sm:$0xff] %v6679_v51  ;;  %v6700_v59 = vmul.f32 %v6139_v46, %v10902_v17  ;;  %v11022_v17 = vld [vmem:[#allocation88_spill] sm:$0xff] }
 0x20a   : > { %10883 = vst [vmem:[#allocation179_spill] sm:$0xff] %v6656_v4  ;;  %v6671_v48 = vmul.f32 %v10888_v47, %v6139_v46  ;;  %v10890_v4 = vld [vmem:[#allocation79_spill] sm:$0xff]  ;;  %10895 = vst [vmem:[#allocation184_spill] sm:$0xff] %v6683_v26  ;;  %v6692_v47 = vmul.f32 %v6139_v46, %v10898_v34  ;;  %v2125_v51 = vadd.f32 %v2124_v53, %v2123_v8  ;;  %v10912_v53 = vld [vmem:[#allocation90_spill] sm:$0xff] }
 0x20b   : > { %v6675_v38 = vmul.f32 %v6139_v46, %v10890_v4  ;;  %10897 = vst [vmem:[#allocation185_spill] sm:$0xff] %v6687_v39  ;;  %10903 = vst [vmem:[#allocation188_spill] sm:$0xff] %v6700_v59  ;;  %v6704_v26 = vmul.f32 %v6075_v6, %v6139_v46  ;;  %v10905_v39 = vld [vmem:[#allocation87_spill] sm:$0xff]  ;;  %v6720_v8 = vmul.f32 %v6103_v30, %v6139_v46 }
 0x20c   : > { %10889 = vst [vmem:[#allocation182_spill] sm:$0xff] %v6671_v48  ;;  %v1736_v48 = vrot.slane %v1735_v44, 4  ;;  %10899 = vst [vmem:[#allocation186_spill] sm:$0xff] %v6692_v47  ;;  %v6708_v35 = vmul.f32 %v6139_v46, %v10905_v39  ;;  %v6712_v47 = vmul.f32 %v10907_v42, %v6139_v46  ;;  %v2126_v59 = vrot.slane %v2125_v51, 4  ;;  %v10916_v42 = vld [vmem:[#allocation92_spill] sm:$0xff]  ;;  %v11023_v39 = vld [vmem:[#allocation91_spill] sm:$0xff] }
 0x20d   : > { %10891 = vst [vmem:[#allocation79_spill] sm:$0xff] %v6675_v38  ;;  %v10900_v38 = vld [vmem:[#allocation84_spill] sm:$0xff]  ;;  %10904 = vst [vmem:[#allocation189_spill] sm:$0xff] %v6704_v26  ;;  %v6724_v26 = vmul.f32 %v6139_v46, %v10912_v53 }
 0x20e   : > { %v6696_v37 = vmul.f32 %v10900_v38, %v6139_v46  ;;  %10906 = vst [vmem:[#allocation190_spill] sm:$0xff] %v6708_v35  ;;  %10908 = vst [vmem:[#allocation191_spill] sm:$0xff] %v6712_v47  ;;  %v1737_v34 = vadd.f32 %v1736_v48, %v1735_v44  ;;  %v10909_v38 = vld [vmem:[#allocation89_spill] sm:$0xff]  ;;  %v10914_v35 = vld [vmem:[#allocation91_spill] sm:$0xff]  ;;  %v6732_v48 = vmul.f32 %v6139_v46, %v10916_v42 }
 0x20f   : > { %10911 = vst [vmem:[#allocation192_spill] sm:$0xff] %v6720_v8  ;;  %10913 = vst [vmem:[#allocation90_spill] sm:$0xff] %v6724_v26  ;;  %v6728_v6 = vmul.f32 %v10914_v35, %v6139_v46  ;;  %v6736_v44 = vmul.f32 %v6131_v28, %v6139_v46  ;;  %v6744_v26 = vmul.f32 %v6145_v7, %v6139_v46 }
 0x210   : > { %10901 = vst [vmem:[#allocation187_spill] sm:$0xff] %v6696_v37  ;;  %v6716_v37 = vmul.f32 %v6139_v46, %v10909_v38  ;;  %10917 = vst [vmem:[#allocation92_spill] sm:$0xff] %v6732_v48  ;;  %v1738_v47 = vrot.slane %v1737_v34, 2  ;;  %v2127_v35 = vadd.f32 %v2126_v59, %v2125_v51  ;;  %v6752_v48 = vmul.f32 %v6188_v3, %v6139_v46 }
 0x211   : > { %10915 = vst [vmem:[#allocation193_spill] sm:$0xff] %v6728_v6  ;;  %10918 = vst [vmem:[#allocation194_spill] sm:$0xff] %v6736_v44  ;;  %v6748_v6 = vmul.f32 %v6139_v46, %v6148_v21  ;;  %v6756_v44 = vmul.f32 %v6139_v46, %v6199_v36  ;;  %v6768_v51 = vmul.f32 %v6264_v18, %v6139_v46 }
 0x212   : > { %10910 = vst [vmem:[#allocation89_spill] sm:$0xff] %v6716_v37  ;;  %v10919_v37 = vld [vmem:[#allocation94_spill] sm:$0xff]  ;;  %10921 = vst [vmem:[#allocation195_spill] sm:$0xff] %v6744_v26  ;;  %v1739_v28 = vadd.f32 %v1738_v47, %v1737_v34  ;;  %v6764_v26 = vmul.f32 %v6139_v46, %v6220_v29  ;;  %v6772_v59 = vmul.f32 %v6139_v46, %v6275_v33 }
 0x213   : > { %v6740_v8 = vmul.f32 %v6139_v46, %v10919_v37  ;;  %10922 = vst [vmem:[#allocation196_spill] sm:$0xff] %v6748_v6  ;;  %10923 = vst [vmem:[#allocation197_spill] sm:$0xff] %v6752_v48  ;;  %v2128_v48 = vrot.slane %v2127_v35, 2  ;;  %v6780_v47 = vmul.f32 %v6139_v46, %v6296_v12  ;;  %v6784_v34 = vmul.f32 %v6340_v55, %v6139_v46 }
 0x214   : > { %10924 = vst [vmem:[#allocation198_spill] sm:$0xff] %v6756_v44  ;;  %10926 = vst [vmem:[#allocation200_spill] sm:$0xff] %v6764_v26  ;;  %v6776_v44 = vmul.f32 %v6285_v50, %v6139_v46 }
 0x215   : > { %10920 = vst [vmem:[#allocation94_spill] sm:$0xff] %v6740_v8  ;;  %v6760_v8 = vmul.f32 %v6209_v27, %v6139_v46  ;;  %10927 = vst [vmem:[#allocation201_spill] sm:$0xff] %v6768_v51  ;;  %v6788_v51 = vmul.f32 %v6139_v46, %v6351_v49  ;;  %v2129_v26 = vadd.f32 %v2128_v48, %v2127_v35 }
 0x216   : > { %10928 = vst [vmem:[#allocation202_spill] sm:$0xff] %v6772_v59  ;;  %10929 = vst [vmem:[#allocation203_spill] sm:$0xff] %v6776_v44  ;;  %v6792_v59 = vmul.f32 %v6361_v32, %v6139_v46  ;;  %v6796_v44 = vmul.f32 %v6139_v46, %v6372_v16  ;;  %v6816_v35 = vmul.f32 %v6492_v45, %v6139_v46 }
 0x217   : > { %10925 = vst [vmem:[#allocation199_spill] sm:$0xff] %v6760_v8  ;;  %10930 = vst [vmem:[#allocation204_spill] sm:$0xff] %v6780_v47  ;;  %v1740_v8 = vrot.slane %v1739_v28, 1  ;;  %v6800_v47 = vmul.f32 %v6416_v60, %v6139_v46  ;;  %v6820_v48 = vmul.f32 %v6139_v46, %v6503_v9 }
 0x218   : > { %10931 = vst [vmem:[#allocation205_spill] sm:$0xff] %v6784_v34  ;;  %10932 = vst [vmem:[#allocation206_spill] sm:$0xff] %v6788_v51  ;;  %v6804_v34 = vmul.f32 %v6139_v46, %v6427_v58  ;;  %v6808_v51 = vmul.f32 %v6437_v57, %v6139_v46 }
 0x219   : > { %10933 = vst [vmem:[#allocation207_spill] sm:$0xff] %v6792_v59  ;;  %10934 = vst [vmem:[#allocation208_spill] sm:$0xff] %v6796_v44  ;;  %v1741_v6 = vadd.f32 %v1740_v8, %v1739_v28  ;;  %v6812_v59 = vmul.f32 %v6139_v46, %v6448_v11  ;;  %v6828_v28 = vmul.f32 %v6139_v46, %v6524_v1  ;;  %v11029_v1 = vld [vmem:[#allocation4_spill] sm:$0xff] }
 0x21a   : > { %10935 = vst [vmem:[#allocation209_spill] sm:$0xff] %v6800_v47  ;;  %10936 = vst [vmem:[#allocation210_spill] sm:$0xff] %v6804_v34  ;;  %v2130_v47 = vrot.slane %v2129_v26, 1  ;;  %v6824_v34 = vmul.f32 %v6513_v14, %v6139_v46  ;;  %v6832_v8 = vmul.f32 %v6568_v15, %v6139_v46  ;;  %v11032_v15 = vld [vmem:[#allocation3_spill] sm:$0xff] }
 0x21b   : > { %10937 = vst [vmem:[#allocation211_spill] sm:$0xff] %v6808_v51  ;;  %10938 = vst [vmem:[#allocation212_spill] sm:$0xff] %v6812_v59  ;;  %v6834_v51 = vmul.f32 0.0009765625, %v1741_v6 }
 0x21c   : > { %10939 = vst [vmem:[#allocation213_spill] sm:$0xff] %v6816_v35  ;;  %10940 = vst [vmem:[#allocation214_spill] sm:$0xff] %v6820_v48  ;;  %v6838_v35 = vmul.f32 %v6139_v46, %v6579_v62  ;;  %v6842_v48 = vmul.f32 %v6589_v2, %v6139_v46  ;;  %v2131_v59 = vadd.f32 %v2130_v47, %v2129_v26  ;;  %v7018_v47 = vld [vmem:[%s10470_s3] ss:$0 sm:$0xff] }
 0x21d   : > { %10941 = vst [vmem:[#allocation215_spill] sm:$0xff] %v6824_v34  ;;  %10942 = vst [vmem:[#allocation216_spill] sm:$0xff] %v6828_v28  ;;  %v6846_v34 = vmul.f32 %v6139_v46, %v6604_v41  ;;  %v2133_v28 = vmul.f32 %v6834_v51, %v6834_v51  ;;  %v10949_v46 = vld [vmem:[#allocation6_spill] sm:$0xff]  ;;  %v11004_v2 = vsub.f32 %v6604_v41, %v6834_v51  ;;  %v11009_v41 = vld [vmem:[#allocation73_spill] sm:$0xff] }
 0x21e   : > { %10943 = vst [vmem:[#allocation217_spill] sm:$0xff] %v6832_v8  ;;  %10944 = vst [vmem:[#allocation218_spill] sm:$0xff] %v6838_v35  ;;  %v2132_v44 = vmul.f32 0.0009765625, %v2131_v59  ;;  %v10947_v8 = vld [vmem:[#allocation5_spill] sm:$0xff]  ;;  %v10948_v59 = vld [vmem:[#allocation7_spill] sm:$0xff]  ;;  %v11030_v61 = vsub.f32 %v11029_v1, %v6834_v51  ;;  %v11033_v26 = vsub.f32 %v11032_v15, %v6834_v51 }
 0x21f   : > { %10945 = vst [vmem:[#allocation219_spill] sm:$0xff] %v6842_v48  ;;  %10999 = vst [vmem:[#allocation5_spill] sm:$0xff] %v6995_v0  ;;  %v11015_v48 = vld [vmem:[#allocation76_spill] sm:$0xff] }
 0x220   : > { %v2134_v5 = vsub.f32 %v2132_v44, %v2133_v28  ;;  %11007 = vst [vmem:[#allocation7_spill] sm:$0xff] %v7018_v47 }
 0x222   : > { %v2135_v35 = vmax.f32 %v2134_v5, 0.0  ;;  %v11014_v5 = vld [vmem:[#allocation74_spill] sm:$0xff] }
 0x224   : > { %v2264_v44 = vadd.f32 1e-05, %v2135_v35 }
 0x226   : > { %5258 = vrsqrt.f32 %v2264_v44  ;;  %v4645_v44 = vld [vmem:[%s10472_s5] ss:$0 sm:$0xff] }
 0x230   : > { %v6990_v35 = vpop.eup %5258 }
 0x231   : > { %v2391_v13 = vmul.f32 %v6990_v35, %v11004_v2  ;;  %v11021_v2 = vld [vmem:[#allocation86_spill] sm:$0xff] }
 0x233   : > { %v2526_v25 = vmul.f32 %v6995_v0, %v2391_v13  ;;  %v11020_v0 = vld [vmem:[#allocation84_spill] sm:$0xff]  ;;  %v7141_v13 = vmul.f32 %v6990_v35, %v11030_v61  ;;  %v11035_v61 = vsub.f32 %v5466_v31, %v6834_v51 }
 0x235   : > { %v2661_v28 = vadd.f32 %v7018_v47, %v2526_v25  ;;  %v11025_v47 = vld [vmem:[#allocation93_spill] sm:$0xff]  ;;  %v11031_v25 = vsub.f32 %v5424_v63, %v6834_v51  ;;  %v7165_v63 = vmul.f32 %v6990_v35, %v11035_v61  ;;  %v11040_v61 = vsub.f32 %v5496_v56, %v6834_v51 }
 0x237   : > { %v2924_v40 = vadd.f32 %v6846_v34, %v2661_v28  ;;  %v11026_v34 = vld [vmem:[#allocation166_spill] sm:$0xff]  ;;  %v7147_v6 = vmul.f32 %v6990_v35, %v11031_v25  ;;  %v11036_v25 = vsub.f32 %v5453_v19, %v6834_v51  ;;  %v7189_v19 = vmul.f32 %v6990_v35, %v11040_v61 }
 0x238   : > { %v11047_v61 = vld [vmem:[#allocation10_spill] sm:$0xff] }
 0x239   : > { %v7076_v28 = vadd.f32 %v4645_v44, %v2924_v40  ;;  %v7171_v15 = vmul.f32 %v6990_v35, %v11036_v25  ;;  %11041 = vst [vmem:[#allocation70_spill] sm:$0xff] %v7189_v19  ;;  %v11042_v25 = vsub.f32 %v10949_v46, %v6834_v51  ;;  %v11048_v19 = vsub.f32 %v11047_v61, %v6834_v51 }
 0x23b   : > { %11024 = vst [vmem:[#allocation6_spill] sm:$0xff] %v7076_v28  ;;  %v11027_v28 = vld [vmem:[#allocation2_spill] sm:$0xff]  ;;  %v7213_v46 = vmul.f32 %v6990_v35, %v11048_v19  ;;  %v11057_v19 = vld [vmem:[#allocation13_spill] sm:$0xff] }
 0x23c   : > { %v11028_v40 = vsub.f32 %v11027_v28, %v6834_v51  ;;  %v7153_v28 = vmul.f32 %v6990_v35, %v11033_v26  ;;  %v11037_v26 = vsub.f32 %v10947_v8, %v6834_v51  ;;  %v7195_v8 = vmul.f32 %v6990_v35, %v11042_v25 }
 0x23d   : > { %11049 = vst [vmem:[#allocation74_spill] sm:$0xff] %v7213_v46  ;;  %v11050_v25 = vsub.f32 %v5512_v10, %v6834_v51  ;;  %v11058_v46 = vsub.f32 %v11057_v19, %v6834_v51 }
 0x23e   : > { %v7135_v44 = vmul.f32 %v6990_v35, %v11028_v40  ;;  %v11034_v40 = vsub.f32 %v5455_v22, %v6834_v51  ;;  %v7177_v22 = vmul.f32 %v6990_v35, %v11037_v26  ;;  %v11043_v26 = vsub.f32 %v5492_v52, %v6834_v51 }
 0x23f   : > { %v7219_v52 = vmul.f32 %v6990_v35, %v11050_v25  ;;  %v7237_v10 = vmul.f32 %v6990_v35, %v11058_v46  ;;  %v11060_v25 = vld [vmem:[#allocation11_spill] sm:$0xff]  ;;  %v11069_v46 = vld [vmem:[#allocation17_spill] sm:$0xff] }
 0x240   : > { %v7159_v1 = vmul.f32 %v6990_v35, %v11034_v40  ;;  %v11038_v40 = vsub.f32 %v10948_v59, %v6834_v51  ;;  %v7201_v59 = vmul.f32 %v6990_v35, %v11043_v26  ;;  %v11052_v26 = vld [vmem:[#allocation9_spill] sm:$0xff] }
 0x241   : > { %11051 = vst [vmem:[#allocation76_spill] sm:$0xff] %v7219_v52  ;;  %11059 = vst [vmem:[#allocation84_spill] sm:$0xff] %v7237_v10  ;;  %v11061_v52 = vsub.f32 %v11060_v25, %v6834_v51  ;;  %v11070_v10 = vsub.f32 %v11069_v46, %v6834_v51 }
 0x242   : > { %v7183_v31 = vmul.f32 %v6990_v35, %v11038_v40  ;;  %11044 = vst [vmem:[#allocation72_spill] sm:$0xff] %v7201_v59  ;;  %v11045_v40 = vld [vmem:[#allocation8_spill] sm:$0xff]  ;;  %v11053_v59 = vsub.f32 %v11052_v26, %v6834_v51 }
 0x243   : > { %v7243_v26 = vmul.f32 %v6990_v35, %v11061_v52  ;;  %v7261_v25 = vmul.f32 %v6990_v35, %v11070_v10  ;;  %v11072_v52 = vld [vmem:[#allocation14_spill] sm:$0xff]  ;;  %v11081_v10 = vld [vmem:[#allocation21_spill] sm:$0xff] }
 0x244   : > { %11039 = vst [vmem:[#allocation73_spill] sm:$0xff] %v7183_v31  ;;  %v11046_v31 = vsub.f32 %v11045_v40, %v6834_v51  ;;  %v7225_v40 = vmul.f32 %v6990_v35, %v11053_v59  ;;  %v11063_v59 = vld [vmem:[#allocation12_spill] sm:$0xff] }
 0x245   : > { %11062 = vst [vmem:[#allocation86_spill] sm:$0xff] %v7243_v26  ;;  %11071 = vst [vmem:[#allocation93_spill] sm:$0xff] %v7261_v25  ;;  %v11073_v26 = vsub.f32 %v11072_v52, %v6834_v51  ;;  %v11082_v25 = vsub.f32 %v11081_v10, %v6834_v51 }
 0x246   : > { %v7207_v56 = vmul.f32 %v6990_v35, %v11046_v31  ;;  %11054 = vst [vmem:[#allocation80_spill] sm:$0xff] %v7225_v40  ;;  %v11055_v31 = vsub.f32 %v5545_v43, %v6834_v51  ;;  %v11064_v40 = vsub.f32 %v11063_v59, %v6834_v51 }
 0x247   : > { %v7267_v59 = vmul.f32 %v6990_v35, %v11073_v26  ;;  %v7285_v52 = vmul.f32 %v6990_v35, %v11082_v25  ;;  %v11084_v26 = vld [vmem:[#allocation18_spill] sm:$0xff]  ;;  %v11093_v25 = vld [vmem:[#allocation25_spill] sm:$0xff] }
 0x248   : > { %v7231_v61 = vmul.f32 %v6990_v35, %v11055_v31  ;;  %v7249_v43 = vmul.f32 %v6990_v35, %v11064_v40  ;;  %v11066_v31 = vld [vmem:[#allocation15_spill] sm:$0xff]  ;;  %v11075_v40 = vld [vmem:[#allocation16_spill] sm:$0xff] }
 0x249   : > { %11074 = vst [vmem:[#allocation166_spill] sm:$0xff] %v7267_v59  ;;  %11083 = vst [vmem:[#allocation3_spill] sm:$0xff] %v7285_v52  ;;  %v11085_v59 = vsub.f32 %v11084_v26, %v6834_v51  ;;  %v11094_v52 = vsub.f32 %v11093_v25, %v6834_v51 }
 0x24a   : > { %11056 = vst [vmem:[#allocation82_spill] sm:$0xff] %v7231_v61  ;;  %11065 = vst [vmem:[#allocation88_spill] sm:$0xff] %v7249_v43  ;;  %v11067_v61 = vsub.f32 %v11066_v31, %v6834_v51  ;;  %v11076_v43 = vsub.f32 %v11075_v40, %v6834_v51 }
 0x24b   : > { %v7291_v40 = vmul.f32 %v6990_v35, %v11085_v59  ;;  %v7309_v26 = vmul.f32 %v6990_v35, %v11094_v52  ;;  %v11096_v59 = vld [vmem:[#allocation22_spill] sm:$0xff]  ;;  %v11105_v52 = vld [vmem:[#allocation29_spill] sm:$0xff] }
 0x24c   : > { %v7255_v19 = vmul.f32 %v6990_v35, %v11067_v61  ;;  %v7273_v31 = vmul.f32 %v6990_v35, %v11076_v43  ;;  %v11078_v61 = vld [vmem:[#allocation19_spill] sm:$0xff]  ;;  %v11087_v43 = vld [vmem:[#allocation20_spill] sm:$0xff] }
 0x24d   : > { %11086 = vst [vmem:[#allocation8_spill] sm:$0xff] %v7291_v40  ;;  %11095 = vst [vmem:[#allocation13_spill] sm:$0xff] %v7309_v26  ;;  %v11097_v40 = vsub.f32 %v11096_v59, %v6834_v51  ;;  %v11106_v26 = vsub.f32 %v11105_v52, %v6834_v51 }
 0x24e   : > { %11068 = vst [vmem:[#allocation91_spill] sm:$0xff] %v7255_v19  ;;  %11077 = vst [vmem:[#allocation2_spill] sm:$0xff] %v7273_v31  ;;  %v11079_v19 = vsub.f32 %v11078_v61, %v6834_v51  ;;  %v11088_v31 = vsub.f32 %v11087_v43, %v6834_v51 }
 0x24f   : > { %v7315_v43 = vmul.f32 %v6990_v35, %v11097_v40  ;;  %v7333_v59 = vmul.f32 %v6990_v35, %v11106_v26  ;;  %v11108_v40 = vld [vmem:[#allocation26_spill] sm:$0xff]  ;;  %v11117_v26 = vld [vmem:[#allocation33_spill] sm:$0xff] }
 0x250   : > { %v7279_v46 = vmul.f32 %v6990_v35, %v11079_v19  ;;  %v7297_v61 = vmul.f32 %v6990_v35, %v11088_v31  ;;  %v11090_v19 = vld [vmem:[#allocation23_spill] sm:$0xff]  ;;  %v11099_v31 = vld [vmem:[#allocation24_spill] sm:$0xff] }
 0x251   : > { %11098 = vst [vmem:[#allocation11_spill] sm:$0xff] %v7315_v43  ;;  %11107 = vst [vmem:[#allocation17_spill] sm:$0xff] %v7333_v59  ;;  %v11109_v43 = vsub.f32 %v11108_v40, %v6834_v51  ;;  %v11118_v59 = vsub.f32 %v11117_v26, %v6834_v51 }
 0x252   : > { %11080 = vst [vmem:[#allocation4_spill] sm:$0xff] %v7279_v46  ;;  %11089 = vst [vmem:[#allocation10_spill] sm:$0xff] %v7297_v61  ;;  %v11091_v46 = vsub.f32 %v11090_v19, %v6834_v51  ;;  %v11100_v61 = vsub.f32 %v11099_v31, %v6834_v51 }
 0x253   : > { %v7339_v31 = vmul.f32 %v6990_v35, %v11109_v43  ;;  %v7357_v40 = vmul.f32 %v6990_v35, %v11118_v59  ;;  %v11120_v43 = vld [vmem:[#allocation30_spill] sm:$0xff]  ;;  %v11129_v59 = vld [vmem:[#allocation37_spill] sm:$0xff] }
 0x254   : > { %v7303_v10 = vmul.f32 %v6990_v35, %v11091_v46  ;;  %v7321_v19 = vmul.f32 %v6990_v35, %v11100_v61  ;;  %v11102_v46 = vld [vmem:[#allocation27_spill] sm:$0xff]  ;;  %v11111_v61 = vld [vmem:[#allocation28_spill] sm:$0xff] }
 0x255   : > { %11110 = vst [vmem:[#allocation14_spill] sm:$0xff] %v7339_v31  ;;  %11119 = vst [vmem:[#allocation21_spill] sm:$0xff] %v7357_v40  ;;  %v11121_v31 = vsub.f32 %v11120_v43, %v6834_v51  ;;  %v11130_v40 = vsub.f32 %v11129_v59, %v6834_v51 }
 0x256   : > { %11092 = vst [vmem:[#allocation9_spill] sm:$0xff] %v7303_v10  ;;  %11101 = vst [vmem:[#allocation12_spill] sm:$0xff] %v7321_v19  ;;  %v11103_v10 = vsub.f32 %v11102_v46, %v6834_v51  ;;  %v11112_v19 = vsub.f32 %v11111_v61, %v6834_v51 }
 0x257   : > { %v7363_v61 = vmul.f32 %v6990_v35, %v11121_v31  ;;  %v7381_v43 = vmul.f32 %v6990_v35, %v11130_v40  ;;  %v11132_v31 = vld [vmem:[#allocation34_spill] sm:$0xff]  ;;  %v11141_v40 = vld [vmem:[#allocation41_spill] sm:$0xff] }
 0x258   : > { %v7327_v25 = vmul.f32 %v6990_v35, %v11103_v10  ;;  %v7345_v46 = vmul.f32 %v6990_v35, %v11112_v19  ;;  %v11114_v10 = vld [vmem:[#allocation31_spill] sm:$0xff]  ;;  %v11123_v19 = vld [vmem:[#allocation32_spill] sm:$0xff] }
 0x259   : > { %11122 = vst [vmem:[#allocation18_spill] sm:$0xff] %v7363_v61  ;;  %11131 = vst [vmem:[#allocation25_spill] sm:$0xff] %v7381_v43  ;;  %v11133_v61 = vsub.f32 %v11132_v31, %v6834_v51  ;;  %v11142_v43 = vsub.f32 %v11141_v40, %v6834_v51 }
 0x25a   : > { %11104 = vst [vmem:[#allocation15_spill] sm:$0xff] %v7327_v25  ;;  %11113 = vst [vmem:[#allocation16_spill] sm:$0xff] %v7345_v46  ;;  %v11115_v25 = vsub.f32 %v11114_v10, %v6834_v51  ;;  %v11124_v46 = vsub.f32 %v11123_v19, %v6834_v51 }
 0x25b   : > { %v7387_v19 = vmul.f32 %v6990_v35, %v11133_v61  ;;  %v7405_v31 = vmul.f32 %v6990_v35, %v11142_v43  ;;  %v11144_v61 = vld [vmem:[#allocation38_spill] sm:$0xff]  ;;  %v11153_v43 = vld [vmem:[#allocation45_spill] sm:$0xff] }
 0x25c   : > { %v7351_v52 = vmul.f32 %v6990_v35, %v11115_v25  ;;  %v7369_v10 = vmul.f32 %v6990_v35, %v11124_v46  ;;  %v11126_v25 = vld [vmem:[#allocation35_spill] sm:$0xff]  ;;  %v11135_v46 = vld [vmem:[#allocation36_spill] sm:$0xff] }
 0x25d   : > { %11134 = vst [vmem:[#allocation22_spill] sm:$0xff] %v7387_v19  ;;  %11143 = vst [vmem:[#allocation29_spill] sm:$0xff] %v7405_v31  ;;  %v11145_v19 = vsub.f32 %v11144_v61, %v6834_v51  ;;  %v11154_v31 = vsub.f32 %v11153_v43, %v6834_v51 }
 0x25e   : > { %11116 = vst [vmem:[#allocation19_spill] sm:$0xff] %v7351_v52  ;;  %11125 = vst [vmem:[#allocation20_spill] sm:$0xff] %v7369_v10  ;;  %v11127_v52 = vsub.f32 %v11126_v25, %v6834_v51  ;;  %v11136_v10 = vsub.f32 %v11135_v46, %v6834_v51 }
 0x25f   : > { %v7411_v46 = vmul.f32 %v6990_v35, %v11145_v19  ;;  %v7429_v61 = vmul.f32 %v6990_v35, %v11154_v31  ;;  %v11156_v19 = vld [vmem:[#allocation42_spill] sm:$0xff]  ;;  %v11165_v31 = vld [vmem:[#allocation49_spill] sm:$0xff] }
 0x260   : > { %v7375_v26 = vmul.f32 %v6990_v35, %v11127_v52  ;;  %v7393_v25 = vmul.f32 %v6990_v35, %v11136_v10  ;;  %v11138_v52 = vld [vmem:[#allocation39_spill] sm:$0xff]  ;;  %v11147_v10 = vld [vmem:[#allocation40_spill] sm:$0xff] }
 0x261   : > { %11146 = vst [vmem:[#allocation26_spill] sm:$0xff] %v7411_v46  ;;  %11155 = vst [vmem:[#allocation33_spill] sm:$0xff] %v7429_v61  ;;  %v11157_v46 = vsub.f32 %v11156_v19, %v6834_v51  ;;  %v11166_v61 = vsub.f32 %v11165_v31, %v6834_v51 }
 0x262   : > { %11128 = vst [vmem:[#allocation23_spill] sm:$0xff] %v7375_v26  ;;  %11137 = vst [vmem:[#allocation24_spill] sm:$0xff] %v7393_v25  ;;  %v11139_v26 = vsub.f32 %v11138_v52, %v6834_v51  ;;  %v11148_v25 = vsub.f32 %v11147_v10, %v6834_v51 }
 0x263   : > { %v7435_v10 = vmul.f32 %v6990_v35, %v11157_v46  ;;  %v7453_v19 = vmul.f32 %v6990_v35, %v11166_v61  ;;  %v11168_v46 = vld [vmem:[#allocation46_spill] sm:$0xff]  ;;  %v11177_v61 = vld [vmem:[#allocation53_spill] sm:$0xff] }
 0x264   : > { %v7399_v59 = vmul.f32 %v6990_v35, %v11139_v26  ;;  %v7417_v52 = vmul.f32 %v6990_v35, %v11148_v25  ;;  %v11150_v26 = vld [vmem:[#allocation43_spill] sm:$0xff]  ;;  %v11159_v25 = vld [vmem:[#allocation44_spill] sm:$0xff] }
 0x265   : > { %11158 = vst [vmem:[#allocation30_spill] sm:$0xff] %v7435_v10  ;;  %11167 = vst [vmem:[#allocation37_spill] sm:$0xff] %v7453_v19  ;;  %v11169_v10 = vsub.f32 %v11168_v46, %v6834_v51  ;;  %v11178_v19 = vsub.f32 %v11177_v61, %v6834_v51 }
 0x266   : > { %11140 = vst [vmem:[#allocation27_spill] sm:$0xff] %v7399_v59  ;;  %11149 = vst [vmem:[#allocation28_spill] sm:$0xff] %v7417_v52  ;;  %v11151_v59 = vsub.f32 %v11150_v26, %v6834_v51  ;;  %v11160_v52 = vsub.f32 %v11159_v25, %v6834_v51 }
 0x267   : > { %v7459_v25 = vmul.f32 %v6990_v35, %v11169_v10  ;;  %v7477_v46 = vmul.f32 %v6990_v35, %v11178_v19  ;;  %v11180_v10 = vld [vmem:[#allocation50_spill] sm:$0xff]  ;;  %v11189_v19 = vld [vmem:[#allocation57_spill] sm:$0xff] }
 0x268   : > { %v7423_v40 = vmul.f32 %v6990_v35, %v11151_v59  ;;  %v7441_v26 = vmul.f32 %v6990_v35, %v11160_v52  ;;  %v11162_v59 = vld [vmem:[#allocation47_spill] sm:$0xff]  ;;  %v11171_v52 = vld [vmem:[#allocation48_spill] sm:$0xff] }
 0x269   : > { %11170 = vst [vmem:[#allocation34_spill] sm:$0xff] %v7459_v25  ;;  %11179 = vst [vmem:[#allocation41_spill] sm:$0xff] %v7477_v46  ;;  %v11181_v25 = vsub.f32 %v11180_v10, %v6834_v51  ;;  %v11190_v46 = vsub.f32 %v11189_v19, %v6834_v51 }
 0x26a   : > { %11152 = vst [vmem:[#allocation31_spill] sm:$0xff] %v7423_v40  ;;  %11161 = vst [vmem:[#allocation32_spill] sm:$0xff] %v7441_v26  ;;  %v11163_v40 = vsub.f32 %v11162_v59, %v6834_v51  ;;  %v11172_v26 = vsub.f32 %v11171_v52, %v6834_v51 }
 0x26b   : > { %v7483_v52 = vmul.f32 %v6990_v35, %v11181_v25  ;;  %v7501_v10 = vmul.f32 %v6990_v35, %v11190_v46  ;;  %v11192_v25 = vld [vmem:[#allocation54_spill] sm:$0xff]  ;;  %v11201_v46 = vld [vmem:[#allocation61_spill] sm:$0xff] }
 0x26c   : > { %v7447_v43 = vmul.f32 %v6990_v35, %v11163_v40  ;;  %v7465_v59 = vmul.f32 %v6990_v35, %v11172_v26  ;;  %v11174_v40 = vld [vmem:[#allocation51_spill] sm:$0xff]  ;;  %v11183_v26 = vld [vmem:[#allocation52_spill] sm:$0xff] }
 0x26d   : > { %11182 = vst [vmem:[#allocation38_spill] sm:$0xff] %v7483_v52  ;;  %11191 = vst [vmem:[#allocation45_spill] sm:$0xff] %v7501_v10  ;;  %v11193_v52 = vsub.f32 %v11192_v25, %v6834_v51  ;;  %v11202_v10 = vsub.f32 %v11201_v46, %v6834_v51 }
 0x26e   : > { %11164 = vst [vmem:[#allocation35_spill] sm:$0xff] %v7447_v43  ;;  %11173 = vst [vmem:[#allocation36_spill] sm:$0xff] %v7465_v59  ;;  %v11175_v43 = vsub.f32 %v11174_v40, %v6834_v51  ;;  %v11184_v59 = vsub.f32 %v11183_v26, %v6834_v51 }
 0x26f   : > { %v7507_v26 = vmul.f32 %v6990_v35, %v11193_v52  ;;  %v7525_v25 = vmul.f32 %v6990_v35, %v11202_v10  ;;  %v11204_v52 = vld [vmem:[#allocation58_spill] sm:$0xff]  ;;  %v11213_v10 = vld [vmem:[#allocation65_spill] sm:$0xff] }
 0x270   : > { %v7471_v31 = vmul.f32 %v6990_v35, %v11175_v43  ;;  %v7489_v40 = vmul.f32 %v6990_v35, %v11184_v59  ;;  %v11186_v43 = vld [vmem:[#allocation55_spill] sm:$0xff]  ;;  %v11195_v59 = vld [vmem:[#allocation56_spill] sm:$0xff] }
 0x271   : > { %11194 = vst [vmem:[#allocation42_spill] sm:$0xff] %v7507_v26  ;;  %11203 = vst [vmem:[#allocation49_spill] sm:$0xff] %v7525_v25  ;;  %v11205_v26 = vsub.f32 %v11204_v52, %v6834_v51  ;;  %v11214_v25 = vsub.f32 %v11213_v10, %v6834_v51 }
 0x272   : > { %11176 = vst [vmem:[#allocation39_spill] sm:$0xff] %v7471_v31  ;;  %11185 = vst [vmem:[#allocation40_spill] sm:$0xff] %v7489_v40  ;;  %v11187_v31 = vsub.f32 %v11186_v43, %v6834_v51  ;;  %v11196_v40 = vsub.f32 %v11195_v59, %v6834_v51 }
 0x273   : > { %v7531_v59 = vmul.f32 %v6990_v35, %v11205_v26  ;;  %v7549_v52 = vmul.f32 %v6990_v35, %v11214_v25  ;;  %v11216_v26 = vld [vmem:[#allocation62_spill] sm:$0xff]  ;;  %v11225_v25 = vld [vmem:[#allocation69_spill] sm:$0xff] }
 0x274   : > { %v7495_v61 = vmul.f32 %v6990_v35, %v11187_v31  ;;  %v7513_v43 = vmul.f32 %v6990_v35, %v11196_v40  ;;  %v11198_v31 = vld [vmem:[#allocation59_spill] sm:$0xff]  ;;  %v11207_v40 = vld [vmem:[#allocation60_spill] sm:$0xff] }
 0x275   : > { %11206 = vst [vmem:[#allocation46_spill] sm:$0xff] %v7531_v59  ;;  %11215 = vst [vmem:[#allocation53_spill] sm:$0xff] %v7549_v52  ;;  %v11217_v59 = vsub.f32 %v11216_v26, %v6834_v51  ;;  %v11226_v52 = vsub.f32 %v11225_v25, %v6834_v51 }
 0x276   : > { %11188 = vst [vmem:[#allocation43_spill] sm:$0xff] %v7495_v61  ;;  %11197 = vst [vmem:[#allocation44_spill] sm:$0xff] %v7513_v43  ;;  %v11199_v61 = vsub.f32 %v11198_v31, %v6834_v51  ;;  %v11208_v43 = vsub.f32 %v11207_v40, %v6834_v51 }
 0x277   : > { %v7555_v40 = vmul.f32 %v6990_v35, %v11217_v59  ;;  %v7573_v26 = vmul.f32 %v6990_v35, %v11226_v52  ;;  %v11227_v59 = vld [vmem:[#allocation66_spill] sm:$0xff]  ;;  %v11234_v52 = vsub.f32 %v11009_v41, %v6834_v51 }
 0x278   : > { %v7519_v19 = vmul.f32 %v6990_v35, %v11199_v61  ;;  %v7537_v31 = vmul.f32 %v6990_v35, %v11208_v43  ;;  %v11210_v61 = vld [vmem:[#allocation63_spill] sm:$0xff]  ;;  %v11219_v43 = vld [vmem:[#allocation64_spill] sm:$0xff] }
 0x279   : > { %11218 = vst [vmem:[#allocation50_spill] sm:$0xff] %v7555_v40  ;;  %v11228_v40 = vsub.f32 %v11227_v59, %v6834_v51  ;;  %v7597_v59 = vmul.f32 %v6990_v35, %v11234_v52  ;;  %v11240_v52 = vld [vmem:[#allocation77_spill] sm:$0xff] }
 0x27a   : > { %11200 = vst [vmem:[#allocation47_spill] sm:$0xff] %v7519_v19  ;;  %11209 = vst [vmem:[#allocation48_spill] sm:$0xff] %v7537_v31  ;;  %v11211_v19 = vsub.f32 %v11210_v61, %v6834_v51  ;;  %v11220_v31 = vsub.f32 %v11219_v43, %v6834_v51 }
 0x27b   : > { %v7579_v43 = vmul.f32 %v6990_v35, %v11228_v40  ;;  %11235 = vst [vmem:[#allocation54_spill] sm:$0xff] %v7597_v59  ;;  %v11236_v40 = vsub.f32 %v11010_v54, %v6834_v51  ;;  %v11241_v59 = vsub.f32 %v11240_v52, %v6834_v51 }
 0x27c   : > { %v7543_v46 = vmul.f32 %v6990_v35, %v11211_v19  ;;  %v7561_v61 = vmul.f32 %v6990_v35, %v11220_v31  ;;  %v11222_v19 = vld [vmem:[#allocation67_spill] sm:$0xff]  ;;  %v11229_v31 = vld [vmem:[#allocation68_spill] sm:$0xff] }
 0x27d   : > { %v7621_v54 = vmul.f32 %v6990_v35, %v11241_v59  ;;  %v11248_v59 = vld [vmem:[#allocation81_spill] sm:$0xff] }
 0x27e   : > { %11212 = vst [vmem:[#allocation51_spill] sm:$0xff] %v7543_v46  ;;  %11221 = vst [vmem:[#allocation52_spill] sm:$0xff] %v7561_v61  ;;  %v11223_v46 = vsub.f32 %v11222_v19, %v6834_v51  ;;  %v11230_v61 = vsub.f32 %v11229_v31, %v6834_v51  ;;  %v7603_v31 = vmul.f32 %v6990_v35, %v11236_v40 }
 0x27f   : > { %11242 = vst [vmem:[#allocation56_spill] sm:$0xff] %v7621_v54  ;;  %v11243_v40 = vsub.f32 %v11014_v5, %v6834_v51  ;;  %v11249_v54 = vsub.f32 %v11248_v59, %v6834_v51 }
 0x280   : > { %v7567_v10 = vmul.f32 %v6990_v35, %v11223_v46  ;;  %v7585_v19 = vmul.f32 %v6990_v35, %v11230_v61  ;;  %v11231_v46 = vld [vmem:[#allocation71_spill] sm:$0xff]  ;;  %v11237_v61 = vsub.f32 %v11011_v23, %v6834_v51 }
 0x281   : > { %v7627_v23 = vmul.f32 %v6990_v35, %v11243_v40  ;;  %v7645_v5 = vmul.f32 %v6990_v35, %v11249_v54  ;;  %v11251_v40 = vld [vmem:[#allocation78_spill] sm:$0xff]  ;;  %v11257_v54 = vld [vmem:[#allocation85_spill] sm:$0xff] }
 0x282   : > { %11224 = vst [vmem:[#allocation55_spill] sm:$0xff] %v7567_v10  ;;  %v11232_v10 = vsub.f32 %v11231_v46, %v6834_v51  ;;  %v7609_v46 = vmul.f32 %v6990_v35, %v11237_v61  ;;  %v11245_v61 = vsub.f32 %v11015_v48, %v6834_v51 }
 0x283   : > { %11244 = vst [vmem:[#allocation59_spill] sm:$0xff] %v7627_v23  ;;  %11250 = vst [vmem:[#allocation58_spill] sm:$0xff] %v7645_v5  ;;  %v11252_v23 = vsub.f32 %v11251_v40, %v6834_v51  ;;  %v11258_v5 = vsub.f32 %v11257_v54, %v6834_v51 }
 0x284   : > { %v7591_v25 = vmul.f32 %v6990_v35, %v11232_v10  ;;  %v11238_v10 = vld [vmem:[#allocation75_spill] sm:$0xff] }
 0x285   : > { %v7651_v48 = vmul.f32 %v6990_v35, %v11252_v23  ;;  %v7669_v40 = vmul.f32 %v6990_v35, %v11258_v5  ;;  %v11259_v23 = vsub.f32 %v11019_v24, %v6834_v51  ;;  %v11263_v5 = vsub.f32 %v10909_v38, %v6834_v51 }
 0x286   : > { %11233 = vst [vmem:[#allocation57_spill] sm:$0xff] %v7591_v25  ;;  %v11239_v25 = vsub.f32 %v11238_v10, %v6834_v51  ;;  %v7633_v10 = vmul.f32 %v6990_v35, %v11245_v61  ;;  %v11253_v61 = vsub.f32 %v11017_v20, %v6834_v51 }
 0x287   : > { %v7675_v20 = vmul.f32 %v6990_v35, %v11259_v23  ;;  %v7693_v24 = vmul.f32 %v6990_v35, %v11263_v5  ;;  %v11264_v23 = vsub.f32 %v11021_v2, %v6834_v51  ;;  %v11267_v5 = vsub.f32 %v10916_v42, %v6834_v51 }
 0x288   : > { %v7615_v41 = vmul.f32 %v6990_v35, %v11239_v25  ;;  %v11246_v25 = vsub.f32 %v10890_v4, %v6834_v51  ;;  %v7657_v4 = vmul.f32 %v6990_v35, %v11253_v61  ;;  %v11260_v61 = vsub.f32 %v11020_v0, %v6834_v51 }
 0x289   : > { %v7699_v0 = vmul.f32 %v6990_v35, %v11264_v23  ;;  %v7717_v2 = vmul.f32 %v6990_v35, %v11267_v5  ;;  %v11268_v23 = vsub.f32 %v6103_v30, %v6834_v51  ;;  %v11271_v5 = vsub.f32 %v6148_v21, %v6834_v51 }
 0x28a   : > { %v7639_v52 = vmul.f32 %v6990_v35, %v11246_v25  ;;  %v11254_v25 = vld [vmem:[#allocation83_spill] sm:$0xff] }
 0x28b   : > { %v7741_v30 = vmul.f32 %v6990_v35, %v11271_v5  ;;  %v11275_v5 = vsub.f32 %v6220_v29, %v6834_v51  ;;  %v11279_v29 = vsub.f32 %v6275_v33, %v6834_v51 }
 0x28c   : > { %11247 = vst [vmem:[#allocation61_spill] sm:$0xff] %v7639_v52  ;;  %v11255_v52 = vsub.f32 %v11254_v25, %v6834_v51  ;;  %v7681_v25 = vmul.f32 %v6990_v35, %v11260_v61  ;;  %v11265_v61 = vsub.f32 %v11022_v17, %v6834_v51  ;;  %v7723_v17 = vmul.f32 %v6990_v35, %v11268_v23 }
 0x28d   : > { %v11272_v23 = vsub.f32 %v11025_v47, %v6834_v51  ;;  %v7765_v47 = vmul.f32 %v6990_v35, %v11275_v5  ;;  %v7786_v5 = vmul.f32 %v6990_v35, %v11279_v29  ;;  %v11283_v29 = vsub.f32 %v6351_v49, %v6834_v51 }
 0x28e   : > { %v7663_v59 = vmul.f32 %v6990_v35, %v11255_v52  ;;  %v11261_v52 = vld [vmem:[#allocation87_spill] sm:$0xff] }
 0x290   : > { %11256 = vst [vmem:[#allocation60_spill] sm:$0xff] %v7663_v59  ;;  %v11262_v59 = vsub.f32 %v11261_v52, %v6834_v51  ;;  %v7705_v52 = vmul.f32 %v6990_v35, %v11265_v61  ;;  %v11269_v61 = vsub.f32 %v11023_v39, %v6834_v51  ;;  %v7747_v39 = vmul.f32 %v6990_v35, %v11272_v23 }
 0x291   : > { %v11276_v23 = vsub.f32 %v6188_v3, %v6834_v51  ;;  %v11280_v3 = vsub.f32 %v6296_v12, %v6834_v51  ;;  %v7810_v12 = vmul.f32 %v6990_v35, %v11283_v29  ;;  %v11287_v29 = vsub.f32 %v6427_v58, %v6834_v51 }
 0x292   : > { %v7687_v54 = vmul.f32 %v6990_v35, %v11262_v59  ;;  %v11266_v59 = vsub.f32 %v10912_v53, %v6834_v51  ;;  %v7729_v53 = vmul.f32 %v6990_v35, %v11269_v61  ;;  %v11273_v61 = vsub.f32 %v6145_v7, %v6834_v51 }
 0x293   : > { %v7771_v7 = vmul.f32 %v6990_v35, %v11276_v23  ;;  %v7792_v23 = vmul.f32 %v6990_v35, %v11280_v3  ;;  %v11284_v3 = vsub.f32 %v6372_v16, %v6834_v51  ;;  %v7834_v16 = vmul.f32 %v6990_v35, %v11287_v29 }
 0x294   : > { %v7711_v38 = vmul.f32 %v6990_v35, %v11266_v59  ;;  %v11270_v59 = vsub.f32 %v10919_v37, %v6834_v51  ;;  %v7753_v37 = vmul.f32 %v6990_v35, %v11273_v61  ;;  %v11277_v61 = vsub.f32 %v6209_v27, %v6834_v51 }
 0x295   : > { %v11281_v27 = vsub.f32 %v6264_v18, %v6834_v51  ;;  %v7816_v18 = vmul.f32 %v6990_v35, %v11284_v3  ;;  %v11288_v3 = vsub.f32 %v6448_v11, %v6834_v51  ;;  %v5257_v11 = vld [vmem:[%s10473_s6 + $0x8] sm:$0xff]   ;;  %v11292_v29 = vsub.f32 %v6503_v9, %v6834_v51 }
 0x296   : > { %v7735_v42 = vmul.f32 %v6990_v35, %v11270_v59  ;;  %v11274_v59 = vsub.f32 %v6199_v36, %v6834_v51  ;;  %v7777_v36 = vmul.f32 %v6990_v35, %v11277_v61 }
 0x297   : > { %v7798_v61 = vmul.f32 %v6990_v35, %v11281_v27  ;;  %v11285_v27 = vsub.f32 %v6340_v55, %v6834_v51  ;;  %v7840_v55 = vmul.f32 %v6990_v35, %v11288_v3  ;;  %v7861_v3 = vmul.f32 %v6990_v35, %v11292_v29 }
 0x298   : > { %v7759_v21 = vmul.f32 %v6990_v35, %v11274_v59  ;;  %11278 = vst [vmem:[#allocation63_spill] sm:$0xff] %v7777_v36  ;;  %v5256_v59 = vld [vmem:[%s10473_s6] sm:$0xff]   ;;  %v11282_v36 = vsub.f32 %v6285_v50, %v6834_v51  ;;  %v11299_v29 = vsub.f32 %v6579_v62, %v6834_v51 }
 0x299   : > { %v7822_v50 = vmul.f32 %v6990_v35, %v11285_v27  ;;  %5009 = vmatprep.subr.bf16.mxu1 %v5256_v59  ;;  %v11289_v27 = vsub.f32 %v6416_v60, %v6834_v51  ;;  %v11293_v60 = vld [vmem:[#allocation154_spill] sm:$0xff] }
 0x29a   : > { %v7804_v33 = vmul.f32 %v6990_v35, %v11282_v36  ;;  %v11286_v36 = vsub.f32 %v6361_v32, %v6834_v51  ;;  %5010 = vmatpush3.bf16.msra.mxu1 %v5256_v59 }
 0x29b   : > { %v7846_v32 = vmul.f32 %v6990_v35, %v11289_v27  ;;  %v11294_v27 = vsub.f32 %v11293_v60, %v6834_v51  ;;  %v7885_v60 = vmul.f32 %v6990_v35, %v11299_v29  ;;  %5011 = vmatprep.subr.bf16.mxu1 %v5257_v11 }
 0x29c   : > { %v7828_v49 = vmul.f32 %v6990_v35, %v11286_v36  ;;  %v11291_v36 = vsub.f32 %v6437_v57, %v6834_v51  ;;  %v11296_v57 = vsub.f32 %v6492_v45, %v6834_v51 }
 0x29d   : > { %11290 = vst [vmem:[#allocation65_spill] sm:$0xff] %v7846_v32  ;;  %v7867_v32 = vmul.f32 %v6990_v35, %v11294_v27  ;;  %v11300_v27 = vld [vmem:[#allocation162_spill] sm:$0xff] }
 0x29e   : > { %v7852_v58 = vmul.f32 %v6990_v35, %v11291_v36  ;;  %v7873_v59 = vmul.f32 %v6990_v35, %v11296_v57  ;;  %v11297_v36 = vsub.f32 %v6513_v14, %v6834_v51  ;;  %v11302_v57 = vsub.f32 %v11026_v34, %v6834_v51  ;;  %v11306_v34 = vld [vmem:[#allocation73_spill] sm:$0xff]  ;;  %5012 = vmatpush3.bf16.msra.mxu1 %v5257_v11  ;;  %v11313_v11 = vld [vmem:[#allocation76_spill] sm:$0xff] }
 0x29f   : > { %11295 = vst [vmem:[#allocation62_spill] sm:$0xff] %v7867_v32  ;;  %v11301_v32 = vsub.f32 %v11300_v27, %v6834_v51  ;;  %v11308_v27 = vld [vmem:[#allocation72_spill] sm:$0xff] }
 0x2a0   : > { %v7879_v9 = vmul.f32 %v6990_v35, %v11297_v36  ;;  %v7897_v14 = vmul.f32 %v6990_v35, %v11302_v57  ;;  %v11303_v36 = vld [vmem:[#allocation5_spill] sm:$0xff]  ;;  %v11311_v57 = vld [vmem:[#allocation74_spill] sm:$0xff] }
 0x2a1   : > { %v7891_v45 = vmul.f32 %v6990_v35, %v11301_v32  ;;  %v7905_v62 = vmul.f32 %v11303_v36, %v7141_v13  ;;  %v7909_v29 = vmul.f32 %v11303_v36, %v7147_v6  ;;  %v7913_v32 = vmul.f32 %v11303_v36, %v7153_v28  ;;  %v11307_v28 = vld [vmem:[#allocation70_spill] sm:$0xff] }
 0x2a2   : > { %11298 = vst [vmem:[#allocation64_spill] sm:$0xff] %v7879_v9  ;;  %v7901_v9 = vmul.f32 %v11303_v36, %v7135_v44  ;;  %v7917_v51 = vmul.f32 %v11303_v36, %v7159_v1  ;;  %v7921_v35 = vmul.f32 %v11303_v36, %v7165_v63  ;;  %v7925_v13 = vmul.f32 %v11303_v36, %v7171_v15 }
 0x2a3   : > { %11305 = vst [vmem:[#allocation69_spill] sm:$0xff] %v7905_v62  ;;  %v7929_v6 = vmul.f32 %v11303_v36, %v7177_v22  ;;  %v7933_v44 = vmul.f32 %v11303_v36, %v11306_v34  ;;  %v7937_v1 = vmul.f32 %v11303_v36, %v11307_v28  ;;  %v7941_v63 = vmul.f32 %v11303_v36, %v7195_v8  ;;  %v11315_v62 = vld [vmem:[#allocation80_spill] sm:$0xff] }
 0x2a4   : > { %11304 = vst [vmem:[#allocation67_spill] sm:$0xff] %v7901_v9  ;;  %v7945_v15 = vmul.f32 %v11303_v36, %v11308_v27  ;;  %v7949_v22 = vmul.f32 %v11303_v36, %v7207_v56  ;;  %v7953_v34 = vmul.f32 %v11303_v36, %v11311_v57  ;;  %v7957_v28 = vmul.f32 %v11303_v36, %v11313_v11  ;;  %v11317_v9 = vld [vmem:[#allocation82_spill] sm:$0xff] }
 0x2a5   : > { %v7961_v8 = vmul.f32 %v11303_v36, %v11315_v62  ;;  %v7965_v27 = vmul.f32 %v11303_v36, %v11317_v9 }
 0x2a6   : > { %11309 = vst [vmem:[#allocation66_spill] sm:$0xff] %v7945_v15  ;;  %11310 = vst [vmem:[#allocation68_spill] sm:$0xff] %v7949_v22  ;;  %v11319_v15 = vld [vmem:[#allocation84_spill] sm:$0xff]  ;;  %v11321_v22 = vld [vmem:[#allocation86_spill] sm:$0xff] }
 0x2a7   : > { %11312 = vst [vmem:[#allocation71_spill] sm:$0xff] %v7953_v34  ;;  %11314 = vst [vmem:[#allocation75_spill] sm:$0xff] %v7957_v28  ;;  %v7969_v56 = vmul.f32 %v11303_v36, %v11319_v15  ;;  %v7973_v57 = vmul.f32 %v11303_v36, %v11321_v22  ;;  %v11323_v34 = vld [vmem:[#allocation88_spill] sm:$0xff]  ;;  %v11325_v28 = vld [vmem:[#allocation91_spill] sm:$0xff] }
 0x2a8   : > { %11316 = vst [vmem:[#allocation77_spill] sm:$0xff] %v7961_v8  ;;  %11318 = vst [vmem:[#allocation81_spill] sm:$0xff] %v7965_v27  ;;  %v7977_v11 = vmul.f32 %v11303_v36, %v11323_v34  ;;  %v7981_v62 = vmul.f32 %v11303_v36, %v11325_v28  ;;  %v11327_v8 = vld [vmem:[#allocation93_spill] sm:$0xff]  ;;  %v11329_v27 = vld [vmem:[#allocation166_spill] sm:$0xff] }
 0x2a9   : > { %11320 = vst [vmem:[#allocation78_spill] sm:$0xff] %v7969_v56  ;;  %11322 = vst [vmem:[#allocation83_spill] sm:$0xff] %v7973_v57  ;;  %v7985_v9 = vmul.f32 %v11303_v36, %v11327_v8  ;;  %v7989_v15 = vmul.f32 %v11303_v36, %v11329_v27  ;;  %v11331_v56 = vld [vmem:[#allocation2_spill] sm:$0xff]  ;;  %v11333_v57 = vld [vmem:[#allocation4_spill] sm:$0xff] }
 0x2aa   : > { %11324 = vst [vmem:[#allocation85_spill] sm:$0xff] %v7977_v11  ;;  %11326 = vst [vmem:[#allocation87_spill] sm:$0xff] %v7981_v62  ;;  %v7993_v22 = vmul.f32 %v11303_v36, %v11331_v56  ;;  %v7997_v34 = vmul.f32 %v11303_v36, %v11333_v57  ;;  %v11335_v11 = vld [vmem:[#allocation3_spill] sm:$0xff]  ;;  %v11337_v62 = vld [vmem:[#allocation8_spill] sm:$0xff] }
 0x2ab   : > { %11328 = vst [vmem:[#allocation154_spill] sm:$0xff] %v7985_v9  ;;  %11330 = vst [vmem:[#allocation162_spill] sm:$0xff] %v7989_v15  ;;  %v8001_v28 = vmul.f32 %v11303_v36, %v11335_v11  ;;  %v8005_v8 = vmul.f32 %v11303_v36, %v11337_v62  ;;  %v11339_v9 = vld [vmem:[#allocation10_spill] sm:$0xff]  ;;  %v11341_v15 = vld [vmem:[#allocation9_spill] sm:$0xff] }
 0x2ac   : > { %11332 = vst [vmem:[#allocation5_spill] sm:$0xff] %v7993_v22  ;;  %11334 = vst [vmem:[#allocation73_spill] sm:$0xff] %v7997_v34  ;;  %v8009_v27 = vmul.f32 %v11303_v36, %v11339_v9  ;;  %v8013_v56 = vmul.f32 %v11303_v36, %v11341_v15  ;;  %v11343_v22 = vld [vmem:[#allocation13_spill] sm:$0xff]  ;;  %v11345_v34 = vld [vmem:[#allocation11_spill] sm:$0xff] }
 0x2ad   : > { %11336 = vst [vmem:[#allocation70_spill] sm:$0xff] %v8001_v28  ;;  %11338 = vst [vmem:[#allocation72_spill] sm:$0xff] %v8005_v8  ;;  %v8017_v57 = vmul.f32 %v11303_v36, %v11343_v22  ;;  %v8021_v11 = vmul.f32 %v11303_v36, %v11345_v34  ;;  %v11347_v28 = vld [vmem:[#allocation12_spill] sm:$0xff]  ;;  %v11349_v8 = vld [vmem:[#allocation15_spill] sm:$0xff] }
 0x2ae   : > { %11340 = vst [vmem:[#allocation74_spill] sm:$0xff] %v8009_v27  ;;  %11342 = vst [vmem:[#allocation76_spill] sm:$0xff] %v8013_v56  ;;  %v8025_v62 = vmul.f32 %v11303_v36, %v11347_v28  ;;  %v8029_v9 = vmul.f32 %v11303_v36, %v11349_v8  ;;  %v11351_v27 = vld [vmem:[#allocation17_spill] sm:$0xff]  ;;  %v11353_v56 = vld [vmem:[#allocation14_spill] sm:$0xff] }
 0x2af   : > { %11344 = vst [vmem:[#allocation80_spill] sm:$0xff] %v8017_v57  ;;  %11346 = vst [vmem:[#allocation82_spill] sm:$0xff] %v8021_v11  ;;  %v8033_v15 = vmul.f32 %v11303_v36, %v11351_v27  ;;  %v8037_v22 = vmul.f32 %v11303_v36, %v11353_v56  ;;  %v11355_v57 = vld [vmem:[#allocation16_spill] sm:$0xff]  ;;  %v11357_v11 = vld [vmem:[#allocation19_spill] sm:$0xff] }
 0x2b0   : > { %11348 = vst [vmem:[#allocation84_spill] sm:$0xff] %v8025_v62  ;;  %11350 = vst [vmem:[#allocation86_spill] sm:$0xff] %v8029_v9  ;;  %v8041_v34 = vmul.f32 %v11303_v36, %v11355_v57  ;;  %v8045_v28 = vmul.f32 %v11303_v36, %v11357_v11  ;;  %v11359_v62 = vld [vmem:[#allocation21_spill] sm:$0xff]  ;;  %v11361_v9 = vld [vmem:[#allocation18_spill] sm:$0xff] }
 0x2b1   : > { %11352 = vst [vmem:[#allocation88_spill] sm:$0xff] %v8033_v15  ;;  %11354 = vst [vmem:[#allocation91_spill] sm:$0xff] %v8037_v22  ;;  %v8049_v8 = vmul.f32 %v11303_v36, %v11359_v62  ;;  %v8053_v27 = vmul.f32 %v11303_v36, %v11361_v9  ;;  %v11363_v15 = vld [vmem:[#allocation20_spill] sm:$0xff]  ;;  %v11365_v22 = vld [vmem:[#allocation23_spill] sm:$0xff] }
 0x2b2   : > { %11356 = vst [vmem:[#allocation93_spill] sm:$0xff] %v8041_v34  ;;  %11358 = vst [vmem:[#allocation166_spill] sm:$0xff] %v8045_v28  ;;  %v8057_v56 = vmul.f32 %v11303_v36, %v11363_v15  ;;  %v8061_v57 = vmul.f32 %v11303_v36, %v11365_v22  ;;  %v11367_v34 = vld [vmem:[#allocation25_spill] sm:$0xff]  ;;  %v11369_v28 = vld [vmem:[#allocation22_spill] sm:$0xff] }
 0x2b3   : > { %11360 = vst [vmem:[#allocation2_spill] sm:$0xff] %v8049_v8  ;;  %11362 = vst [vmem:[#allocation4_spill] sm:$0xff] %v8053_v27  ;;  %v8065_v11 = vmul.f32 %v11303_v36, %v11367_v34  ;;  %v8069_v62 = vmul.f32 %v11303_v36, %v11369_v28  ;;  %v11371_v8 = vld [vmem:[#allocation24_spill] sm:$0xff]  ;;  %v11373_v27 = vld [vmem:[#allocation27_spill] sm:$0xff] }
 0x2b4   : > { %11364 = vst [vmem:[#allocation3_spill] sm:$0xff] %v8057_v56  ;;  %11366 = vst [vmem:[#allocation8_spill] sm:$0xff] %v8061_v57  ;;  %v8073_v9 = vmul.f32 %v11303_v36, %v11371_v8  ;;  %v8077_v15 = vmul.f32 %v11303_v36, %v11373_v27  ;;  %v11375_v56 = vld [vmem:[#allocation29_spill] sm:$0xff]  ;;  %v11377_v57 = vld [vmem:[#allocation26_spill] sm:$0xff] }
 0x2b5   : > { %11368 = vst [vmem:[#allocation10_spill] sm:$0xff] %v8065_v11  ;;  %11370 = vst [vmem:[#allocation9_spill] sm:$0xff] %v8069_v62  ;;  %v8081_v22 = vmul.f32 %v11303_v36, %v11375_v56  ;;  %v8085_v34 = vmul.f32 %v11303_v36, %v11377_v57  ;;  %v11379_v11 = vld [vmem:[#allocation28_spill] sm:$0xff]  ;;  %v11381_v62 = vld [vmem:[#allocation31_spill] sm:$0xff] }
 0x2b6   : > { %11372 = vst [vmem:[#allocation13_spill] sm:$0xff] %v8073_v9  ;;  %11374 = vst [vmem:[#allocation11_spill] sm:$0xff] %v8077_v15  ;;  %v8089_v28 = vmul.f32 %v11303_v36, %v11379_v11  ;;  %v8093_v8 = vmul.f32 %v11303_v36, %v11381_v62  ;;  %v11383_v9 = vld [vmem:[#allocation33_spill] sm:$0xff]  ;;  %v11385_v15 = vld [vmem:[#allocation30_spill] sm:$0xff] }
 0x2b7   : > { %11376 = vst [vmem:[#allocation12_spill] sm:$0xff] %v8081_v22  ;;  %11378 = vst [vmem:[#allocation15_spill] sm:$0xff] %v8085_v34  ;;  %v8097_v27 = vmul.f32 %v11303_v36, %v11383_v9  ;;  %v8101_v56 = vmul.f32 %v11303_v36, %v11385_v15  ;;  %v11387_v22 = vld [vmem:[#allocation32_spill] sm:$0xff]  ;;  %v11389_v34 = vld [vmem:[#allocation35_spill] sm:$0xff] }
 0x2b8   : > { %11380 = vst [vmem:[#allocation17_spill] sm:$0xff] %v8089_v28  ;;  %11382 = vst [vmem:[#allocation14_spill] sm:$0xff] %v8093_v8  ;;  %v8105_v57 = vmul.f32 %v11303_v36, %v11387_v22  ;;  %v8109_v11 = vmul.f32 %v11303_v36, %v11389_v34  ;;  %v11391_v28 = vld [vmem:[#allocation37_spill] sm:$0xff]  ;;  %v11393_v8 = vld [vmem:[#allocation34_spill] sm:$0xff] }
 0x2b9   : > { %11384 = vst [vmem:[#allocation16_spill] sm:$0xff] %v8097_v27  ;;  %11386 = vst [vmem:[#allocation19_spill] sm:$0xff] %v8101_v56  ;;  %v8113_v62 = vmul.f32 %v11303_v36, %v11391_v28  ;;  %v8117_v9 = vmul.f32 %v11303_v36, %v11393_v8  ;;  %v11395_v27 = vld [vmem:[#allocation36_spill] sm:$0xff]  ;;  %v11397_v56 = vld [vmem:[#allocation39_spill] sm:$0xff] }
 0x2ba   : > { %11388 = vst [vmem:[#allocation21_spill] sm:$0xff] %v8105_v57  ;;  %11390 = vst [vmem:[#allocation18_spill] sm:$0xff] %v8109_v11  ;;  %v8121_v15 = vmul.f32 %v11303_v36, %v11395_v27  ;;  %v8125_v22 = vmul.f32 %v11303_v36, %v11397_v56  ;;  %v11399_v57 = vld [vmem:[#allocation41_spill] sm:$0xff]  ;;  %v11401_v11 = vld [vmem:[#allocation38_spill] sm:$0xff] }
 0x2bb   : > { %11392 = vst [vmem:[#allocation20_spill] sm:$0xff] %v8113_v62  ;;  %11394 = vst [vmem:[#allocation23_spill] sm:$0xff] %v8117_v9  ;;  %v8129_v34 = vmul.f32 %v11303_v36, %v11399_v57  ;;  %v8133_v28 = vmul.f32 %v11303_v36, %v11401_v11  ;;  %v11403_v62 = vld [vmem:[#allocation40_spill] sm:$0xff]  ;;  %v11405_v9 = vld [vmem:[#allocation43_spill] sm:$0xff] }
 0x2bc   : > { %11396 = vst [vmem:[#allocation25_spill] sm:$0xff] %v8121_v15  ;;  %11398 = vst [vmem:[#allocation22_spill] sm:$0xff] %v8125_v22  ;;  %v8137_v8 = vmul.f32 %v11303_v36, %v11403_v62  ;;  %v8141_v27 = vmul.f32 %v11303_v36, %v11405_v9  ;;  %v11407_v15 = vld [vmem:[#allocation45_spill] sm:$0xff]  ;;  %v11409_v22 = vld [vmem:[#allocation42_spill] sm:$0xff] }
 0x2bd   : > { %11400 = vst [vmem:[#allocation24_spill] sm:$0xff] %v8129_v34  ;;  %11402 = vst [vmem:[#allocation27_spill] sm:$0xff] %v8133_v28  ;;  %v8145_v56 = vmul.f32 %v11303_v36, %v11407_v15  ;;  %v8149_v57 = vmul.f32 %v11303_v36, %v11409_v22  ;;  %v11411_v34 = vld [vmem:[#allocation44_spill] sm:$0xff]  ;;  %v11413_v28 = vld [vmem:[#allocation47_spill] sm:$0xff] }
 0x2be   : > { %11404 = vst [vmem:[#allocation29_spill] sm:$0xff] %v8137_v8  ;;  %11406 = vst [vmem:[#allocation26_spill] sm:$0xff] %v8141_v27  ;;  %v8153_v11 = vmul.f32 %v11303_v36, %v11411_v34  ;;  %v8157_v62 = vmul.f32 %v11303_v36, %v11413_v28  ;;  %v11415_v8 = vld [vmem:[#allocation49_spill] sm:$0xff]  ;;  %v11417_v27 = vld [vmem:[#allocation46_spill] sm:$0xff] }
 0x2bf   : > { %11408 = vst [vmem:[#allocation28_spill] sm:$0xff] %v8145_v56  ;;  %11410 = vst [vmem:[#allocation31_spill] sm:$0xff] %v8149_v57  ;;  %v8161_v9 = vmul.f32 %v11303_v36, %v11415_v8  ;;  %v8165_v15 = vmul.f32 %v11303_v36, %v11417_v27  ;;  %v11419_v56 = vld [vmem:[#allocation48_spill] sm:$0xff]  ;;  %v11420_v57 = vld [vmem:[#allocation51_spill] sm:$0xff] }
 0x2c0   : > { %11412 = vst [vmem:[#allocation33_spill] sm:$0xff] %v8153_v11  ;;  %11414 = vst [vmem:[#allocation30_spill] sm:$0xff] %v8157_v62  ;;  %v8169_v22 = vmul.f32 %v11303_v36, %v11419_v56  ;;  %v8173_v34 = vmul.f32 %v11303_v36, %v11420_v57  ;;  %v11421_v11 = vld [vmem:[#allocation53_spill] sm:$0xff]  ;;  %v11422_v62 = vld [vmem:[#allocation50_spill] sm:$0xff]  ;;  %v8193_v57 = vmul.f32 %v11303_v36, %v7573_v26 }
 0x2c1   : > { %11416 = vst [vmem:[#allocation32_spill] sm:$0xff] %v8161_v9  ;;  %11418 = vst [vmem:[#allocation35_spill] sm:$0xff] %v8165_v15  ;;  %v8177_v28 = vmul.f32 %v11303_v36, %v11421_v11  ;;  %v8181_v8 = vmul.f32 %v11303_v36, %v11422_v62  ;;  %v11424_v9 = vld [vmem:[#allocation52_spill] sm:$0xff]  ;;  %v11426_v15 = vld [vmem:[#allocation55_spill] sm:$0xff]  ;;  %v8197_v11 = vmul.f32 %v11303_v36, %v7579_v43 }
 0x2c2   : > { %v8185_v27 = vmul.f32 %v11303_v36, %v11424_v9  ;;  %v8189_v56 = vmul.f32 %v11303_v36, %v11426_v15  ;;  %v8201_v62 = vmul.f32 %v11303_v36, %v7585_v19  ;;  %v8213_v26 = vmul.f32 %v11303_v36, %v7603_v31 }
 0x2c3   : > { %11423 = vst [vmem:[#allocation37_spill] sm:$0xff] %v8181_v8  ;;  %v11428_v8 = vld [vmem:[#allocation57_spill] sm:$0xff]  ;;  %v8217_v43 = vmul.f32 %v11303_v36, %v7609_v46  ;;  %v8221_v19 = vmul.f32 %v11303_v36, %v7615_v41  ;;  %v8233_v31 = vmul.f32 %v11303_v36, %v7633_v10 }
 0x2c4   : > { %11425 = vst [vmem:[#allocation34_spill] sm:$0xff] %v8185_v27  ;;  %11427 = vst [vmem:[#allocation36_spill] sm:$0xff] %v8201_v62  ;;  %v8205_v9 = vmul.f32 %v11303_v36, %v11428_v8  ;;  %v11430_v27 = vld [vmem:[#allocation54_spill] sm:$0xff]  ;;  %v11433_v62 = vld [vmem:[#allocation56_spill] sm:$0xff] }
 0x2c5   : > { %v8209_v15 = vmul.f32 %v11303_v36, %v11430_v27  ;;  %11431 = vst [vmem:[#allocation41_spill] sm:$0xff] %v8213_v26  ;;  %11432 = vst [vmem:[#allocation38_spill] sm:$0xff] %v8217_v43  ;;  %v8225_v8 = vmul.f32 %v11303_v36, %v11433_v62  ;;  %v11436_v26 = vld [vmem:[#allocation61_spill] sm:$0xff]  ;;  %v11437_v43 = vld [vmem:[#allocation58_spill] sm:$0xff]  ;;  %v8245_v62 = vmul.f32 %v11303_v36, %v7651_v48 }
 0x2c6   : > { %11429 = vst [vmem:[#allocation39_spill] sm:$0xff] %v8205_v9  ;;  %v11434_v9 = vld [vmem:[#allocation59_spill] sm:$0xff]  ;;  %v8237_v46 = vmul.f32 %v11303_v36, %v11436_v26  ;;  %v8241_v41 = vmul.f32 %v11303_v36, %v11437_v43  ;;  %v8257_v26 = vmul.f32 %v11303_v36, %v7669_v40  ;;  %v8261_v43 = vmul.f32 %v11303_v36, %v7675_v20 }
 0x2c7   : > { %v8229_v27 = vmul.f32 %v11303_v36, %v11434_v9  ;;  %v8249_v9 = vmul.f32 %v11303_v36, %v7657_v4  ;;  %v8265_v48 = vmul.f32 %v11303_v36, %v7681_v25  ;;  %v8269_v4 = vmul.f32 %v11303_v36, %v7687_v54 }
 0x2c8   : > { %v8277_v40 = vmul.f32 %v11303_v36, %v7699_v0  ;;  %v8281_v20 = vmul.f32 %v11303_v36, %v7705_v52  ;;  %v8285_v25 = vmul.f32 %v11303_v36, %v7711_v38  ;;  %v8289_v54 = vmul.f32 %v11303_v36, %v7717_v2 }
 0x2c9   : > { %11435 = vst [vmem:[#allocation40_spill] sm:$0xff] %v8229_v27  ;;  %v11438_v27 = vld [vmem:[#allocation60_spill] sm:$0xff]  ;;  %v8297_v0 = vmul.f32 %v11303_v36, %v7729_v53  ;;  %v8301_v52 = vmul.f32 %v11303_v36, %v7735_v42  ;;  %v8305_v38 = vmul.f32 %v11303_v36, %v7741_v30  ;;  %v8309_v2 = vmul.f32 %v11303_v36, %v7747_v39 }
 0x2ca   : > { %v8253_v10 = vmul.f32 %v11303_v36, %v11438_v27  ;;  %v8273_v27 = vmul.f32 %v11303_v36, %v7693_v24  ;;  %v8293_v24 = vmul.f32 %v11303_v36, %v7723_v17  ;;  %v8313_v17 = vmul.f32 %v11303_v36, %v7753_v37 }
 0x2cb   : > { %11439 = vst [vmem:[#allocation43_spill] sm:$0xff] %v8305_v38  ;;  %v8317_v53 = vmul.f32 %v11303_v36, %v7759_v21  ;;  %v8321_v42 = vmul.f32 %v11303_v36, %v7765_v47  ;;  %v8325_v30 = vmul.f32 %v11303_v36, %v7771_v7  ;;  %v11440_v38 = vld [vmem:[#allocation63_spill] sm:$0xff]  ;;  %v8333_v37 = vmul.f32 %v11303_v36, %v7786_v5 }
 0x2cc   : > { %v8329_v39 = vmul.f32 %v11303_v36, %v11440_v38  ;;  %v8337_v21 = vmul.f32 %v11303_v36, %v7792_v23  ;;  %v8341_v47 = vmul.f32 %v11303_v36, %v7798_v61  ;;  %v8345_v7 = vmul.f32 %v11303_v36, %v7804_v33 }
 0x2cd   : > { %v8349_v38 = vmul.f32 %v11303_v36, %v7810_v12  ;;  %v8353_v5 = vmul.f32 %v11303_v36, %v7816_v18  ;;  %v8357_v23 = vmul.f32 %v11303_v36, %v7822_v50  ;;  %v8361_v61 = vmul.f32 %v11303_v36, %v7828_v49 }
 0x2ce   : > { %v8365_v33 = vmul.f32 %v11303_v36, %v7834_v16  ;;  %v8369_v12 = vmul.f32 %v11303_v36, %v7840_v55  ;;  %v8377_v50 = vmul.f32 %v11303_v36, %v7852_v58  ;;  %v8381_v49 = vmul.f32 %v11303_v36, %v7861_v3 }
 0x2cf   : > { %11441 = vst [vmem:[#allocation45_spill] sm:$0xff] %v8349_v38  ;;  %11442 = vst [vmem:[#allocation42_spill] sm:$0xff] %v8361_v61  ;;  %v11444_v38 = vld [vmem:[#allocation65_spill] sm:$0xff]  ;;  %v11445_v61 = vld [vmem:[#allocation62_spill] sm:$0xff]  ;;  %v8389_v55 = vmul.f32 %v11303_v36, %v7873_v59  ;;  %v8397_v58 = vmul.f32 %v11303_v36, %v7885_v60  ;;  %v8401_v3 = vmul.f32 %v11303_v36, %v7891_v45 }
 0x2d0   : > { %11443 = vst [vmem:[#allocation44_spill] sm:$0xff] %v8369_v12  ;;  %v8373_v18 = vmul.f32 %v11303_v36, %v11444_v38  ;;  %v8385_v16 = vmul.f32 %v11303_v36, %v11445_v61  ;;  %v11447_v12 = vld [vmem:[#allocation64_spill] sm:$0xff]  ;;  %v8405_v61 = vmul.f32 %v11303_v36, %v7897_v14 }
 0x2d1   : > { %v8393_v38 = vmul.f32 %v11303_v36, %v11447_v12 }
 0x2d2   : > { %11446 = vst [vmem:[#allocation47_spill] sm:$0xff] %v8385_v16  ;;  %v11448_v16 = vld [vmem:[#allocation7_spill] sm:$0xff] }
 0x2d3   : > { %v8409_v59 = vadd.f32 %v11448_v16, %v7909_v29  ;;  %v8413_v12 = vadd.f32 %v11448_v16, %v7913_v32  ;;  %v8417_v60 = vadd.f32 %v11448_v16, %v7917_v51  ;;  %v8421_v45 = vadd.f32 %v11448_v16, %v7921_v35  ;;  %v11454_v35 = vld [vmem:[#allocation66_spill] sm:$0xff] }
 0x2d4   : > { %v8425_v14 = vadd.f32 %v11448_v16, %v7925_v13  ;;  %v8429_v36 = vadd.f32 %v11448_v16, %v7929_v6  ;;  %v8433_v29 = vadd.f32 %v11448_v16, %v7933_v44  ;;  %v8437_v32 = vadd.f32 %v11448_v16, %v7937_v1 }
 0x2d5   : > { %v8441_v51 = vadd.f32 %v11448_v16, %v7941_v63  ;;  %v8445_v13 = vadd.f32 %v11448_v16, %v11454_v35 }
 0x2d6   : > { %11449 = vst [vmem:[#allocation49_spill] sm:$0xff] %v8425_v14  ;;  %11450 = vst [vmem:[#allocation46_spill] sm:$0xff] %v8429_v36  ;;  %v11456_v14 = vld [vmem:[#allocation68_spill] sm:$0xff]  ;;  %v11458_v36 = vld [vmem:[#allocation71_spill] sm:$0xff] }
 0x2d7   : > { %11451 = vst [vmem:[#allocation48_spill] sm:$0xff] %v8433_v29  ;;  %11452 = vst [vmem:[#allocation51_spill] sm:$0xff] %v8437_v32  ;;  %v8449_v6 = vadd.f32 %v11448_v16, %v11456_v14  ;;  %v8453_v44 = vadd.f32 %v11448_v16, %v11458_v36  ;;  %v11460_v29 = vld [vmem:[#allocation75_spill] sm:$0xff]  ;;  %v11462_v32 = vld [vmem:[#allocation77_spill] sm:$0xff] }
 0x2d8   : > { %11453 = vst [vmem:[#allocation53_spill] sm:$0xff] %v8441_v51  ;;  %11455 = vst [vmem:[#allocation50_spill] sm:$0xff] %v8445_v13  ;;  %v8457_v1 = vadd.f32 %v11448_v16, %v11460_v29  ;;  %v8461_v63 = vadd.f32 %v11448_v16, %v11462_v32  ;;  %v11464_v51 = vld [vmem:[#allocation81_spill] sm:$0xff]  ;;  %v11466_v13 = vld [vmem:[#allocation78_spill] sm:$0xff] }
 0x2d9   : > { %11457 = vst [vmem:[#allocation52_spill] sm:$0xff] %v8449_v6  ;;  %11459 = vst [vmem:[#allocation55_spill] sm:$0xff] %v8453_v44  ;;  %v8465_v35 = vadd.f32 %v11448_v16, %v11464_v51  ;;  %v8469_v14 = vadd.f32 %v11448_v16, %v11466_v13  ;;  %v11468_v6 = vld [vmem:[#allocation83_spill] sm:$0xff]  ;;  %v11470_v44 = vld [vmem:[#allocation85_spill] sm:$0xff] }
 0x2da   : > { %11461 = vst [vmem:[#allocation57_spill] sm:$0xff] %v8457_v1  ;;  %11463 = vst [vmem:[#allocation54_spill] sm:$0xff] %v8461_v63  ;;  %v8473_v36 = vadd.f32 %v11448_v16, %v11468_v6  ;;  %v8477_v29 = vadd.f32 %v11448_v16, %v11470_v44  ;;  %v11472_v1 = vld [vmem:[#allocation87_spill] sm:$0xff]  ;;  %v11474_v63 = vld [vmem:[#allocation154_spill] sm:$0xff] }
 0x2db   : > { %11465 = vst [vmem:[#allocation56_spill] sm:$0xff] %v8465_v35  ;;  %11467 = vst [vmem:[#allocation59_spill] sm:$0xff] %v8469_v14  ;;  %v8481_v32 = vadd.f32 %v11448_v16, %v11472_v1  ;;  %v8485_v51 = vadd.f32 %v11448_v16, %v11474_v63  ;;  %v11476_v35 = vld [vmem:[#allocation162_spill] sm:$0xff]  ;;  %v11478_v14 = vld [vmem:[#allocation5_spill] sm:$0xff] }
 0x2dc   : > { %11469 = vst [vmem:[#allocation61_spill] sm:$0xff] %v8473_v36  ;;  %11471 = vst [vmem:[#allocation58_spill] sm:$0xff] %v8477_v29  ;;  %v8489_v13 = vadd.f32 %v11448_v16, %v11476_v35  ;;  %v8493_v6 = vadd.f32 %v11448_v16, %v11478_v14  ;;  %v11480_v36 = vld [vmem:[#allocation73_spill] sm:$0xff]  ;;  %v11482_v29 = vld [vmem:[#allocation70_spill] sm:$0xff] }
 0x2dd   : > { %11473 = vst [vmem:[#allocation60_spill] sm:$0xff] %v8481_v32  ;;  %11475 = vst [vmem:[#allocation63_spill] sm:$0xff] %v8485_v51  ;;  %v8497_v44 = vadd.f32 %v11448_v16, %v11480_v36  ;;  %v8501_v1 = vadd.f32 %v11448_v16, %v11482_v29  ;;  %v11484_v32 = vld [vmem:[#allocation72_spill] sm:$0xff]  ;;  %v11486_v51 = vld [vmem:[#allocation74_spill] sm:$0xff] }
 0x2de   : > { %11477 = vst [vmem:[#allocation65_spill] sm:$0xff] %v8489_v13  ;;  %11479 = vst [vmem:[#allocation62_spill] sm:$0xff] %v8493_v6  ;;  %v8505_v63 = vadd.f32 %v11448_v16, %v11484_v32  ;;  %v8509_v35 = vadd.f32 %v11448_v16, %v11486_v51  ;;  %v11488_v13 = vld [vmem:[#allocation76_spill] sm:$0xff] }
 0x2df   : > { %11481 = vst [vmem:[#allocation64_spill] sm:$0xff] %v8497_v44  ;;  %11483 = vst [vmem:[#allocation7_spill] sm:$0xff] %v8501_v1  ;;  %v8513_v14 = vadd.f32 %v11448_v16, %v11488_v13  ;;  %v11490_v6 = vld [vmem:[#allocation80_spill] sm:$0xff]  ;;  %v11492_v44 = vld [vmem:[#allocation82_spill] sm:$0xff] }
 0x2e0   : > { %11485 = vst [vmem:[#allocation66_spill] sm:$0xff] %v8505_v63  ;;  %11487 = vst [vmem:[#allocation68_spill] sm:$0xff] %v8509_v35  ;;  %v8517_v36 = vadd.f32 %v11448_v16, %v11490_v6  ;;  %v8521_v29 = vadd.f32 %v11448_v16, %v11492_v44  ;;  %v11494_v1 = vld [vmem:[#allocation84_spill] sm:$0xff]  ;;  %v11496_v63 = vld [vmem:[#allocation86_spill] sm:$0xff] }
 0x2e1   : > { %11489 = vst [vmem:[#allocation71_spill] sm:$0xff] %v8513_v14  ;;  %v8525_v32 = vadd.f32 %v11448_v16, %v11494_v1  ;;  %v8529_v51 = vadd.f32 %v11448_v16, %v11496_v63  ;;  %v11498_v35 = vld [vmem:[#allocation88_spill] sm:$0xff]  ;;  %v11500_v14 = vld [vmem:[#allocation91_spill] sm:$0xff] }
 0x2e2   : > { %11491 = vst [vmem:[#allocation75_spill] sm:$0xff] %v8517_v36  ;;  %11493 = vst [vmem:[#allocation77_spill] sm:$0xff] %v8521_v29  ;;  %v8533_v13 = vadd.f32 %v11448_v16, %v11498_v35  ;;  %v8537_v6 = vadd.f32 %v11448_v16, %v11500_v14  ;;  %v11502_v36 = vld [vmem:[#allocation93_spill] sm:$0xff]  ;;  %v11504_v29 = vld [vmem:[#allocation166_spill] sm:$0xff] }
 0x2e3   : > { %11495 = vst [vmem:[#allocation81_spill] sm:$0xff] %v8525_v32  ;;  %11497 = vst [vmem:[#allocation78_spill] sm:$0xff] %v8529_v51  ;;  %v8541_v44 = vadd.f32 %v11448_v16, %v11502_v36  ;;  %v8545_v1 = vadd.f32 %v11448_v16, %v11504_v29  ;;  %v11506_v32 = vld [vmem:[#allocation2_spill] sm:$0xff]  ;;  %v11508_v51 = vld [vmem:[#allocation4_spill] sm:$0xff] }
 0x2e4   : > { %11499 = vst [vmem:[#allocation83_spill] sm:$0xff] %v8533_v13  ;;  %11501 = vst [vmem:[#allocation85_spill] sm:$0xff] %v8537_v6  ;;  %v8549_v63 = vadd.f32 %v11448_v16, %v11506_v32  ;;  %v8553_v35 = vadd.f32 %v11448_v16, %v11508_v51  ;;  %v11510_v13 = vld [vmem:[#allocation3_spill] sm:$0xff]  ;;  %v11512_v6 = vld [vmem:[#allocation8_spill] sm:$0xff] }
 0x2e5   : > { %11503 = vst [vmem:[#allocation87_spill] sm:$0xff] %v8541_v44  ;;  %11505 = vst [vmem:[#allocation154_spill] sm:$0xff] %v8545_v1  ;;  %v8557_v14 = vadd.f32 %v11448_v16, %v11510_v13  ;;  %v8561_v36 = vadd.f32 %v11448_v16, %v11512_v6  ;;  %v11514_v44 = vld [vmem:[#allocation10_spill] sm:$0xff]  ;;  %v11516_v1 = vld [vmem:[#allocation9_spill] sm:$0xff] }
 0x2e6   : > { %11507 = vst [vmem:[#allocation162_spill] sm:$0xff] %v8549_v63  ;;  %11509 = vst [vmem:[#allocation5_spill] sm:$0xff] %v8553_v35  ;;  %v8565_v29 = vadd.f32 %v11448_v16, %v11514_v44  ;;  %v8569_v32 = vadd.f32 %v11448_v16, %v11516_v1  ;;  %v11518_v63 = vld [vmem:[#allocation13_spill] sm:$0xff]  ;;  %v11520_v35 = vld [vmem:[#allocation11_spill] sm:$0xff] }
 0x2e7   : > { %11511 = vst [vmem:[#allocation73_spill] sm:$0xff] %v8557_v14  ;;  %11513 = vst [vmem:[#allocation70_spill] sm:$0xff] %v8561_v36  ;;  %v8573_v51 = vadd.f32 %v11448_v16, %v11518_v63  ;;  %v8577_v13 = vadd.f32 %v11448_v16, %v11520_v35  ;;  %v11522_v14 = vld [vmem:[#allocation12_spill] sm:$0xff]  ;;  %v11524_v36 = vld [vmem:[#allocation15_spill] sm:$0xff] }
 0x2e8   : > { %11515 = vst [vmem:[#allocation72_spill] sm:$0xff] %v8565_v29  ;;  %11517 = vst [vmem:[#allocation74_spill] sm:$0xff] %v8569_v32  ;;  %v8581_v6 = vadd.f32 %v11448_v16, %v11522_v14  ;;  %v8585_v44 = vadd.f32 %v11448_v16, %v11524_v36  ;;  %v11526_v29 = vld [vmem:[#allocation17_spill] sm:$0xff]  ;;  %v11528_v32 = vld [vmem:[#allocation14_spill] sm:$0xff] }
 0x2e9   : > { %11519 = vst [vmem:[#allocation76_spill] sm:$0xff] %v8573_v51  ;;  %11521 = vst [vmem:[#allocation80_spill] sm:$0xff] %v8577_v13  ;;  %v8589_v1 = vadd.f32 %v11448_v16, %v11526_v29  ;;  %v8593_v63 = vadd.f32 %v11448_v16, %v11528_v32  ;;  %v11530_v51 = vld [vmem:[#allocation16_spill] sm:$0xff]  ;;  %v11532_v13 = vld [vmem:[#allocation19_spill] sm:$0xff] }
 0x2ea   : > { %11523 = vst [vmem:[#allocation82_spill] sm:$0xff] %v8581_v6  ;;  %11525 = vst [vmem:[#allocation84_spill] sm:$0xff] %v8585_v44  ;;  %v8597_v35 = vadd.f32 %v11448_v16, %v11530_v51  ;;  %v8601_v14 = vadd.f32 %v11448_v16, %v11532_v13  ;;  %v11534_v6 = vld [vmem:[#allocation21_spill] sm:$0xff]  ;;  %v11536_v44 = vld [vmem:[#allocation18_spill] sm:$0xff] }
 0x2eb   : > { %11527 = vst [vmem:[#allocation86_spill] sm:$0xff] %v8589_v1  ;;  %11529 = vst [vmem:[#allocation88_spill] sm:$0xff] %v8593_v63  ;;  %v8605_v36 = vadd.f32 %v11448_v16, %v11534_v6  ;;  %v8609_v29 = vadd.f32 %v11448_v16, %v11536_v44  ;;  %v11538_v1 = vld [vmem:[#allocation20_spill] sm:$0xff]  ;;  %v11540_v63 = vld [vmem:[#allocation23_spill] sm:$0xff] }
 0x2ec   : > { %11531 = vst [vmem:[#allocation91_spill] sm:$0xff] %v8597_v35  ;;  %11533 = vst [vmem:[#allocation93_spill] sm:$0xff] %v8601_v14  ;;  %v8613_v32 = vadd.f32 %v11448_v16, %v11538_v1  ;;  %v8617_v51 = vadd.f32 %v11448_v16, %v11540_v63  ;;  %v11542_v35 = vld [vmem:[#allocation25_spill] sm:$0xff]  ;;  %v11544_v14 = vld [vmem:[#allocation22_spill] sm:$0xff] }
 0x2ed   : > { %11535 = vst [vmem:[#allocation166_spill] sm:$0xff] %v8605_v36  ;;  %11537 = vst [vmem:[#allocation2_spill] sm:$0xff] %v8609_v29  ;;  %v8621_v13 = vadd.f32 %v11448_v16, %v11542_v35  ;;  %v8625_v6 = vadd.f32 %v11448_v16, %v11544_v14  ;;  %v11546_v36 = vld [vmem:[#allocation24_spill] sm:$0xff]  ;;  %v11548_v29 = vld [vmem:[#allocation27_spill] sm:$0xff] }
 0x2ee   : > { %11539 = vst [vmem:[#allocation4_spill] sm:$0xff] %v8613_v32  ;;  %11541 = vst [vmem:[#allocation3_spill] sm:$0xff] %v8617_v51  ;;  %v8629_v44 = vadd.f32 %v11448_v16, %v11546_v36  ;;  %v8633_v1 = vadd.f32 %v11448_v16, %v11548_v29  ;;  %v11550_v32 = vld [vmem:[#allocation29_spill] sm:$0xff]  ;;  %v11552_v51 = vld [vmem:[#allocation26_spill] sm:$0xff] }
 0x2ef   : > { %11543 = vst [vmem:[#allocation8_spill] sm:$0xff] %v8621_v13  ;;  %11545 = vst [vmem:[#allocation10_spill] sm:$0xff] %v8625_v6  ;;  %v8637_v63 = vadd.f32 %v11448_v16, %v11550_v32  ;;  %v8641_v35 = vadd.f32 %v11448_v16, %v11552_v51  ;;  %v11554_v13 = vld [vmem:[#allocation28_spill] sm:$0xff]  ;;  %v11555_v6 = vld [vmem:[#allocation31_spill] sm:$0xff] }
 0x2f0   : > { %11547 = vst [vmem:[#allocation9_spill] sm:$0xff] %v8629_v44  ;;  %11549 = vst [vmem:[#allocation13_spill] sm:$0xff] %v8633_v1  ;;  %v8645_v14 = vadd.f32 %v11448_v16, %v11554_v13  ;;  %v8649_v36 = vadd.f32 %v11448_v16, %v11555_v6  ;;  %v11556_v44 = vld [vmem:[#allocation33_spill] sm:$0xff]  ;;  %v11557_v1 = vld [vmem:[#allocation30_spill] sm:$0xff]  ;;  %v8669_v6 = vadd.f32 %v11448_v16, %v8169_v22 }
 0x2f1   : > { %11551 = vst [vmem:[#allocation11_spill] sm:$0xff] %v8637_v63  ;;  %11553 = vst [vmem:[#allocation12_spill] sm:$0xff] %v8641_v35  ;;  %v8653_v29 = vadd.f32 %v11448_v16, %v11556_v44  ;;  %v8657_v32 = vadd.f32 %v11448_v16, %v11557_v1  ;;  %v11559_v63 = vld [vmem:[#allocation32_spill] sm:$0xff]  ;;  %v11561_v35 = vld [vmem:[#allocation35_spill] sm:$0xff]  ;;  %v8673_v44 = vadd.f32 %v11448_v16, %v8173_v34 }
 0x2f2   : > { %v8661_v51 = vadd.f32 %v11448_v16, %v11559_v63  ;;  %v8665_v13 = vadd.f32 %v11448_v16, %v11561_v35  ;;  %v8677_v1 = vadd.f32 %v11448_v16, %v8177_v28  ;;  %v8689_v22 = vadd.f32 %v11448_v16, %v8189_v56 }
 0x2f3   : > { %11558 = vst [vmem:[#allocation15_spill] sm:$0xff] %v8657_v32  ;;  %v11563_v32 = vld [vmem:[#allocation37_spill] sm:$0xff]  ;;  %v8693_v34 = vadd.f32 %v11448_v16, %v8193_v57  ;;  %v8697_v28 = vadd.f32 %v11448_v16, %v8197_v11  ;;  %v8709_v56 = vadd.f32 %v11448_v16, %v8209_v15 }
 0x2f4   : > { %11560 = vst [vmem:[#allocation17_spill] sm:$0xff] %v8661_v51  ;;  %11562 = vst [vmem:[#allocation14_spill] sm:$0xff] %v8677_v1  ;;  %v8681_v63 = vadd.f32 %v11448_v16, %v11563_v32  ;;  %v11565_v51 = vld [vmem:[#allocation34_spill] sm:$0xff]  ;;  %v11568_v1 = vld [vmem:[#allocation36_spill] sm:$0xff] }
 0x2f5   : > { %v8685_v35 = vadd.f32 %v11448_v16, %v11565_v51  ;;  %11566 = vst [vmem:[#allocation19_spill] sm:$0xff] %v8689_v22  ;;  %11567 = vst [vmem:[#allocation21_spill] sm:$0xff] %v8693_v34  ;;  %v8701_v32 = vadd.f32 %v11448_v16, %v11568_v1  ;;  %v11571_v22 = vld [vmem:[#allocation41_spill] sm:$0xff]  ;;  %v11572_v34 = vld [vmem:[#allocation38_spill] sm:$0xff]  ;;  %v8721_v1 = vadd.f32 %v11448_v16, %v8221_v19 }
 0x2f6   : > { %11564 = vst [vmem:[#allocation16_spill] sm:$0xff] %v8681_v63  ;;  %v11569_v63 = vld [vmem:[#allocation39_spill] sm:$0xff]  ;;  %v8713_v57 = vadd.f32 %v11448_v16, %v11571_v22  ;;  %v8717_v11 = vadd.f32 %v11448_v16, %v11572_v34  ;;  %v8733_v22 = vadd.f32 %v11448_v16, %v8233_v31  ;;  %v8737_v34 = vadd.f32 %v11448_v16, %v8237_v46 }
 0x2f7   : > { %v8705_v51 = vadd.f32 %v11448_v16, %v11569_v63  ;;  %v8725_v63 = vadd.f32 %v11448_v16, %v8225_v8  ;;  %v8741_v19 = vadd.f32 %v11448_v16, %v8241_v41  ;;  %v8745_v8 = vadd.f32 %v11448_v16, %v8245_v62 }
 0x2f8   : > { %v8753_v31 = vadd.f32 %v11448_v16, %v8253_v10  ;;  %v8757_v46 = vadd.f32 %v11448_v16, %v8257_v26  ;;  %v8761_v41 = vadd.f32 %v11448_v16, %v8261_v43  ;;  %v8765_v62 = vadd.f32 %v11448_v16, %v8265_v48 }
 0x2f9   : > { %11570 = vst [vmem:[#allocation18_spill] sm:$0xff] %v8705_v51  ;;  %v11573_v51 = vld [vmem:[#allocation40_spill] sm:$0xff]  ;;  %v8773_v10 = vadd.f32 %v11448_v16, %v8273_v27  ;;  %v8777_v26 = vadd.f32 %v11448_v16, %v8277_v40  ;;  %v8781_v43 = vadd.f32 %v11448_v16, %v8281_v20  ;;  %v8785_v48 = vadd.f32 %v11448_v16, %v8285_v25 }
 0x2fa   : > { %v8729_v15 = vadd.f32 %v11448_v16, %v11573_v51  ;;  %v8749_v51 = vadd.f32 %v11448_v16, %v8249_v9  ;;  %v8769_v9 = vadd.f32 %v11448_v16, %v8269_v4  ;;  %v8789_v4 = vadd.f32 %v11448_v16, %v8289_v54 }
 0x2fb   : > { %11574 = vst [vmem:[#allocation20_spill] sm:$0xff] %v8781_v43  ;;  %v8793_v27 = vadd.f32 %v11448_v16, %v8293_v24  ;;  %v8797_v40 = vadd.f32 %v11448_v16, %v8297_v0  ;;  %v8801_v20 = vadd.f32 %v11448_v16, %v8301_v52  ;;  %v11575_v43 = vld [vmem:[#allocation43_spill] sm:$0xff]  ;;  %v8809_v54 = vadd.f32 %v11448_v16, %v8309_v2 }
 0x2fc   : > { %v8805_v25 = vadd.f32 %v11448_v16, %v11575_v43  ;;  %v8813_v24 = vadd.f32 %v11448_v16, %v8313_v17  ;;  %v8817_v0 = vadd.f32 %v11448_v16, %v8317_v53  ;;  %v8821_v52 = vadd.f32 %v11448_v16, %v8321_v42 }
 0x2fd   : > { %v8825_v43 = vadd.f32 %v11448_v16, %v8325_v30  ;;  %v8829_v2 = vadd.f32 %v11448_v16, %v8329_v39  ;;  %v8833_v17 = vadd.f32 %v11448_v16, %v8333_v37  ;;  %v8837_v53 = vadd.f32 %v11448_v16, %v8337_v21 }
 0x2fe   : > { %v8841_v42 = vadd.f32 %v11448_v16, %v8341_v47  ;;  %v8845_v30 = vadd.f32 %v11448_v16, %v8345_v7  ;;  %v8853_v37 = vadd.f32 %v11448_v16, %v8353_v5  ;;  %v8857_v21 = vadd.f32 %v11448_v16, %v8357_v23 }
 0x2ff   : > { %11576 = vst [vmem:[#allocation23_spill] sm:$0xff] %v8825_v43  ;;  %11577 = vst [vmem:[#allocation25_spill] sm:$0xff] %v8837_v53  ;;  %v11579_v43 = vld [vmem:[#allocation45_spill] sm:$0xff]  ;;  %v11580_v53 = vld [vmem:[#allocation42_spill] sm:$0xff]  ;;  %v8865_v7 = vadd.f32 %v11448_v16, %v8365_v33  ;;  %v8873_v5 = vadd.f32 %v11448_v16, %v8373_v18  ;;  %v8877_v23 = vadd.f32 %v11448_v16, %v8377_v50 }
 0x300   : > { %11578 = vst [vmem:[#allocation22_spill] sm:$0xff] %v8845_v30  ;;  %v8849_v39 = vadd.f32 %v11448_v16, %v11579_v43  ;;  %v8861_v47 = vadd.f32 %v11448_v16, %v11580_v53  ;;  %v11582_v30 = vld [vmem:[#allocation44_spill] sm:$0xff]  ;;  %v8881_v53 = vadd.f32 %v11448_v16, %v8381_v49  ;;  %v8893_v18 = vadd.f32 %v11448_v16, %v8393_v38 }
 0x301   : > { %v8869_v43 = vadd.f32 %v11448_v16, %v11582_v30  ;;  %v8889_v30 = vadd.f32 %v11448_v16, %v8389_v55  ;;  %v8897_v50 = vadd.f32 %v11448_v16, %v8397_v58  ;;  %v8901_v49 = vadd.f32 %v11448_v16, %v8401_v3 }
 0x302   : > { %11581 = vst [vmem:[#allocation24_spill] sm:$0xff] %v8861_v47  ;;  %11583 = vst [vmem:[#allocation27_spill] sm:$0xff] %v8881_v53  ;;  %v11584_v47 = vld [vmem:[#allocation47_spill] sm:$0xff] }
 0x303   : > { %v8885_v33 = vadd.f32 %v11448_v16, %v11584_v47  ;;  %11586 = vst [vmem:[#allocation26_spill] sm:$0xff] %v8889_v30  ;;  %11587 = vst [vmem:[#allocation28_spill] sm:$0xff] %v8893_v18  ;;  %v8905_v47 = vadd.f32 %v11448_v16, %v8405_v61  ;;  %v11593_v30 = vld [vmem:[#allocation97_spill] sm:$0xff]  ;;  %v11595_v18 = vld [vmem:[#allocation100_spill] sm:$0xff] }
 0x304   : > { %11588 = vst [vmem:[#allocation31_spill] sm:$0xff] %v8897_v50  ;;  %11589 = vst [vmem:[#allocation33_spill] sm:$0xff] %v8901_v49  ;;  %v8913_v38 = vadd.f32 %v11593_v30, %v8413_v12  ;;  %v8917_v58 = vadd.f32 %v11595_v18, %v8417_v60  ;;  %v11597_v50 = vld [vmem:[#allocation102_spill] sm:$0xff]  ;;  %v11599_v49 = vld [vmem:[#allocation49_spill] sm:$0xff] }
 0x305   : > { %11585 = vst [vmem:[#allocation29_spill] sm:$0xff] %v8885_v33  ;;  %11590 = vst [vmem:[#allocation30_spill] sm:$0xff] %v8905_v47  ;;  %v11591_v33 = vld [vmem:[#allocation95_spill] sm:$0xff]  ;;  %v8921_v3 = vadd.f32 %v11597_v50, %v8421_v45  ;;  %v11602_v61 = vld [vmem:[#allocation46_spill] sm:$0xff] }
 0x306   : > { %v8909_v55 = vadd.f32 %v11591_v33, %v8409_v59  ;;  %11594 = vst [vmem:[#allocation35_spill] sm:$0xff] %v8913_v38  ;;  %11596 = vst [vmem:[#allocation37_spill] sm:$0xff] %v8917_v58  ;;  %v11600_v53 = vld [vmem:[#allocation99_spill] sm:$0xff]  ;;  %v11603_v47 = vld [vmem:[#allocation101_spill] sm:$0xff] }
 0x307   : > { %11598 = vst [vmem:[#allocation34_spill] sm:$0xff] %v8921_v3  ;;  %v8925_v16 = vadd.f32 %v11600_v53, %v11599_v49  ;;  %v8929_v59 = vadd.f32 %v11603_v47, %v11602_v61  ;;  %v11605_v33 = vld [vmem:[#allocation48_spill] sm:$0xff]  ;;  %v11608_v30 = vld [vmem:[#allocation51_spill] sm:$0xff]  ;;  %v11609_v38 = vld [vmem:[#allocation106_spill] sm:$0xff] }
 0x308   : > { %11592 = vst [vmem:[#allocation32_spill] sm:$0xff] %v8909_v55  ;;  %v11606_v55 = vld [vmem:[#allocation104_spill] sm:$0xff]  ;;  %v8937_v60 = vadd.f32 %v11609_v38, %v11608_v30  ;;  %v11611_v18 = vld [vmem:[#allocation53_spill] sm:$0xff]  ;;  %v11612_v58 = vld [vmem:[#allocation103_spill] sm:$0xff] }
 0x309   : > { %11601 = vst [vmem:[#allocation36_spill] sm:$0xff] %v8925_v16  ;;  %11604 = vst [vmem:[#allocation39_spill] sm:$0xff] %v8929_v59  ;;  %v8933_v12 = vadd.f32 %v11606_v55, %v11605_v33  ;;  %v8941_v45 = vadd.f32 %v11612_v58, %v11611_v18  ;;  %v11614_v50 = vld [vmem:[#allocation50_spill] sm:$0xff]  ;;  %v11615_v3 = vld [vmem:[#allocation105_spill] sm:$0xff] }
 0x30a   : > { %11610 = vst [vmem:[#allocation38_spill] sm:$0xff] %v8937_v60  ;;  %v8945_v53 = vadd.f32 %v11615_v3, %v11614_v50  ;;  %v11617_v49 = vld [vmem:[#allocation52_spill] sm:$0xff]  ;;  %v11620_v61 = vld [vmem:[#allocation55_spill] sm:$0xff]  ;;  %v11621_v59 = vld [vmem:[#allocation110_spill] sm:$0xff] }
 0x30b   : > { %11607 = vst [vmem:[#allocation41_spill] sm:$0xff] %v8933_v12  ;;  %11613 = vst [vmem:[#allocation40_spill] sm:$0xff] %v8941_v45  ;;  %v11618_v16 = vld [vmem:[#allocation108_spill] sm:$0xff]  ;;  %v8953_v55 = vadd.f32 %v11621_v59, %v11620_v61  ;;  %v11623_v33 = vld [vmem:[#allocation57_spill] sm:$0xff] }
 0x30c   : > { %11616 = vst [vmem:[#allocation43_spill] sm:$0xff] %v8945_v53  ;;  %v8949_v47 = vadd.f32 %v11618_v16, %v11617_v49  ;;  %v11624_v12 = vld [vmem:[#allocation107_spill] sm:$0xff]  ;;  %v11626_v30 = vld [vmem:[#allocation54_spill] sm:$0xff]  ;;  %v11627_v60 = vld [vmem:[#allocation109_spill] sm:$0xff] }
 0x30d   : > { %11622 = vst [vmem:[#allocation42_spill] sm:$0xff] %v8953_v55  ;;  %v8957_v38 = vadd.f32 %v11624_v12, %v11623_v33  ;;  %v8961_v58 = vadd.f32 %v11627_v60, %v11626_v30  ;;  %v11629_v18 = vld [vmem:[#allocation56_spill] sm:$0xff]  ;;  %v11632_v50 = vld [vmem:[#allocation59_spill] sm:$0xff]  ;;  %v11633_v53 = vld [vmem:[#allocation114_spill] sm:$0xff] }
 0x30e   : > { %11619 = vst [vmem:[#allocation45_spill] sm:$0xff] %v8949_v47  ;;  %v11630_v45 = vld [vmem:[#allocation112_spill] sm:$0xff]  ;;  %v8969_v16 = vadd.f32 %v11633_v53, %v11632_v50  ;;  %v11635_v49 = vld [vmem:[#allocation61_spill] sm:$0xff]  ;;  %v11636_v47 = vld [vmem:[#allocation111_spill] sm:$0xff] }
 0x30f   : > { %11625 = vst [vmem:[#allocation44_spill] sm:$0xff] %v8957_v38  ;;  %11628 = vst [vmem:[#allocation47_spill] sm:$0xff] %v8961_v58  ;;  %v8965_v3 = vadd.f32 %v11630_v45, %v11629_v18  ;;  %v8973_v59 = vadd.f32 %v11636_v47, %v11635_v49  ;;  %v11638_v61 = vld [vmem:[#allocation58_spill] sm:$0xff]  ;;  %v11639_v55 = vld [vmem:[#allocation113_spill] sm:$0xff] }
 0x310   : > { %11634 = vst [vmem:[#allocation97_spill] sm:$0xff] %v8969_v16  ;;  %v8977_v12 = vadd.f32 %v11639_v55, %v11638_v61  ;;  %v11641_v33 = vld [vmem:[#allocation60_spill] sm:$0xff]  ;;  %v11644_v30 = vld [vmem:[#allocation63_spill] sm:$0xff]  ;;  %v11645_v58 = vld [vmem:[#allocation118_spill] sm:$0xff] }
 0x311   : > { %11631 = vst [vmem:[#allocation95_spill] sm:$0xff] %v8965_v3  ;;  %11637 = vst [vmem:[#allocation100_spill] sm:$0xff] %v8973_v59  ;;  %v11642_v38 = vld [vmem:[#allocation116_spill] sm:$0xff]  ;;  %v8985_v45 = vadd.f32 %v11645_v58, %v11644_v30  ;;  %v11647_v18 = vld [vmem:[#allocation65_spill] sm:$0xff] }
 0x312   : > { %11640 = vst [vmem:[#allocation102_spill] sm:$0xff] %v8977_v12  ;;  %v8981_v60 = vadd.f32 %v11642_v38, %v11641_v33  ;;  %v11648_v3 = vld [vmem:[#allocation115_spill] sm:$0xff]  ;;  %v11650_v50 = vld [vmem:[#allocation62_spill] sm:$0xff]  ;;  %v11651_v16 = vld [vmem:[#allocation117_spill] sm:$0xff] }
 0x313   : > { %11646 = vst [vmem:[#allocation99_spill] sm:$0xff] %v8985_v45  ;;  %v8989_v53 = vadd.f32 %v11648_v3, %v11647_v18  ;;  %v8993_v47 = vadd.f32 %v11651_v16, %v11650_v50  ;;  %v11653_v49 = vld [vmem:[#allocation64_spill] sm:$0xff]  ;;  %v11656_v61 = vld [vmem:[#allocation7_spill] sm:$0xff]  ;;  %v11657_v12 = vld [vmem:[#allocation122_spill] sm:$0xff] }
 0x314   : > { %11643 = vst [vmem:[#allocation49_spill] sm:$0xff] %v8981_v60  ;;  %v11654_v59 = vld [vmem:[#allocation120_spill] sm:$0xff]  ;;  %v9001_v38 = vadd.f32 %v11657_v12, %v11656_v61  ;;  %v11659_v33 = vld [vmem:[#allocation66_spill] sm:$0xff]  ;;  %v11660_v60 = vld [vmem:[#allocation119_spill] sm:$0xff] }
 0x315   : > { %11649 = vst [vmem:[#allocation46_spill] sm:$0xff] %v8989_v53  ;;  %11652 = vst [vmem:[#allocation101_spill] sm:$0xff] %v8993_v47  ;;  %v8997_v55 = vadd.f32 %v11654_v59, %v11653_v49  ;;  %v9005_v58 = vadd.f32 %v11660_v60, %v11659_v33  ;;  %v11662_v30 = vld [vmem:[#allocation68_spill] sm:$0xff]  ;;  %v11663_v45 = vld [vmem:[#allocation121_spill] sm:$0xff] }
 0x316   : > { %11658 = vst [vmem:[#allocation104_spill] sm:$0xff] %v9001_v38  ;;  %v9009_v3 = vadd.f32 %v11663_v45, %v11662_v30  ;;  %v11665_v18 = vld [vmem:[#allocation71_spill] sm:$0xff]  ;;  %v11666_v53 = vld [vmem:[#allocation124_spill] sm:$0xff]  ;;  %v11669_v47 = vld [vmem:[#allocation126_spill] sm:$0xff] }
 0x317   : > { %11655 = vst [vmem:[#allocation48_spill] sm:$0xff] %v8997_v55  ;;  %11661 = vst [vmem:[#allocation51_spill] sm:$0xff] %v9005_v58  ;;  %v9013_v16 = vadd.f32 %v11666_v53, %v11665_v18  ;;  %v11668_v50 = vld [vmem:[#allocation75_spill] sm:$0xff]  ;;  %v11671_v49 = vld [vmem:[#allocation77_spill] sm:$0xff] }
 0x318   : > { %11664 = vst [vmem:[#allocation106_spill] sm:$0xff] %v9009_v3  ;;  %v9017_v59 = vadd.f32 %v11669_v47, %v11668_v50  ;;  %v11672_v55 = vld [vmem:[#allocation123_spill] sm:$0xff]  ;;  %v11674_v61 = vld [vmem:[#allocation81_spill] sm:$0xff]  ;;  %v11677_v33 = vld [vmem:[#allocation78_spill] sm:$0xff] }
 0x319   : > { %11667 = vst [vmem:[#allocation53_spill] sm:$0xff] %v9013_v16  ;;  %v9021_v12 = vadd.f32 %v11672_v55, %v11671_v49  ;;  %v11675_v38 = vld [vmem:[#allocation125_spill] sm:$0xff]  ;;  %v11678_v58 = vld [vmem:[#allocation128_spill] sm:$0xff]  ;;  %v11680_v30 = vld [vmem:[#allocation83_spill] sm:$0xff] }
 0x31a   : > { %11670 = vst [vmem:[#allocation103_spill] sm:$0xff] %v9017_v59  ;;  %v9025_v60 = vadd.f32 %v11675_v38, %v11674_v61  ;;  %v9029_v45 = vadd.f32 %v11678_v58, %v11677_v33  ;;  %v11681_v3 = vld [vmem:[#allocation130_spill] sm:$0xff]  ;;  %v11683_v18 = vld [vmem:[#allocation85_spill] sm:$0xff]  ;;  %v11684_v16 = vld [vmem:[#allocation127_spill] sm:$0xff] }
 0x31b   : > { %11673 = vst [vmem:[#allocation50_spill] sm:$0xff] %v9021_v12  ;;  %v9033_v53 = vadd.f32 %v11681_v3, %v11680_v30  ;;  %v9037_v47 = vadd.f32 %v11684_v16, %v11683_v18  ;;  %v11686_v50 = vld [vmem:[#allocation87_spill] sm:$0xff]  ;;  %v11687_v59 = vld [vmem:[#allocation129_spill] sm:$0xff]  ;;  %v11689_v49 = vld [vmem:[#allocation154_spill] sm:$0xff] }
 0x31c   : > { %11676 = vst [vmem:[#allocation105_spill] sm:$0xff] %v9025_v60  ;;  %11679 = vst [vmem:[#allocation52_spill] sm:$0xff] %v9029_v45  ;;  %v9041_v55 = vadd.f32 %v11687_v59, %v11686_v50  ;;  %v11690_v12 = vld [vmem:[#allocation132_spill] sm:$0xff]  ;;  %v11692_v61 = vld [vmem:[#allocation162_spill] sm:$0xff] }
 0x31d   : > { %11682 = vst [vmem:[#allocation108_spill] sm:$0xff] %v9033_v53  ;;  %11685 = vst [vmem:[#allocation55_spill] sm:$0xff] %v9037_v47  ;;  %v9045_v38 = vadd.f32 %v11690_v12, %v11689_v49  ;;  %v11693_v60 = vld [vmem:[#allocation134_spill] sm:$0xff]  ;;  %v11695_v33 = vld [vmem:[#allocation5_spill] sm:$0xff] }
 0x31e   : > { %11688 = vst [vmem:[#allocation110_spill] sm:$0xff] %v9041_v55  ;;  %v9049_v58 = vadd.f32 %v11693_v60, %v11692_v61  ;;  %v11696_v45 = vld [vmem:[#allocation131_spill] sm:$0xff]  ;;  %v11698_v30 = vld [vmem:[#allocation73_spill] sm:$0xff]  ;;  %v11701_v18 = vld [vmem:[#allocation70_spill] sm:$0xff] }
 0x31f   : > { %11691 = vst [vmem:[#allocation57_spill] sm:$0xff] %v9045_v38  ;;  %v9053_v3 = vadd.f32 %v11696_v45, %v11695_v33  ;;  %v11699_v53 = vld [vmem:[#allocation133_spill] sm:$0xff]  ;;  %v11702_v47 = vld [vmem:[#allocation136_spill] sm:$0xff]  ;;  %v11705_v55 = vld [vmem:[#allocation138_spill] sm:$0xff] }
 0x320   : > { %11694 = vst [vmem:[#allocation107_spill] sm:$0xff] %v9049_v58  ;;  %v9057_v16 = vadd.f32 %v11699_v53, %v11698_v30  ;;  %v9061_v59 = vadd.f32 %v11702_v47, %v11701_v18  ;;  %v11704_v50 = vld [vmem:[#allocation72_spill] sm:$0xff]  ;;  %v11707_v49 = vld [vmem:[#allocation74_spill] sm:$0xff]  ;;  %v11708_v38 = vld [vmem:[#allocation135_spill] sm:$0xff] }
 0x321   : > { %11697 = vst [vmem:[#allocation54_spill] sm:$0xff] %v9053_v3  ;;  %v9065_v12 = vadd.f32 %v11705_v55, %v11704_v50  ;;  %v9069_v60 = vadd.f32 %v11708_v38, %v11707_v49  ;;  %v11710_v61 = vld [vmem:[#allocation76_spill] sm:$0xff]  ;;  %v11711_v58 = vld [vmem:[#allocation137_spill] sm:$0xff]  ;;  %v11716_v30 = vld [vmem:[#allocation82_spill] sm:$0xff] }
 0x322   : > { %11700 = vst [vmem:[#allocation109_spill] sm:$0xff] %v9057_v16  ;;  %11703 = vst [vmem:[#allocation56_spill] sm:$0xff] %v9061_v59  ;;  %v9073_v45 = vadd.f32 %v11711_v58, %v11710_v61  ;;  %v11713_v33 = vld [vmem:[#allocation80_spill] sm:$0xff]  ;;  %v11717_v16 = vld [vmem:[#allocation142_spill] sm:$0xff] }
 0x323   : > { %11706 = vst [vmem:[#allocation112_spill] sm:$0xff] %v9065_v12  ;;  %11709 = vst [vmem:[#allocation59_spill] sm:$0xff] %v9069_v60  ;;  %v11714_v3 = vld [vmem:[#allocation140_spill] sm:$0xff]  ;;  %v9081_v47 = vadd.f32 %v11717_v16, %v11716_v30  ;;  %v11720_v59 = vld [vmem:[#allocation139_spill] sm:$0xff] }
 0x324   : > { %11712 = vst [vmem:[#allocation114_spill] sm:$0xff] %v9073_v45  ;;  %v9077_v53 = vadd.f32 %v11714_v3, %v11713_v33  ;;  %v11719_v18 = vld [vmem:[#allocation84_spill] sm:$0xff]  ;;  %v11722_v50 = vld [vmem:[#allocation86_spill] sm:$0xff]  ;;  %v11723_v12 = vld [vmem:[#allocation141_spill] sm:$0xff] }
 0x325   : > { %11718 = vst [vmem:[#allocation111_spill] sm:$0xff] %v9081_v47  ;;  %v9085_v55 = vadd.f32 %v11720_v59, %v11719_v18  ;;  %v9089_v38 = vadd.f32 %v11723_v12, %v11722_v50  ;;  %v11725_v49 = vld [vmem:[#allocation88_spill] sm:$0xff]  ;;  %v11728_v61 = vld [vmem:[#allocation91_spill] sm:$0xff]  ;;  %v11729_v45 = vld [vmem:[#allocation146_spill] sm:$0xff] }
 0x326   : > { %11715 = vst [vmem:[#allocation61_spill] sm:$0xff] %v9077_v53  ;;  %v11726_v60 = vld [vmem:[#allocation144_spill] sm:$0xff]  ;;  %v9097_v3 = vadd.f32 %v11729_v45, %v11728_v61  ;;  %v11731_v33 = vld [vmem:[#allocation93_spill] sm:$0xff]  ;;  %v11732_v53 = vld [vmem:[#allocation143_spill] sm:$0xff] }
 0x327   : > { %11721 = vst [vmem:[#allocation58_spill] sm:$0xff] %v9085_v55  ;;  %11724 = vst [vmem:[#allocation113_spill] sm:$0xff] %v9089_v38  ;;  %v9093_v58 = vadd.f32 %v11726_v60, %v11725_v49  ;;  %v9101_v16 = vadd.f32 %v11732_v53, %v11731_v33  ;;  %v11734_v30 = vld [vmem:[#allocation166_spill] sm:$0xff]  ;;  %v11735_v47 = vld [vmem:[#allocation145_spill] sm:$0xff] }
 0x328   : > { %11730 = vst [vmem:[#allocation116_spill] sm:$0xff] %v9097_v3  ;;  %v9105_v59 = vadd.f32 %v11735_v47, %v11734_v30  ;;  %v11737_v18 = vld [vmem:[#allocation2_spill] sm:$0xff]  ;;  %v11738_v55 = vld [vmem:[#allocation148_spill] sm:$0xff]  ;;  %v11743_v49 = vld [vmem:[#allocation3_spill] sm:$0xff] }
 0x329   : > { %11727 = vst [vmem:[#allocation60_spill] sm:$0xff] %v9093_v58  ;;  %11733 = vst [vmem:[#allocation63_spill] sm:$0xff] %v9101_v16  ;;  %v9109_v12 = vadd.f32 %v11738_v55, %v11737_v18  ;;  %v11740_v50 = vld [vmem:[#allocation4_spill] sm:$0xff]  ;;  %v11741_v38 = vld [vmem:[#allocation150_spill] sm:$0xff] }
 0x32a   : > { %11736 = vst [vmem:[#allocation118_spill] sm:$0xff] %v9105_v59  ;;  %v9113_v60 = vadd.f32 %v11741_v38, %v11740_v50  ;;  %v11744_v58 = vld [vmem:[#allocation147_spill] sm:$0xff]  ;;  %v11746_v61 = vld [vmem:[#allocation8_spill] sm:$0xff]  ;;  %v11747_v3 = vld [vmem:[#allocation149_spill] sm:$0xff] }
 0x32b   : > { %11739 = vst [vmem:[#allocation65_spill] sm:$0xff] %v9109_v12  ;;  %v9117_v45 = vadd.f32 %v11744_v58, %v11743_v49  ;;  %v9121_v53 = vadd.f32 %v11747_v3, %v11746_v61  ;;  %v11748_v33 = vld [vmem:[#allocation10_spill] sm:$0xff]  ;;  %v11749_v16 = vld [vmem:[#allocation152_spill] sm:$0xff]  ;;  %v11750_v30 = vld [vmem:[#allocation9_spill] sm:$0xff] }
 0x32c   : > { %11742 = vst [vmem:[#allocation115_spill] sm:$0xff] %v9113_v60  ;;  %v9125_v47 = vadd.f32 %v11749_v16, %v11748_v33  ;;  %v11751_v59 = vld [vmem:[#allocation155_spill] sm:$0xff]  ;;  %v11752_v18 = vld [vmem:[#allocation13_spill] sm:$0xff]  ;;  %v11758_v49 = vld [vmem:[#allocation12_spill] sm:$0xff] }
 0x32d   : > { %11745 = vst [vmem:[#allocation62_spill] sm:$0xff] %v9117_v45  ;;  %v9129_v55 = vadd.f32 %v11751_v59, %v11750_v30  ;;  %v11753_v12 = vld [vmem:[#allocation151_spill] sm:$0xff]  ;;  %v11756_v60 = vld [vmem:[#allocation153_spill] sm:$0xff]  ;;  %v11761_v33 = vld [vmem:[#allocation156_spill] sm:$0xff] }
 0x32e   : > { %v9133_v38 = vadd.f32 %v11753_v12, %v11752_v18  ;;  %v11755_v50 = vld [vmem:[#allocation11_spill] sm:$0xff]  ;;  %v11759_v45 = vld [vmem:[#allocation157_spill] sm:$0xff]  ;;  %v9149_v59 = vadd.f32 %v11761_v33, %v8649_v36  ;;  %v11762_v30 = vld [vmem:[#allocation158_spill] sm:$0xff] }
 0x32f   : > { %v9137_v58 = vadd.f32 %v11756_v60, %v11755_v50  ;;  %v9141_v3 = vadd.f32 %v11759_v45, %v11758_v49  ;;  %v11760_v61 = vld [vmem:[#allocation159_spill] sm:$0xff]  ;;  %v9153_v12 = vadd.f32 %v11762_v30, %v8653_v29  ;;  %v11767_v50 = vld [vmem:[#allocation17_spill] sm:$0xff]  ;;  %v11769_v49 = vld [vmem:[#allocation160_spill] sm:$0xff] }
 0x330   : > { %11754 = vst [vmem:[#allocation117_spill] sm:$0xff] %v9133_v38  ;;  %v9145_v16 = vadd.f32 %v11760_v61, %v8645_v14  ;;  %v11764_v18 = vld [vmem:[#allocation15_spill] sm:$0xff]  ;;  %v11765_v38 = vld [vmem:[#allocation161_spill] sm:$0xff]  ;;  %v9165_v14 = vadd.f32 %v11769_v49, %v8665_v13  ;;  %v11774_v30 = vld [vmem:[#allocation14_spill] sm:$0xff] }
 0x331   : > { %11757 = vst [vmem:[#allocation64_spill] sm:$0xff] %v9137_v58  ;;  %11763 = vst [vmem:[#allocation120_spill] sm:$0xff] %v9153_v12  ;;  %v9157_v60 = vadd.f32 %v11765_v38, %v11764_v18  ;;  %v11768_v58 = vld [vmem:[#allocation164_spill] sm:$0xff]  ;;  %v11771_v61 = vld [vmem:[#allocation163_spill] sm:$0xff] }
 0x332   : > { %v9161_v45 = vadd.f32 %v11768_v58, %v11767_v50  ;;  %11770 = vst [vmem:[#allocation122_spill] sm:$0xff] %v9165_v14  ;;  %v9169_v36 = vadd.f32 %v11771_v61, %v8669_v6  ;;  %v11773_v33 = vld [vmem:[#allocation167_spill] sm:$0xff]  ;;  %v11775_v12 = vld [vmem:[#allocation169_spill] sm:$0xff]  ;;  %v11776_v18 = vld [vmem:[#allocation16_spill] sm:$0xff] }
 0x333   : > { %11766 = vst [vmem:[#allocation7_spill] sm:$0xff] %v9157_v60  ;;  %v9173_v29 = vadd.f32 %v11773_v33, %v8673_v44  ;;  %v9177_v38 = vadd.f32 %v11775_v12, %v11774_v30  ;;  %v11777_v60 = vld [vmem:[#allocation165_spill] sm:$0xff]  ;;  %v11779_v50 = vld [vmem:[#allocation168_spill] sm:$0xff]  ;;  %v11780_v49 = vld [vmem:[#allocation19_spill] sm:$0xff] }
 0x334   : > { %11772 = vst [vmem:[#allocation66_spill] sm:$0xff] %v9169_v36  ;;  %v9181_v58 = vadd.f32 %v11777_v60, %v11776_v18  ;;  %v9185_v13 = vadd.f32 %v11779_v50, %v8685_v35  ;;  %v11781_v14 = vld [vmem:[#allocation171_spill] sm:$0xff]  ;;  %v11782_v61 = vld [vmem:[#allocation21_spill] sm:$0xff]  ;;  %v11784_v33 = vld [vmem:[#allocation170_spill] sm:$0xff] }
 0x335   : > { %v9189_v6 = vadd.f32 %v11781_v14, %v11780_v49  ;;  %v11783_v36 = vld [vmem:[#allocation173_spill] sm:$0xff]  ;;  %v9197_v12 = vadd.f32 %v11784_v33, %v8697_v28  ;;  %v11785_v30 = vld [vmem:[#allocation172_spill] sm:$0xff]  ;;  %v11786_v18 = vld [vmem:[#allocation18_spill] sm:$0xff] }
 0x336   : > { %11778 = vst [vmem:[#allocation119_spill] sm:$0xff] %v9181_v58  ;;  %v9193_v44 = vadd.f32 %v11783_v36, %v11782_v61  ;;  %v9201_v60 = vadd.f32 %v11785_v30, %v8701_v32  ;;  %v11787_v58 = vld [vmem:[#allocation175_spill] sm:$0xff]  ;;  %v11788_v50 = vld [vmem:[#allocation177_spill] sm:$0xff]  ;;  %v11789_v49 = vld [vmem:[#allocation174_spill] sm:$0xff] }
 0x337   : > { %v9205_v35 = vadd.f32 %v11787_v58, %v11786_v18  ;;  %v9209_v14 = vadd.f32 %v11788_v50, %v8709_v56  ;;  %v9213_v36 = vadd.f32 %v11789_v49, %v8713_v57  ;;  %v11790_v61 = vld [vmem:[#allocation176_spill] sm:$0xff]  ;;  %v11791_v33 = vld [vmem:[#allocation179_spill] sm:$0xff]  ;;  %v11792_v30 = vld [vmem:[#allocation181_spill] sm:$0xff] }
 0x338   : > { %v9217_v28 = vadd.f32 %v11790_v61, %v8717_v11  ;;  %v9221_v32 = vadd.f32 %v11791_v33, %v8721_v1  ;;  %v9225_v58 = vadd.f32 %v11792_v30, %v8725_v63  ;;  %v11793_v18 = vld [vmem:[#allocation178_spill] sm:$0xff]  ;;  %v11794_v50 = vld [vmem:[#allocation180_spill] sm:$0xff]  ;;  %v11795_v49 = vld [vmem:[#allocation79_spill] sm:$0xff] }
 0x339   : > { %v9229_v56 = vadd.f32 %v11793_v18, %v8729_v15  ;;  %v9233_v57 = vadd.f32 %v11794_v50, %v8733_v22  ;;  %v9237_v11 = vadd.f32 %v11795_v49, %v8737_v34  ;;  %v11796_v61 = vld [vmem:[#allocation184_spill] sm:$0xff]  ;;  %v11797_v33 = vld [vmem:[#allocation182_spill] sm:$0xff]  ;;  %v11798_v30 = vld [vmem:[#allocation183_spill] sm:$0xff] }
 0x33a   : > { %v9241_v1 = vadd.f32 %v11796_v61, %v8741_v19  ;;  %v9245_v63 = vadd.f32 %v11797_v33, %v8745_v8  ;;  %v9249_v15 = vadd.f32 %v11798_v30, %v8749_v51  ;;  %v11799_v18 = vld [vmem:[#allocation186_spill] sm:$0xff]  ;;  %v11800_v50 = vld [vmem:[#allocation188_spill] sm:$0xff]  ;;  %v11802_v49 = vld [vmem:[#allocation185_spill] sm:$0xff] }
 0x33b   : > { %v9253_v22 = vadd.f32 %v11799_v18, %v8753_v31  ;;  %v9257_v34 = vadd.f32 %v11800_v50, %v8757_v46  ;;  %v9261_v19 = vadd.f32 %v11802_v49, %v8761_v41  ;;  %v11803_v61 = vld [vmem:[#allocation187_spill] sm:$0xff]  ;;  %v11804_v33 = vld [vmem:[#allocation190_spill] sm:$0xff]  ;;  %v11805_v30 = vld [vmem:[#allocation89_spill] sm:$0xff] }
 0x33c   : > { %v9265_v8 = vadd.f32 %v11803_v61, %v8765_v62  ;;  %v9269_v51 = vadd.f32 %v11804_v33, %v8769_v9  ;;  %v9273_v31 = vadd.f32 %v11805_v30, %v8773_v10  ;;  %v11806_v18 = vld [vmem:[#allocation189_spill] sm:$0xff]  ;;  %v11807_v50 = vld [vmem:[#allocation20_spill] sm:$0xff]  ;;  %v11809_v49 = vld [vmem:[#allocation90_spill] sm:$0xff] }
 0x33d   : > { %11801 = vst [vmem:[#allocation68_spill] sm:$0xff] %v9257_v34  ;;  %v9277_v46 = vadd.f32 %v11806_v18, %v8777_v26  ;;  %v11808_v34 = vld [vmem:[#allocation191_spill] sm:$0xff]  ;;  %v9285_v62 = vadd.f32 %v11809_v49, %v8785_v48  ;;  %v11810_v61 = vld [vmem:[#allocation92_spill] sm:$0xff]  ;;  %v11812_v30 = vld [vmem:[#allocation193_spill] sm:$0xff] }
 0x33e   : > { %v9281_v41 = vadd.f32 %v11808_v34, %v11807_v50  ;;  %v9289_v9 = vadd.f32 %v11810_v61, %v8789_v4  ;;  %v11811_v33 = vld [vmem:[#allocation192_spill] sm:$0xff]  ;;  %v9297_v26 = vadd.f32 %v11812_v30, %v8797_v40  ;;  %v11813_v18 = vld [vmem:[#allocation94_spill] sm:$0xff]  ;;  %v11817_v61 = vld [vmem:[#allocation195_spill] sm:$0xff] }
 0x33f   : > { %v9293_v10 = vadd.f32 %v11811_v33, %v8793_v27  ;;  %v9301_v34 = vadd.f32 %v11813_v18, %v8801_v20  ;;  %v11815_v50 = vld [vmem:[#allocation196_spill] sm:$0xff]  ;;  %v11816_v49 = vld [vmem:[#allocation194_spill] sm:$0xff]  ;;  %v9313_v27 = vadd.f32 %v11817_v61, %v8813_v24  ;;  %v11822_v18 = vld [vmem:[#allocation23_spill] sm:$0xff] }
 0x340   : > { %v9305_v48 = vadd.f32 %v11815_v50, %v8805_v25  ;;  %v9309_v4 = vadd.f32 %v11816_v49, %v8809_v54  ;;  %v11819_v33 = vld [vmem:[#allocation198_spill] sm:$0xff]  ;;  %v11820_v30 = vld [vmem:[#allocation200_spill] sm:$0xff]  ;;  %v11824_v50 = vld [vmem:[#allocation199_spill] sm:$0xff] }
 0x341   : > { %11814 = vst [vmem:[#allocation121_spill] sm:$0xff] %v9301_v34  ;;  %11818 = vst [vmem:[#allocation71_spill] sm:$0xff] %v9313_v27  ;;  %v9317_v40 = vadd.f32 %v11819_v33, %v8817_v0  ;;  %v9321_v20 = vadd.f32 %v11820_v30, %v8821_v52  ;;  %v11823_v34 = vld [vmem:[#allocation197_spill] sm:$0xff]  ;;  %v9329_v54 = vadd.f32 %v11824_v50, %v8829_v2  ;;  %v11825_v49 = vld [vmem:[#allocation202_spill] sm:$0xff] }
 0x342   : > { %v9325_v25 = vadd.f32 %v11823_v34, %v11822_v18  ;;  %v9333_v24 = vadd.f32 %v11825_v49, %v8833_v17  ;;  %v11826_v61 = vld [vmem:[#allocation25_spill] sm:$0xff]  ;;  %v11827_v27 = vld [vmem:[#allocation204_spill] sm:$0xff]  ;;  %v11830_v30 = vld [vmem:[#allocation22_spill] sm:$0xff] }
 0x343   : > { %11821 = vst [vmem:[#allocation124_spill] sm:$0xff] %v9321_v20  ;;  %v9337_v0 = vadd.f32 %v11827_v27, %v11826_v61  ;;  %v11829_v33 = vld [vmem:[#allocation201_spill] sm:$0xff]  ;;  %v11831_v20 = vld [vmem:[#allocation203_spill] sm:$0xff]  ;;  %v11832_v18 = vld [vmem:[#allocation206_spill] sm:$0xff] }
 0x344   : > { %v9341_v52 = vadd.f32 %v11829_v33, %v8841_v42  ;;  %v9345_v34 = vadd.f32 %v11831_v20, %v11830_v30  ;;  %v9349_v2 = vadd.f32 %v11832_v18, %v8849_v39  ;;  %v11833_v50 = vld [vmem:[#allocation208_spill] sm:$0xff]  ;;  %v11834_v49 = vld [vmem:[#allocation205_spill] sm:$0xff]  ;;  %v11839_v33 = vld [vmem:[#allocation210_spill] sm:$0xff] }
 0x345   : > { %11828 = vst [vmem:[#allocation75_spill] sm:$0xff] %v9337_v0  ;;  %v9353_v17 = vadd.f32 %v11833_v50, %v8853_v37  ;;  %v9357_v27 = vadd.f32 %v11834_v49, %v8857_v21  ;;  %v11836_v61 = vld [vmem:[#allocation24_spill] sm:$0xff]  ;;  %v11837_v0 = vld [vmem:[#allocation207_spill] sm:$0xff]  ;;  %v9365_v20 = vadd.f32 %v11839_v33, %v8865_v7  ;;  %v11843_v18 = vld [vmem:[#allocation209_spill] sm:$0xff] }
 0x346   : > { %v9361_v42 = vadd.f32 %v11837_v0, %v11836_v61  ;;  %v11841_v30 = vld [vmem:[#allocation212_spill] sm:$0xff]  ;;  %v9373_v37 = vadd.f32 %v11843_v18, %v8873_v5  ;;  %v11845_v50 = vld [vmem:[#allocation211_spill] sm:$0xff]  ;;  %v11850_v61 = vld [vmem:[#allocation29_spill] sm:$0xff] }
 0x347   : > { %11835 = vst [vmem:[#allocation126_spill] sm:$0xff] %v9357_v27  ;;  %11840 = vst [vmem:[#allocation123_spill] sm:$0xff] %v9365_v20  ;;  %v9369_v39 = vadd.f32 %v11841_v30, %v8869_v43  ;;  %v9377_v21 = vadd.f32 %v11845_v50, %v8877_v23  ;;  %v11847_v49 = vld [vmem:[#allocation27_spill] sm:$0xff]  ;;  %v11848_v27 = vld [vmem:[#allocation214_spill] sm:$0xff] }
 0x348   : > { %11838 = vst [vmem:[#allocation77_spill] sm:$0xff] %v9361_v42  ;;  %11844 = vst [vmem:[#allocation125_spill] sm:$0xff] %v9373_v37  ;;  %v9381_v0 = vadd.f32 %v11848_v27, %v11847_v49  ;;  %v11851_v42 = vld [vmem:[#allocation216_spill] sm:$0xff]  ;;  %v11852_v33 = vld [vmem:[#allocation26_spill] sm:$0xff] }
 0x349   : > { %11842 = vst [vmem:[#allocation81_spill] sm:$0xff] %v9369_v39  ;;  %11846 = vst [vmem:[#allocation78_spill] sm:$0xff] %v9377_v21  ;;  %v9385_v7 = vadd.f32 %v11851_v42, %v11850_v61  ;;  %v11853_v20 = vld [vmem:[#allocation213_spill] sm:$0xff]  ;;  %v11854_v30 = vld [vmem:[#allocation28_spill] sm:$0xff] }
 0x34a   : > { %11849 = vst [vmem:[#allocation128_spill] sm:$0xff] %v9381_v0  ;;  %v9389_v43 = vadd.f32 %v11853_v20, %v11852_v33  ;;  %v11855_v39 = vld [vmem:[#allocation215_spill] sm:$0xff]  ;;  %v11857_v37 = vld [vmem:[#allocation218_spill] sm:$0xff]  ;;  %v11858_v50 = vld [vmem:[#allocation33_spill] sm:$0xff] }
 0x34b   : > { %v9393_v5 = vadd.f32 %v11855_v39, %v11854_v30  ;;  %v11856_v18 = vld [vmem:[#allocation31_spill] sm:$0xff]  ;;  %v11859_v21 = vld [vmem:[#allocation217_spill] sm:$0xff]  ;;  %v11860_v49 = vld [vmem:[#allocation30_spill] sm:$0xff] }
 0x34c   : > { %v9397_v23 = vadd.f32 %v11857_v37, %v11856_v18  ;;  %v9401_v27 = vadd.f32 %v11859_v21, %v11858_v50  ;;  %v11861_v0 = vld [vmem:[#allocation219_spill] sm:$0xff]  ;;  %v9410_v20 = vld [vmem:[%s10472_s5] ss:$0 sm:$0xff]  ;;  %v11863_v61 = vld [vmem:[#allocation32_spill] sm:$0xff] }
 0x34d   : > { %v9405_v42 = vadd.f32 %v11861_v0, %v11860_v49  ;;  %v9414_v39 = vadd.f32 %v9410_v20, %v11863_v61  ;;  %v11865_v33 = vld [vmem:[#allocation35_spill] sm:$0xff]  ;;  %v11867_v30 = vld [vmem:[#allocation37_spill] sm:$0xff]  ;;  %v11869_v18 = vld [vmem:[#allocation34_spill] sm:$0xff] }
 0x34e   : > { %v9418_v37 = vadd.f32 %v9410_v20, %v11865_v33  ;;  %v9422_v21 = vadd.f32 %v9410_v20, %v11867_v30  ;;  %v9426_v0 = vadd.f32 %v9410_v20, %v11869_v18  ;;  %v11871_v50 = vld [vmem:[#allocation36_spill] sm:$0xff] }
 0x34f   : > { %11862 = vst [vmem:[#allocation83_spill] sm:$0xff] %v9405_v42  ;;  %11864 = vst [vmem:[#allocation130_spill] sm:$0xff] %v9414_v39  ;;  %v9430_v49 = vadd.f32 %v9410_v20, %v11871_v50  ;;  %v11873_v42 = vld [vmem:[#allocation39_spill] sm:$0xff]  ;;  %v11875_v39 = vld [vmem:[#allocation41_spill] sm:$0xff] }
 0x350   : > { %11866 = vst [vmem:[#allocation85_spill] sm:$0xff] %v9418_v37  ;;  %11868 = vst [vmem:[#allocation127_spill] sm:$0xff] %v9422_v21  ;;  %v9434_v61 = vadd.f32 %v9410_v20, %v11873_v42  ;;  %v9438_v33 = vadd.f32 %v9410_v20, %v11875_v39  ;;  %v11877_v37 = vld [vmem:[#allocation38_spill] sm:$0xff]  ;;  %v11879_v21 = vld [vmem:[#allocation40_spill] sm:$0xff] }
 0x351   : > { %11870 = vst [vmem:[#allocation87_spill] sm:$0xff] %v9426_v0  ;;  %11872 = vst [vmem:[#allocation129_spill] sm:$0xff] %v9430_v49  ;;  %v9442_v30 = vadd.f32 %v9410_v20, %v11877_v37  ;;  %v9446_v18 = vadd.f32 %v9410_v20, %v11879_v21  ;;  %v11881_v0 = vld [vmem:[#allocation43_spill] sm:$0xff]  ;;  %v11883_v49 = vld [vmem:[#allocation45_spill] sm:$0xff] }
 0x352   : > { %11874 = vst [vmem:[#allocation154_spill] sm:$0xff] %v9434_v61  ;;  %11876 = vst [vmem:[#allocation132_spill] sm:$0xff] %v9438_v33  ;;  %v9450_v50 = vadd.f32 %v9410_v20, %v11881_v0  ;;  %v9454_v42 = vadd.f32 %v9410_v20, %v11883_v49  ;;  %v11885_v61 = vld [vmem:[#allocation42_spill] sm:$0xff]  ;;  %v11887_v33 = vld [vmem:[#allocation44_spill] sm:$0xff] }
 0x353   : > { %11878 = vst [vmem:[#allocation162_spill] sm:$0xff] %v9442_v30  ;;  %11880 = vst [vmem:[#allocation134_spill] sm:$0xff] %v9446_v18  ;;  %v9458_v39 = vadd.f32 %v9410_v20, %v11885_v61  ;;  %v9462_v37 = vadd.f32 %v9410_v20, %v11887_v33  ;;  %v11889_v30 = vld [vmem:[#allocation47_spill] sm:$0xff] }
 0x354   : > { %11882 = vst [vmem:[#allocation5_spill] sm:$0xff] %v9450_v50  ;;  %11884 = vst [vmem:[#allocation131_spill] sm:$0xff] %v9454_v42  ;;  %v9466_v21 = vadd.f32 %v9410_v20, %v11889_v30  ;;  %v11891_v18 = vld [vmem:[#allocation95_spill] sm:$0xff]  ;;  %v11893_v50 = vld [vmem:[#allocation97_spill] sm:$0xff] }
 0x355   : > { %11886 = vst [vmem:[#allocation73_spill] sm:$0xff] %v9458_v39  ;;  %11888 = vst [vmem:[#allocation133_spill] sm:$0xff] %v9462_v37  ;;  %v9470_v0 = vadd.f32 %v9410_v20, %v11891_v18  ;;  %v9474_v49 = vadd.f32 %v9410_v20, %v11893_v50  ;;  %v11895_v42 = vld [vmem:[#allocation100_spill] sm:$0xff]  ;;  %v11897_v39 = vld [vmem:[#allocation102_spill] sm:$0xff] }
 0x356   : > { %11890 = vst [vmem:[#allocation70_spill] sm:$0xff] %v9466_v21  ;;  %v9478_v61 = vadd.f32 %v9410_v20, %v11895_v42  ;;  %v9482_v33 = vadd.f32 %v9410_v20, %v11897_v39  ;;  %v11899_v37 = vld [vmem:[#allocation49_spill] sm:$0xff]  ;;  %v11901_v21 = vld [vmem:[#allocation99_spill] sm:$0xff] }
 0x357   : > { %11892 = vst [vmem:[#allocation136_spill] sm:$0xff] %v9470_v0  ;;  %11894 = vst [vmem:[#allocation72_spill] sm:$0xff] %v9474_v49  ;;  %v9486_v30 = vadd.f32 %v9410_v20, %v11899_v37  ;;  %v9490_v18 = vadd.f32 %v9410_v20, %v11901_v21  ;;  %v11903_v0 = vld [vmem:[#allocation46_spill] sm:$0xff]  ;;  %v11905_v49 = vld [vmem:[#allocation101_spill] sm:$0xff] }
 0x358   : > { %11896 = vst [vmem:[#allocation138_spill] sm:$0xff] %v9478_v61  ;;  %11898 = vst [vmem:[#allocation74_spill] sm:$0xff] %v9482_v33  ;;  %v9494_v50 = vadd.f32 %v9410_v20, %v11903_v0  ;;  %v9498_v42 = vadd.f32 %v9410_v20, %v11905_v49  ;;  %v11907_v61 = vld [vmem:[#allocation48_spill] sm:$0xff] }
 0x359   : > { %11900 = vst [vmem:[#allocation135_spill] sm:$0xff] %v9486_v30  ;;  %11902 = vst [vmem:[#allocation76_spill] sm:$0xff] %v9490_v18  ;;  %v9502_v39 = vadd.f32 %v9410_v20, %v11907_v61  ;;  %v11909_v33 = vld [vmem:[#allocation104_spill] sm:$0xff]  ;;  %v11911_v30 = vld [vmem:[#allocation51_spill] sm:$0xff] }
 0x35a   : > { %11904 = vst [vmem:[#allocation137_spill] sm:$0xff] %v9494_v50  ;;  %11906 = vst [vmem:[#allocation80_spill] sm:$0xff] %v9498_v42  ;;  %v9506_v37 = vadd.f32 %v9410_v20, %v11909_v33  ;;  %v9510_v21 = vadd.f32 %v9410_v20, %v11911_v30  ;;  %v11913_v18 = vld [vmem:[#allocation106_spill] sm:$0xff]  ;;  %v11915_v50 = vld [vmem:[#allocation53_spill] sm:$0xff] }
 0x35b   : > { %11908 = vst [vmem:[#allocation140_spill] sm:$0xff] %v9502_v39  ;;  %v9514_v0 = vadd.f32 %v9410_v20, %v11913_v18  ;;  %v9518_v49 = vadd.f32 %v9410_v20, %v11915_v50  ;;  %v11917_v42 = vld [vmem:[#allocation103_spill] sm:$0xff]  ;;  %v11919_v39 = vld [vmem:[#allocation50_spill] sm:$0xff] }
 0x35c   : > { %11910 = vst [vmem:[#allocation82_spill] sm:$0xff] %v9506_v37  ;;  %11912 = vst [vmem:[#allocation142_spill] sm:$0xff] %v9510_v21  ;;  %v9522_v61 = vadd.f32 %v9410_v20, %v11917_v42  ;;  %v9526_v33 = vadd.f32 %v9410_v20, %v11919_v39  ;;  %v11921_v37 = vld [vmem:[#allocation105_spill] sm:$0xff]  ;;  %v11923_v21 = vld [vmem:[#allocation52_spill] sm:$0xff] }
 0x35d   : > { %11914 = vst [vmem:[#allocation84_spill] sm:$0xff] %v9514_v0  ;;  %11916 = vst [vmem:[#allocation139_spill] sm:$0xff] %v9518_v49  ;;  %v9530_v30 = vadd.f32 %v9410_v20, %v11921_v37  ;;  %v9534_v18 = vadd.f32 %v9410_v20, %v11923_v21  ;;  %v11925_v0 = vld [vmem:[#allocation108_spill] sm:$0xff]  ;;  %v11927_v49 = vld [vmem:[#allocation55_spill] sm:$0xff] }
 0x35e   : > { %11918 = vst [vmem:[#allocation86_spill] sm:$0xff] %v9522_v61  ;;  %11920 = vst [vmem:[#allocation141_spill] sm:$0xff] %v9526_v33  ;;  %v9538_v50 = vadd.f32 %v9410_v20, %v11925_v0  ;;  %v9542_v42 = vadd.f32 %v9410_v20, %v11927_v49  ;;  %v11929_v61 = vld [vmem:[#allocation110_spill] sm:$0xff]  ;;  %v11931_v33 = vld [vmem:[#allocation57_spill] sm:$0xff] }
 0x35f   : > { %11922 = vst [vmem:[#allocation88_spill] sm:$0xff] %v9530_v30  ;;  %11924 = vst [vmem:[#allocation144_spill] sm:$0xff] %v9534_v18  ;;  %v9546_v39 = vadd.f32 %v9410_v20, %v11929_v61  ;;  %v9550_v37 = vadd.f32 %v9410_v20, %v11931_v33  ;;  %v11933_v30 = vld [vmem:[#allocation107_spill] sm:$0xff]  ;;  %v11935_v18 = vld [vmem:[#allocation54_spill] sm:$0xff] }
 0x360   : > { %11926 = vst [vmem:[#allocation91_spill] sm:$0xff] %v9538_v50  ;;  %11928 = vst [vmem:[#allocation146_spill] sm:$0xff] %v9542_v42  ;;  %v9554_v21 = vadd.f32 %v9410_v20, %v11933_v30  ;;  %v9558_v0 = vadd.f32 %v9410_v20, %v11935_v18  ;;  %v11937_v50 = vld [vmem:[#allocation109_spill] sm:$0xff]  ;;  %v11939_v42 = vld [vmem:[#allocation56_spill] sm:$0xff] }
 0x361   : > { %11930 = vst [vmem:[#allocation93_spill] sm:$0xff] %v9546_v39  ;;  %11932 = vst [vmem:[#allocation143_spill] sm:$0xff] %v9550_v37  ;;  %v9562_v49 = vadd.f32 %v9410_v20, %v11937_v50  ;;  %v9566_v61 = vadd.f32 %v9410_v20, %v11939_v42  ;;  %v11941_v39 = vld [vmem:[#allocation112_spill] sm:$0xff]  ;;  %v11943_v37 = vld [vmem:[#allocation59_spill] sm:$0xff] }
 0x362   : > { %11934 = vst [vmem:[#allocation166_spill] sm:$0xff] %v9554_v21  ;;  %11936 = vst [vmem:[#allocation145_spill] sm:$0xff] %v9558_v0  ;;  %v9570_v33 = vadd.f32 %v9410_v20, %v11941_v39  ;;  %v9574_v30 = vadd.f32 %v9410_v20, %v11943_v37  ;;  %v11945_v21 = vld [vmem:[#allocation114_spill] sm:$0xff]  ;;  %v11947_v0 = vld [vmem:[#allocation61_spill] sm:$0xff] }
 0x363   : > { %11938 = vst [vmem:[#allocation2_spill] sm:$0xff] %v9562_v49  ;;  %11940 = vst [vmem:[#allocation148_spill] sm:$0xff] %v9566_v61  ;;  %v9578_v18 = vadd.f32 %v9410_v20, %v11945_v21  ;;  %v9582_v50 = vadd.f32 %v9410_v20, %v11947_v0  ;;  %v11949_v49 = vld [vmem:[#allocation111_spill] sm:$0xff]  ;;  %v11951_v61 = vld [vmem:[#allocation58_spill] sm:$0xff] }
 0x364   : > { %11942 = vst [vmem:[#allocation4_spill] sm:$0xff] %v9570_v33  ;;  %11944 = vst [vmem:[#allocation150_spill] sm:$0xff] %v9574_v30  ;;  %v9586_v42 = vadd.f32 %v9410_v20, %v11949_v49  ;;  %v9590_v39 = vadd.f32 %v9410_v20, %v11951_v61  ;;  %v11953_v33 = vld [vmem:[#allocation113_spill] sm:$0xff]  ;;  %v11955_v30 = vld [vmem:[#allocation60_spill] sm:$0xff] }
 0x365   : > { %11946 = vst [vmem:[#allocation3_spill] sm:$0xff] %v9578_v18  ;;  %11948 = vst [vmem:[#allocation147_spill] sm:$0xff] %v9582_v50  ;;  %v9594_v37 = vadd.f32 %v9410_v20, %v11953_v33  ;;  %v9598_v21 = vadd.f32 %v9410_v20, %v11955_v30  ;;  %v11957_v18 = vld [vmem:[#allocation116_spill] sm:$0xff]  ;;  %v11958_v50 = vld [vmem:[#allocation63_spill] sm:$0xff] }
 0x366   : > { %11950 = vst [vmem:[#allocation8_spill] sm:$0xff] %v9586_v42  ;;  %11952 = vst [vmem:[#allocation149_spill] sm:$0xff] %v9590_v39  ;;  %v9602_v0 = vadd.f32 %v9410_v20, %v11957_v18  ;;  %v9606_v49 = vadd.f32 %v9410_v20, %v11958_v50  ;;  %v11959_v42 = vld [vmem:[#allocation118_spill] sm:$0xff]  ;;  %v11960_v39 = vld [vmem:[#allocation65_spill] sm:$0xff]  ;;  %v9626_v50 = vadd.f32 %v9410_v20, %v9121_v53 }
 0x367   : > { %11954 = vst [vmem:[#allocation10_spill] sm:$0xff] %v9594_v37  ;;  %11956 = vst [vmem:[#allocation152_spill] sm:$0xff] %v9598_v21  ;;  %v9610_v61 = vadd.f32 %v9410_v20, %v11959_v42  ;;  %v9614_v33 = vadd.f32 %v9410_v20, %v11960_v39  ;;  %v11962_v37 = vld [vmem:[#allocation115_spill] sm:$0xff]  ;;  %v11964_v21 = vld [vmem:[#allocation62_spill] sm:$0xff]  ;;  %v9630_v42 = vadd.f32 %v9410_v20, %v9125_v47 }
 0x368   : > { %v9618_v30 = vadd.f32 %v9410_v20, %v11962_v37  ;;  %v9622_v18 = vadd.f32 %v9410_v20, %v11964_v21  ;;  %v9634_v39 = vadd.f32 %v9410_v20, %v9129_v55  ;;  %v9646_v53 = vadd.f32 %v9410_v20, %v9141_v3 }
 0x369   : > { %11961 = vst [vmem:[#allocation9_spill] sm:$0xff] %v9614_v33  ;;  %v11966_v33 = vld [vmem:[#allocation117_spill] sm:$0xff]  ;;  %v9650_v47 = vadd.f32 %v9410_v20, %v9145_v16  ;;  %v9654_v55 = vadd.f32 %v9410_v20, %v9149_v59  ;;  %v9666_v3 = vadd.f32 %v9410_v20, %v9161_v45 }
 0x36a   : > { %11963 = vst [vmem:[#allocation155_spill] sm:$0xff] %v9618_v30  ;;  %11965 = vst [vmem:[#allocation13_spill] sm:$0xff] %v9634_v39  ;;  %v9638_v37 = vadd.f32 %v9410_v20, %v11966_v33  ;;  %v11968_v30 = vld [vmem:[#allocation64_spill] sm:$0xff] }
 0x36b   : > { %v9642_v21 = vadd.f32 %v9410_v20, %v11968_v30  ;;  %11969 = vst [vmem:[#allocation11_spill] sm:$0xff] %v9646_v53  ;;  %11970 = vst [vmem:[#allocation153_spill] sm:$0xff] %v9650_v47  ;;  %v11971_v39 = vld [vmem:[#allocation120_spill] sm:$0xff]  ;;  %v11974_v53 = vld [vmem:[#allocation122_spill] sm:$0xff] }
 0x36c   : > { %11967 = vst [vmem:[#allocation151_spill] sm:$0xff] %v9638_v37  ;;  %v9658_v33 = vadd.f32 %v9410_v20, %v11971_v39  ;;  %v11972_v37 = vld [vmem:[#allocation7_spill] sm:$0xff]  ;;  %v9670_v16 = vadd.f32 %v9410_v20, %v11974_v53  ;;  %v11975_v47 = vld [vmem:[#allocation66_spill] sm:$0xff]  ;;  %v9678_v39 = vadd.f32 %v9410_v20, %v9173_v29  ;;  %v9690_v53 = vadd.f32 %v9410_v20, %v9185_v13 }
 0x36d   : > { %v9662_v30 = vadd.f32 %v9410_v20, %v11972_v37  ;;  %v9674_v59 = vadd.f32 %v9410_v20, %v11975_v47  ;;  %v9682_v37 = vadd.f32 %v9410_v20, %v9177_v38  ;;  %v9694_v47 = vadd.f32 %v9410_v20, %v9189_v6 }
 0x36e   : > { %v9698_v29 = vadd.f32 %v9410_v20, %v9193_v44  ;;  %v9702_v38 = vadd.f32 %v9410_v20, %v9197_v12  ;;  %v9710_v13 = vadd.f32 %v9410_v20, %v9205_v35  ;;  %v9714_v6 = vadd.f32 %v9410_v20, %v9209_v14 }
 0x36f   : > { %11973 = vst [vmem:[#allocation12_spill] sm:$0xff] %v9662_v30  ;;  %v11976_v30 = vld [vmem:[#allocation119_spill] sm:$0xff]  ;;  %v9718_v44 = vadd.f32 %v9410_v20, %v9213_v36  ;;  %v9722_v12 = vadd.f32 %v9410_v20, %v9217_v28  ;;  %v9730_v35 = vadd.f32 %v9410_v20, %v9225_v58  ;;  %v9734_v14 = vadd.f32 %v9410_v20, %v9229_v56 }
 0x370   : > { %v9686_v45 = vadd.f32 %v9410_v20, %v11976_v30  ;;  %v9706_v30 = vadd.f32 %v9410_v20, %v9201_v60  ;;  %v9726_v60 = vadd.f32 %v9410_v20, %v9221_v32  ;;  %v9738_v36 = vadd.f32 %v9410_v20, %v9233_v57 }
 0x371   : > { %v9742_v28 = vadd.f32 %v9410_v20, %v9237_v11  ;;  %v9746_v32 = vadd.f32 %v9410_v20, %v9241_v1  ;;  %v9750_v58 = vadd.f32 %v9410_v20, %v9245_v63  ;;  %v9754_v56 = vadd.f32 %v9410_v20, %v9249_v15 }
 0x372   : > { %11977 = vst [vmem:[#allocation157_spill] sm:$0xff] %v9738_v36  ;;  %v9758_v57 = vadd.f32 %v9410_v20, %v9253_v22  ;;  %v11978_v36 = vld [vmem:[#allocation68_spill] sm:$0xff]  ;;  %v9766_v1 = vadd.f32 %v9410_v20, %v9261_v19  ;;  %v9770_v63 = vadd.f32 %v9410_v20, %v9265_v8  ;;  %v9774_v15 = vadd.f32 %v9410_v20, %v9269_v51 }
 0x373   : > { %v9762_v11 = vadd.f32 %v9410_v20, %v11978_v36  ;;  %v9778_v22 = vadd.f32 %v9410_v20, %v9273_v31  ;;  %v9782_v36 = vadd.f32 %v9410_v20, %v9277_v46  ;;  %v9786_v19 = vadd.f32 %v9410_v20, %v9281_v41 }
 0x374   : > { %11979 = vst [vmem:[#allocation159_spill] sm:$0xff] %v9774_v15  ;;  %v9790_v8 = vadd.f32 %v9410_v20, %v9285_v62  ;;  %v9794_v51 = vadd.f32 %v9410_v20, %v9289_v9  ;;  %v9798_v31 = vadd.f32 %v9410_v20, %v9293_v10  ;;  %v9802_v46 = vadd.f32 %v9410_v20, %v9297_v26 }
 0x375   : > { %11980 = vst [vmem:[#allocation156_spill] sm:$0xff] %v9778_v22  ;;  %11981 = vst [vmem:[#allocation158_spill] sm:$0xff] %v9782_v36  ;;  %v11987_v36 = vld [vmem:[#allocation121_spill] sm:$0xff]  ;;  %v9810_v62 = vadd.f32 %v9410_v20, %v9305_v48  ;;  %v9814_v9 = vadd.f32 %v9410_v20, %v9309_v4  ;;  %v9822_v26 = vadd.f32 %v9410_v20, %v9317_v40 }
 0x376   : > { %11982 = vst [vmem:[#allocation15_spill] sm:$0xff] %v9786_v19  ;;  %11983 = vst [vmem:[#allocation161_spill] sm:$0xff] %v9790_v8  ;;  %v9806_v41 = vadd.f32 %v9410_v20, %v11987_v36  ;;  %v9830_v48 = vadd.f32 %v9410_v20, %v9325_v25  ;;  %v9834_v4 = vadd.f32 %v9410_v20, %v9329_v54 }
 0x377   : > { %11984 = vst [vmem:[#allocation17_spill] sm:$0xff] %v9794_v51  ;;  %11985 = vst [vmem:[#allocation164_spill] sm:$0xff] %v9798_v31  ;;  %v11991_v51 = vld [vmem:[#allocation71_spill] sm:$0xff]  ;;  %v9850_v25 = vadd.f32 %v9410_v20, %v9345_v34  ;;  %v9854_v54 = vadd.f32 %v9410_v20, %v9349_v2  ;;  %v12038_v31 = vld [vmem:[#allocation134_spill] sm:$0xff] }
 0x378   : > { %11986 = vst [vmem:[#allocation160_spill] sm:$0xff] %v9802_v46  ;;  %11988 = vst [vmem:[#allocation163_spill] sm:$0xff] %v9806_v41  ;;  %v9818_v10 = vadd.f32 %v9410_v20, %v11991_v51  ;;  %v11994_v46 = vld [vmem:[#allocation124_spill] sm:$0xff]  ;;  %v9838_v51 = vadd.f32 %v9410_v20, %v9333_v24  ;;  %v9858_v24 = vadd.f32 %v9410_v20, %v9353_v17 }
 0x379   : > { %11989 = vst [vmem:[#allocation167_spill] sm:$0xff] %v9810_v62  ;;  %11990 = vst [vmem:[#allocation14_spill] sm:$0xff] %v9814_v9  ;;  %v9826_v36 = vadd.f32 %v9410_v20, %v11994_v46  ;;  %v9846_v46 = vadd.f32 %v9410_v20, %v9341_v52  ;;  %v12036_v62 = vld [vmem:[#allocation132_spill] sm:$0xff] }
 0x37a   : > { %11992 = vst [vmem:[#allocation169_spill] sm:$0xff] %v9818_v10  ;;  %11993 = vst [vmem:[#allocation16_spill] sm:$0xff] %v9822_v26  ;;  %v11999_v10 = vld [vmem:[#allocation75_spill] sm:$0xff]  ;;  %v12035_v26 = vld [vmem:[#allocation154_spill] sm:$0xff] }
 0x37b   : > { %11995 = vst [vmem:[#allocation165_spill] sm:$0xff] %v9826_v36  ;;  %11996 = vst [vmem:[#allocation168_spill] sm:$0xff] %v9830_v48  ;;  %v9842_v40 = vadd.f32 %v9410_v20, %v11999_v10  ;;  %v12034_v48 = vld [vmem:[#allocation98_spill] sm:$0xff]  ;;  %v3069_v9 = vmax.f32 %v12035_v26, 0.0  ;;  %v12041_v26 = vld [vmem:[#allocation73_spill] sm:$0xff] }
 0x37c   : > { %11997 = vst [vmem:[#allocation19_spill] sm:$0xff] %v9834_v4  ;;  %11998 = vst [vmem:[#allocation171_spill] sm:$0xff] %v9838_v51  ;;  %v12005_v51 = vld [vmem:[#allocation126_spill] sm:$0xff] }
 0x37d   : > { %12000 = vst [vmem:[#allocation21_spill] sm:$0xff] %v9842_v40  ;;  %12001 = vst [vmem:[#allocation173_spill] sm:$0xff] %v9846_v46  ;;  %v9862_v10 = vadd.f32 %v9410_v20, %v12005_v51  ;;  %v12007_v40 = vld [vmem:[#allocation77_spill] sm:$0xff]  ;;  %v12009_v46 = vld [vmem:[#allocation123_spill] sm:$0xff] }
 0x37e   : > { %12002 = vst [vmem:[#allocation170_spill] sm:$0xff] %v9850_v25  ;;  %12003 = vst [vmem:[#allocation172_spill] sm:$0xff] %v9854_v54  ;;  %v9866_v52 = vadd.f32 %v9410_v20, %v12007_v40  ;;  %v9870_v34 = vadd.f32 %v9410_v20, %v12009_v46  ;;  %v12011_v25 = vld [vmem:[#allocation81_spill] sm:$0xff]  ;;  %v9890_v46 = vadd.f32 %v9410_v20, %v9385_v7 }
 0x37f   : > { %12004 = vst [vmem:[#allocation18_spill] sm:$0xff] %v9858_v24  ;;  %12006 = vst [vmem:[#allocation175_spill] sm:$0xff] %v9862_v10  ;;  %v9874_v2 = vadd.f32 %v9410_v20, %v12011_v25  ;;  %v12013_v54 = vld [vmem:[#allocation125_spill] sm:$0xff]  ;;  %v12015_v24 = vld [vmem:[#allocation78_spill] sm:$0xff]  ;;  %v9894_v25 = vadd.f32 %v9410_v20, %v9389_v43 }
 0x380   : > { %12008 = vst [vmem:[#allocation177_spill] sm:$0xff] %v9866_v52  ;;  %12010 = vst [vmem:[#allocation174_spill] sm:$0xff] %v9870_v34  ;;  %v9878_v17 = vadd.f32 %v9410_v20, %v12013_v54  ;;  %v9882_v51 = vadd.f32 %v9410_v20, %v12015_v24  ;;  %v12017_v10 = vld [vmem:[#allocation128_spill] sm:$0xff]  ;;  %v9898_v54 = vadd.f32 %v9410_v20, %v9393_v5  ;;  %v5261_v43 = vld [vmem:[%s10470_s3] ss:$0 sm:$0xff] }
 0x381   : > { %12012 = vst [vmem:[#allocation176_spill] sm:$0xff] %v9874_v2  ;;  %v9886_v40 = vadd.f32 %v9410_v20, %v12017_v10  ;;  %12019 = vst [vmem:[#allocation180_spill] sm:$0xff] %v9890_v46  ;;  %v9902_v24 = vadd.f32 %v9410_v20, %v9397_v23  ;;  %v9906_v10 = vadd.f32 %v9410_v20, %v9401_v27  ;;  %v12027_v5 = vld [vmem:[#allocation69_spill] sm:$0xff]  ;;  %v12030_v2 = vld [vmem:[#allocation127_spill] sm:$0xff] }
 0x382   : > { %12014 = vst [vmem:[#allocation179_spill] sm:$0xff] %v9878_v17  ;;  %12016 = vst [vmem:[#allocation181_spill] sm:$0xff] %v9882_v51  ;;  %v12028_v51 = vld [vmem:[#allocation130_spill] sm:$0xff]  ;;  %v12029_v23 = vld [vmem:[#allocation85_spill] sm:$0xff]  ;;  %v3066_v34 = vmax.f32 %v12030_v2, 0.0 }
 0x383   : > { %12018 = vst [vmem:[#allocation178_spill] sm:$0xff] %v9886_v40  ;;  %12020 = vst [vmem:[#allocation79_spill] sm:$0xff] %v9894_v25  ;;  %v12024_v40 = vld [vmem:[#allocation83_spill] sm:$0xff]  ;;  %v3064_v17 = vmax.f32 %v12028_v51, 0.0  ;;  %v12032_v52 = vld [vmem:[#allocation129_spill] sm:$0xff] }
 0x384   : > { %12021 = vst [vmem:[#allocation184_spill] sm:$0xff] %v9898_v54  ;;  %12022 = vst [vmem:[#allocation182_spill] sm:$0xff] %v9902_v24  ;;  %v9910_v7 = vadd.f32 %v9410_v20, %v12024_v40  ;;  %v12026_v25 = vld [vmem:[#allocation67_spill] sm:$0xff]  ;;  %v2537_v54 = vadd.f32 %v5261_v43, %v12027_v5  ;;  %v3065_v24 = vmax.f32 %v12029_v23, 0.0  ;;  %v3068_v4 = vmax.f32 %v12032_v52, 0.0  ;;  %v12033_v40 = vld [vmem:[#allocation96_spill] sm:$0xff] }
 0x385   : > { %12023 = vst [vmem:[#allocation183_spill] sm:$0xff] %v9906_v10  ;;  %v2536_v46 = vadd.f32 %v5261_v43, %v12026_v25  ;;  %v12031_v27 = vld [vmem:[#allocation87_spill] sm:$0xff]  ;;  %v3070_v25 = vmax.f32 %v12036_v62, 0.0  ;;  %v12037_v5 = vld [vmem:[#allocation162_spill] sm:$0xff]  ;;  %v3072_v23 = vmax.f32 %v12038_v31, 0.0  ;;  %v12039_v52 = vld [vmem:[#allocation5_spill] sm:$0xff] }
 0x386   : > { %12025 = vst [vmem:[#allocation186_spill] sm:$0xff] %v9910_v7  ;;  %v3067_v10 = vmax.f32 %v12031_v27, 0.0  ;;  %v2800_v36 = vadd.f32 %v12034_v48, %v2537_v54  ;;  %v3191_v41 = vpack.c.bf16 %v3065_v24, %v3064_v17  ;;  %v3071_v51 = vmax.f32 %v12037_v5, 0.0  ;;  %v12040_v48 = vld [vmem:[#allocation131_spill] sm:$0xff]  ;;  %v12042_v62 = vld [vmem:[#allocation133_spill] sm:$0xff]  ;;  %v12043_v31 = vld [vmem:[#allocation70_spill] sm:$0xff] }
 0x387   : > { %v2799_v7 = vadd.f32 %v12033_v40, %v2536_v46  ;;  %v3193_v8 = vpack.c.bf16 %v3069_v9, %v3068_v4  ;;  %v3073_v19 = vmax.f32 %v12039_v52, 0.0  ;;  %v3074_v54 = vmax.f32 %v12040_v48, 0.0 }
 0x388   : > { %v3192_v43 = vpack.c.bf16 %v3067_v10, %v3066_v34  ;;  %v2935_v27 = vadd.f32 %v9410_v20, %v2800_v36  ;;  %v9931_v46 = vpack.c.bf16 %v3071_v51, %v3070_v25  ;;  %v3075_v40 = vmax.f32 %v12041_v26, 0.0  ;;  %v12045_v36 = vld [vmem:[#allocation72_spill] sm:$0xff]  ;;  %v12046_v25 = vld [vmem:[#allocation138_spill] sm:$0xff] }
 0x389   : > { %v2934_v2 = vadd.f32 %v9410_v20, %v2799_v7  ;;  %v3076_v17 = vmax.f32 %v12042_v62, 0.0  ;;  %v9936_v10 = vpack.c.bf16 %v3073_v19, %v3072_v23  ;;  %v3077_v5 = vmax.f32 %v12043_v31, 0.0  ;;  %v12044_v20 = vld [vmem:[#allocation136_spill] sm:$0xff]  ;;  %v12047_v26 = vld [vmem:[#allocation74_spill] sm:$0xff]  ;;  %v12048_v62 = vld [vmem:[#allocation135_spill] sm:$0xff] }
 0x38a   : > { %v3063_v24 = vmax.f32 %v2935_v27, 0.0  ;;  %v9939_v7 = vpack.c.bf16 %v3075_v40, %v3074_v54  ;;  %v3078_v9 = vmax.f32 %v12044_v20, 0.0  ;;  %v3079_v4 = vmax.f32 %v12045_v36, 0.0  ;;  %v12049_v19 = vld [vmem:[#allocation76_spill] sm:$0xff]  ;;  %v12050_v31 = vld [vmem:[#allocation137_spill] sm:$0xff] }
 0x38b   : > { %v3062_v34 = vmax.f32 %v2934_v2, 0.0  ;;  %v3080_v51 = vmax.f32 %v12046_v25, 0.0  ;;  %v9944_v48 = vpack.c.bf16 %v3077_v5, %v3076_v17  ;;  %v3081_v22 = vmax.f32 %v12047_v26, 0.0  ;;  %v12051_v40 = vld [vmem:[#allocation80_spill] sm:$0xff]  ;;  %v12054_v17 = vld [vmem:[#allocation82_spill] sm:$0xff] }
 0x38c   : > { %v3082_v2 = vmax.f32 %v12048_v62, 0.0  ;;  %v9948_v27 = vpack.c.bf16 %v3079_v4, %v3078_v9  ;;  %v3083_v23 = vmax.f32 %v12049_v19, 0.0  ;;  %v3084_v54 = vmax.f32 %v12050_v31, 0.0  ;;  %v12053_v36 = vld [vmem:[#allocation140_spill] sm:$0xff]  ;;  %v12055_v5 = vld [vmem:[#allocation142_spill] sm:$0xff]  ;;  %v12059_v19 = vld [vmem:[#allocation139_spill] sm:$0xff] }
 0x38d   : > { %v3190_v52 = vpack.c.bf16 %v3063_v24, %v3062_v34  ;;  %v3085_v15 = vmax.f32 %v12051_v40, 0.0  ;;  %v9954_v20 = vpack.c.bf16 %v3081_v22, %v3080_v51  ;;  %v3086_v34 = vmax.f32 %v12053_v36, 0.0  ;;  %v12058_v26 = vld [vmem:[#allocation84_spill] sm:$0xff]  ;;  %v12061_v51 = vld [vmem:[#allocation86_spill] sm:$0xff]  ;;  %v12062_v40 = vld [vmem:[#allocation141_spill] sm:$0xff] }
 0x38e   : > { %v3087_v24 = vmax.f32 %v12054_v17, 0.0  ;;  %v3088_v25 = vmax.f32 %v12055_v5, 0.0  ;;  %v9960_v9 = vpack.c.bf16 %v3083_v23, %v3082_v2  ;;  %v3089_v62 = vmax.f32 %v12058_v26, 0.0  ;;  %v12063_v17 = vld [vmem:[#allocation88_spill] sm:$0xff] }
 0x38f   : > { %5013 = vmatprep.mubr.msk.bf16.mxu1 %vm1480_vm0, %v3190_v52  ;;  %12052 = vst [vmem:[#allocation188_spill] sm:$0xff] %v9954_v20  ;;  %v9962_v4 = vpack.c.bf16 %v3085_v15, %v3084_v54  ;;  %v3090_v31 = vmax.f32 %v12059_v19, 0.0  ;;  %v3091_v52 = vmax.f32 %v12061_v51, 0.0  ;;  %v3092_v36 = vmax.f32 %v12062_v40, 0.0  ;;  %v12066_v15 = vld [vmem:[#allocation91_spill] sm:$0xff]  ;;  %v12067_v54 = vld [vmem:[#allocation146_spill] sm:$0xff] }
 0x390   : > { %5014 = vmatmul.mubr.msk.bf16.vlgmr.msra.gmra.mrb[0].mxu1 %vm1480_vm0, %v3191_v41  ;;  %12056 = vst [vmem:[#allocation185_spill] sm:$0xff] %v9960_v9  ;;  %v9967_v22 = vpack.c.bf16 %v3087_v24, %v3086_v34  ;;  %v3093_v5 = vmax.f32 %v12063_v17, 0.0  ;;  %v9972_v20 = vpack.c.bf16 %v3089_v62, %v3088_v25  ;;  %v12065_v41 = vld [vmem:[#allocation144_spill] sm:$0xff]  ;;  %v3095_v23 = vmax.f32 %v12066_v15, 0.0  ;;  %v12070_v24 = vld [vmem:[#allocation143_spill] sm:$0xff]  ;;  %v12072_v40 = vld [vmem:[#allocation166_spill] sm:$0xff] }
 0x391   : > { %12057 = vst [vmem:[#allocation187_spill] sm:$0xff] %v9962_v4  ;;  %5017 = vmatprep.mubr.msk.bf16.mxu1 %vm1480_vm0, %v3192_v43  ;;  %v3094_v2 = vmax.f32 %v12065_v41, 0.0  ;;  %v3096_v26 = vmax.f32 %v12067_v54, 0.0  ;;  %v9977_v4 = vpack.c.bf16 %v3091_v52, %v3090_v31  ;;  %v12069_v43 = vld [vmem:[#allocation93_spill] sm:$0xff]  ;;  %v3098_v51 = vmax.f32 %v12070_v24, 0.0  ;;  %v12076_v15 = vld [vmem:[#allocation148_spill] sm:$0xff] }
 0x392   : > { %12060 = vst [vmem:[#allocation190_spill] sm:$0xff] %v9967_v22  ;;  %12064 = vst [vmem:[#allocation89_spill] sm:$0xff] %v9972_v20  ;;  %v9979_v19 = vpack.c.bf16 %v3093_v5, %v3092_v36  ;;  %v3097_v34 = vmax.f32 %v12069_v43, 0.0  ;;  %v3099_v17 = vmax.f32 %v12072_v40, 0.0  ;;  %v12073_v25 = vld [vmem:[#allocation145_spill] sm:$0xff]  ;;  %v12074_v20 = vld [vmem:[#allocation2_spill] sm:$0xff] }
 0x393   : > { %v9983_v22 = vpack.c.bf16 %v3095_v23, %v3094_v2  ;;  %v3100_v62 = vmax.f32 %v12073_v25, 0.0  ;;  %v3101_v41 = vmax.f32 %v12074_v20, 0.0  ;;  %v3102_v54 = vmax.f32 %v12076_v15, 0.0  ;;  %v12077_v31 = vld [vmem:[#allocation4_spill] sm:$0xff]  ;;  %v12078_v36 = vld [vmem:[#allocation150_spill] sm:$0xff]  ;;  %v12079_v2 = vld [vmem:[#allocation3_spill] sm:$0xff] }
 0x394   : > { %12068 = vst [vmem:[#allocation189_spill] sm:$0xff] %v9979_v19  ;;  %v9988_v9 = vpack.c.bf16 %v3097_v34, %v3096_v26  ;;  %v3103_v52 = vmax.f32 %v12077_v31, 0.0  ;;  %v3104_v5 = vmax.f32 %v12078_v36, 0.0  ;;  %v9993_v19 = vpack.c.bf16 %v3099_v17, %v3098_v51  ;;  %v12080_v24 = vld [vmem:[#allocation147_spill] sm:$0xff]  ;;  %v12081_v25 = vld [vmem:[#allocation8_spill] sm:$0xff]  ;;  %v12082_v26 = vld [vmem:[#allocation149_spill] sm:$0xff] }
 0x395   : > { %12071 = vst [vmem:[#allocation20_spill] sm:$0xff] %v9983_v22  ;;  %v9995_v43 = vpack.c.bf16 %v3101_v41, %v3100_v62  ;;  %v3105_v23 = vmax.f32 %v12079_v2, 0.0  ;;  %v3106_v40 = vmax.f32 %v12080_v24, 0.0  ;;  %v3107_v20 = vmax.f32 %v12081_v25, 0.0  ;;  %v12084_v51 = vld [vmem:[#allocation152_spill] sm:$0xff] }
 0x396   : > { %12075 = vst [vmem:[#allocation191_spill] sm:$0xff] %v9988_v9  ;;  %v9999_v22 = vpack.c.bf16 %v3103_v52, %v3102_v54  ;;  %v3108_v34 = vmax.f32 %v12082_v26, 0.0  ;;  %v12083_v9 = vld [vmem:[#allocation10_spill] sm:$0xff]  ;;  %v3110_v17 = vmax.f32 %v12084_v51, 0.0  ;;  %v3111_v62 = vmax.f32 %v9602_v0, 0.0  ;;  %v12089_v51 = vld [vmem:[#allocation11_spill] sm:$0xff] }
 0x397   : > { %v3109_v15 = vmax.f32 %v12083_v9, 0.0  ;;  %v10005_v31 = vpack.c.bf16 %v3105_v23, %v3104_v5  ;;  %v3112_v41 = vmax.f32 %v9606_v49, 0.0  ;;  %v10012_v54 = vpack.c.bf16 %v3107_v20, %v3106_v40  ;;  %v12085_v9 = vld [vmem:[#allocation9_spill] sm:$0xff]  ;;  %v12086_v5 = vld [vmem:[#allocation155_spill] sm:$0xff] }
 0x398   : > { %5018 = vmatmul.mubr.msk.bf16.gmra.mrb[4].mxu1 %vm1480_vm0, %v3193_v8  ;;  %v3113_v36 = vmax.f32 %v9610_v61, 0.0  ;;  %v3114_v2 = vmax.f32 %v12085_v9, 0.0  ;;  %v10018_v8 = vpack.c.bf16 %v3111_v62, %v3110_v17  ;;  %v3115_v23 = vmax.f32 %v12086_v5, 0.0  ;;  %v12087_v40 = vld [vmem:[#allocation13_spill] sm:$0xff]  ;;  %v12088_v20 = vld [vmem:[#allocation151_spill] sm:$0xff]  ;;  %v12091_v9 = vld [vmem:[#allocation12_spill] sm:$0xff] }
 0x399   : > { %5021 = vmatprep.mubr.msk.bf16.mxu1 %vm1480_vm0, %v9931_v46  ;;  %v10014_v52 = vpack.c.bf16 %v3109_v15, %v3108_v34  ;;  %v3116_v24 = vmax.f32 %v9622_v18, 0.0  ;;  %v3117_v0 = vmax.f32 %v9626_v50, 0.0  ;;  %v3118_v46 = vmax.f32 %v9630_v42, 0.0  ;;  %v12090_v18 = vld [vmem:[#allocation153_spill] sm:$0xff] }
 0x39a   : > { %v10023_v49 = vpack.c.bf16 %v3113_v36, %v3112_v41  ;;  %v3119_v25 = vmax.f32 %v12087_v40, 0.0  ;;  %v3120_v26 = vmax.f32 %v12088_v20, 0.0  ;;  %v10028_v34 = vpack.c.bf16 %v3115_v23, %v3114_v2 }
 0x39b   : > { %v10030_v61 = vpack.c.bf16 %v3117_v0, %v3116_v24  ;;  %v3121_v15 = vmax.f32 %v9642_v21, 0.0  ;;  %v3122_v17 = vmax.f32 %v12089_v51, 0.0  ;;  %v3123_v50 = vmax.f32 %v12090_v18, 0.0 }
 0x39c   : > { %v10034_v62 = vpack.c.bf16 %v3119_v25, %v3118_v46  ;;  %v3124_v41 = vmax.f32 %v9654_v55, 0.0  ;;  %v3125_v42 = vmax.f32 %v9658_v33, 0.0  ;;  %v3126_v5 = vmax.f32 %v12091_v9, 0.0 }
 0x39d   : > { %v10039_v36 = vpack.c.bf16 %v3121_v15, %v3120_v26  ;;  %v3127_v2 = vmax.f32 %v9666_v3, 0.0  ;;  %v3128_v23 = vmax.f32 %v9670_v16, 0.0  ;;  %v10044_v24 = vpack.c.bf16 %v3123_v50, %v3122_v17 }
 0x39e   : > { %v10046_v21 = vpack.c.bf16 %v3125_v42, %v3124_v41  ;;  %v3129_v0 = vmax.f32 %v9674_v59, 0.0  ;;  %v3130_v46 = vmax.f32 %v9678_v39, 0.0  ;;  %v3131_v33 = vmax.f32 %v9682_v37, 0.0 }
 0x39f   : > { %v10052_v55 = vpack.c.bf16 %v3127_v2, %v3126_v5  ;;  %v3132_v40 = vmax.f32 %v9686_v45, 0.0  ;;  %v3133_v3 = vmax.f32 %v9690_v53, 0.0  ;;  %v3134_v59 = vmax.f32 %v9694_v47, 0.0  ;;  %v12095_v2 = vld [vmem:[#allocation158_spill] sm:$0xff] }
 0x3a0   : > { %5022 = vmatmul.mubr.msk.bf16.gmra.mrb[8].mxu1 %vm1480_vm0, %v9936_v10  ;;  %v10059_v16 = vpack.c.bf16 %v3129_v0, %v3128_v23  ;;  %v3135_v39 = vmax.f32 %v9698_v29, 0.0  ;;  %v3136_v25 = vmax.f32 %v9702_v38, 0.0  ;;  %v10064_v10 = vpack.c.bf16 %v3131_v33, %v3130_v46  ;;  %v12096_v23 = vld [vmem:[#allocation15_spill] sm:$0xff]  ;;  %v12097_v46 = vld [vmem:[#allocation161_spill] sm:$0xff] }
 0x3a1   : > { %5025 = vmatprep.mubr.msk.bf16.mxu1 %vm1480_vm0, %v9939_v7  ;;  %v10066_v20 = vpack.c.bf16 %v3133_v3, %v3132_v40  ;;  %v3137_v37 = vmax.f32 %v9706_v30, 0.0  ;;  %v3138_v45 = vmax.f32 %v9710_v13, 0.0  ;;  %v3139_v7 = vmax.f32 %v9714_v6, 0.0  ;;  %v12092_v13 = vld [vmem:[#allocation157_spill] sm:$0xff] }
 0x3a2   : > { %v10070_v53 = vpack.c.bf16 %v3135_v39, %v3134_v59  ;;  %v3140_v26 = vmax.f32 %v9718_v44, 0.0  ;;  %v3141_v47 = vmax.f32 %v9722_v12, 0.0  ;;  %v3142_v29 = vmax.f32 %v9726_v60, 0.0  ;;  %v12098_v40 = vld [vmem:[#allocation17_spill] sm:$0xff] }
 0x3a3   : > { %v10075_v15 = vpack.c.bf16 %v3137_v37, %v3136_v25  ;;  %v3143_v38 = vmax.f32 %v9730_v35, 0.0  ;;  %v3144_v51 = vmax.f32 %v9734_v14, 0.0  ;;  %v10080_v17 = vpack.c.bf16 %v3139_v7, %v3138_v45  ;;  %v12101_v45 = vld [vmem:[#allocation163_spill] sm:$0xff] }
 0x3a4   : > { %v10082_v30 = vpack.c.bf16 %v3141_v47, %v3140_v26  ;;  %v3145_v18 = vmax.f32 %v12092_v13, 0.0  ;;  %v3146_v6 = vmax.f32 %v9742_v28, 0.0  ;;  %v3147_v44 = vmax.f32 %v9746_v32, 0.0  ;;  %v12102_v47 = vld [vmem:[#allocation167_spill] sm:$0xff]  ;;  %v12104_v13 = vld [vmem:[#allocation169_spill] sm:$0xff] }
 0x3a5   : > { %v10086_v50 = vpack.c.bf16 %v3143_v38, %v3142_v29  ;;  %v3148_v12 = vmax.f32 %v9750_v58, 0.0  ;;  %v3149_v60 = vmax.f32 %v9754_v56, 0.0  ;;  %v3150_v35 = vmax.f32 %v9758_v57, 0.0  ;;  %v12093_v58 = vld [vmem:[#allocation159_spill] sm:$0xff]  ;;  %v12094_v57 = vld [vmem:[#allocation156_spill] sm:$0xff]  ;;  %v12103_v38 = vld [vmem:[#allocation14_spill] sm:$0xff] }
 0x3a6   : > { %v10091_v41 = vpack.c.bf16 %v3145_v18, %v3144_v51  ;;  %v3151_v14 = vmax.f32 %v9762_v11, 0.0  ;;  %v3152_v42 = vmax.f32 %v9766_v1, 0.0  ;;  %v10098_v28 = vpack.c.bf16 %v3147_v44, %v3146_v6  ;;  %v12105_v44 = vld [vmem:[#allocation16_spill] sm:$0xff] }
 0x3a7   : > { %v10100_v9 = vpack.c.bf16 %v3149_v60, %v3148_v12  ;;  %v3153_v32 = vmax.f32 %v9770_v63, 0.0  ;;  %v3154_v5 = vmax.f32 %v12093_v58, 0.0  ;;  %v3155_v11 = vmax.f32 %v12094_v57, 0.0  ;;  %v12099_v63 = vld [vmem:[#allocation164_spill] sm:$0xff]  ;;  %v12106_v60 = vld [vmem:[#allocation165_spill] sm:$0xff] }
 0x3a8   : > { %5026 = vmatmul.mubr.msk.bf16.gmra.mrb[12].mxu1 %vm1480_vm0, %v9944_v48  ;;  %v10106_v56 = vpack.c.bf16 %v3151_v14, %v3150_v35  ;;  %v3156_v1 = vmax.f32 %v12095_v2, 0.0  ;;  %v3157_v0 = vmax.f32 %v12096_v23, 0.0  ;;  %v3158_v33 = vmax.f32 %v12097_v46, 0.0  ;;  %v12107_v14 = vld [vmem:[#allocation168_spill] sm:$0xff]  ;;  %v12110_v23 = vld [vmem:[#allocation21_spill] sm:$0xff] }
 0x3a9   : > { %5029 = vmatprep.mubr.msk.bf16.mxu1 %vm1480_vm0, %v9948_v27  ;;  %v10111_v48 = vpack.c.bf16 %v3153_v32, %v3152_v42  ;;  %v3159_v3 = vmax.f32 %v12098_v40, 0.0  ;;  %v3160_v59 = vmax.f32 %v12099_v63, 0.0  ;;  %v10116_v39 = vpack.c.bf16 %v3155_v11, %v3154_v5  ;;  %v12100_v27 = vld [vmem:[#allocation160_spill] sm:$0xff]  ;;  %v12108_v5 = vld [vmem:[#allocation19_spill] sm:$0xff]  ;;  %v12111_v46 = vld [vmem:[#allocation173_spill] sm:$0xff] }
 0x3aa   : > { %v10118_v25 = vpack.c.bf16 %v3157_v0, %v3156_v1  ;;  %v3161_v37 = vmax.f32 %v12100_v27, 0.0  ;;  %v3162_v7 = vmax.f32 %v12101_v45, 0.0  ;;  %v3163_v29 = vmax.f32 %v12102_v47, 0.0  ;;  %v12109_v11 = vld [vmem:[#allocation171_spill] sm:$0xff]  ;;  %v12112_v40 = vld [vmem:[#allocation170_spill] sm:$0xff]  ;;  %v12113_v63 = vld [vmem:[#allocation188_spill] sm:$0xff] }
 0x3ab   : > { %v10122_v26 = vpack.c.bf16 %v3159_v3, %v3158_v33  ;;  %v3164_v51 = vmax.f32 %v12103_v38, 0.0  ;;  %v3165_v18 = vmax.f32 %v12104_v13, 0.0  ;;  %v3166_v12 = vmax.f32 %v12105_v44, 0.0  ;;  %v12114_v27 = vld [vmem:[#allocation172_spill] sm:$0xff]  ;;  %v12115_v45 = vld [vmem:[#allocation18_spill] sm:$0xff]  ;;  %v12116_v47 = vld [vmem:[#allocation175_spill] sm:$0xff] }
 0x3ac   : > { %v10127_v6 = vpack.c.bf16 %v3161_v37, %v3160_v59  ;;  %v3167_v35 = vmax.f32 %v12106_v60, 0.0  ;;  %v3168_v42 = vmax.f32 %v12107_v14, 0.0  ;;  %v10132_v32 = vpack.c.bf16 %v3163_v29, %v3162_v7  ;;  %v12117_v38 = vld [vmem:[#allocation185_spill] sm:$0xff]  ;;  %v12120_v14 = vld [vmem:[#allocation176_spill] sm:$0xff] }
 0x3ad   : > { %v10134_v58 = vpack.c.bf16 %v3165_v18, %v3164_v51  ;;  %v3169_v57 = vmax.f32 %v12108_v5, 0.0  ;;  %v3170_v2 = vmax.f32 %v12109_v11, 0.0  ;;  %v3171_v0 = vmax.f32 %v12110_v23, 0.0  ;;  %v12118_v18 = vld [vmem:[#allocation177_spill] sm:$0xff]  ;;  %v12121_v5 = vld [vmem:[#allocation179_spill] sm:$0xff] }
 0x3ae   : > { %v10138_v1 = vpack.c.bf16 %v3167_v35, %v3166_v12  ;;  %v3172_v33 = vmax.f32 %v12111_v46, 0.0  ;;  %v3173_v3 = vmax.f32 %v12112_v40, 0.0  ;;  %v3174_v37 = vmax.f32 %v12114_v27, 0.0  ;;  %v12119_v12 = vld [vmem:[#allocation174_spill] sm:$0xff]  ;;  %v12122_v11 = vld [vmem:[#allocation181_spill] sm:$0xff] }
 0x3af   : > { %v10145_v59 = vpack.c.bf16 %v3169_v57, %v3168_v42  ;;  %v3175_v7 = vmax.f32 %v12115_v45, 0.0  ;;  %v3176_v29 = vmax.f32 %v12116_v47, 0.0  ;;  %v10152_v51 = vpack.c.bf16 %v3171_v0, %v3170_v2  ;;  %v12123_v40 = vld [vmem:[#allocation178_spill] sm:$0xff]  ;;  %v12124_v2 = vld [vmem:[#allocation180_spill] sm:$0xff] }
 0x3b0   : > { %5030 = vmatmul.mubr.msk.bf16.gmra.mrb[16].mxu1 %vm1480_vm0, %v12113_v63  ;;  %v10154_v13 = vpack.c.bf16 %v3173_v3, %v3172_v33  ;;  %v3177_v44 = vmax.f32 %v12118_v18, 0.0  ;;  %v3178_v60 = vmax.f32 %v12119_v12, 0.0  ;;  %v3179_v42 = vmax.f32 %v12120_v14, 0.0  ;;  %v12125_v33 = vld [vmem:[#allocation79_spill] sm:$0xff]  ;;  %v12127_v47 = vld [vmem:[#allocation182_spill] sm:$0xff] }
 0x3b1   : > { %5033 = vmatprep.mubr.msk.bf16.mxu1 %vm1480_vm0, %v12117_v38  ;;  %v10158_v35 = vpack.c.bf16 %v3175_v7, %v3174_v37  ;;  %v3180_v57 = vmax.f32 %v12121_v5, 0.0  ;;  %v3181_v23 = vmax.f32 %v12122_v11, 0.0  ;;  %v3182_v63 = vmax.f32 %v12123_v40, 0.0  ;;  %v12126_v37 = vld [vmem:[#allocation184_spill] sm:$0xff]  ;;  %v12128_v12 = vld [vmem:[#allocation183_spill] sm:$0xff]  ;;  %v12130_v11 = vld [vmem:[#allocation6_spill] sm:$0xff] }
 0x3b2   : > { %v10163_v46 = vpack.c.bf16 %v3177_v44, %v3176_v29  ;;  %v3183_v0 = vmax.f32 %v12124_v2, 0.0  ;;  %v3184_v3 = vmax.f32 %v12125_v33, 0.0  ;;  %v10168_v27 = vpack.c.bf16 %v3179_v42, %v3178_v60  ;;  %v12129_v29 = vld [vmem:[#allocation186_spill] sm:$0xff]  ;;  %v12132_v42 = vld [vmem:[#allocation187_spill] sm:$0xff] }
 0x3b3   : > { %v10170_v45 = vpack.c.bf16 %v3181_v23, %v3180_v57  ;;  %v3185_v7 = vmax.f32 %v12126_v37, 0.0  ;;  %v3186_v38 = vmax.f32 %v12127_v47, 0.0  ;;  %v3188_v14 = vmax.f32 %v12128_v12, 0.0  ;;  %v12133_v57 = vld [vmem:[#allocation190_spill] sm:$0xff]  ;;  %v12134_v23 = vld [vmem:[#allocation89_spill] sm:$0xff]  ;;  %v12137_v33 = vld [vmem:[#allocation191_spill] sm:$0xff] }
 0x3b4   : > { %v10174_v18 = vpack.c.bf16 %v3183_v0, %v3182_v63  ;;  %v3189_v44 = vmax.f32 %v12129_v29, 0.0  ;;  %v12131_v40 = vmax.f32 %v12130_v11, 0.0  ;;  %v12135_v63 = vld [vmem:[#allocation189_spill] sm:$0xff]  ;;  %v12136_v0 = vld [vmem:[#allocation20_spill] sm:$0xff] }
 0x3b5   : > { %v10178_v5 = vpack.c.bf16 %v3185_v7, %v3184_v3 }
 0x3b6   : > { %v10182_v2 = vpack.c.bf16 %v12131_v40, %v3186_v38  ;;  %v10184_v60 = vpack.c.bf16 %v3189_v44, %v3188_v14 }
 0x3b8   : > { %5034 = vmatmul.mubr.msk.bf16.gmra.mrb[20].mxu1 %vm1480_vm0, %v12132_v42 }
 0x3b9   : > { %5037 = vmatprep.mubr.msk.bf16.mxu1 %vm1480_vm0, %v12133_v57 }
 0x3c0   : > { %5038 = vmatmul.mubr.msk.bf16.gmra.mrb[24].mxu1 %vm1480_vm0, %v12134_v23 }
 0x3c1   : > { %5041 = vmatprep.mubr.msk.bf16.mxu1 %vm1480_vm0, %v9977_v4  ;;  %v5270_v4 = vmov 0.0|0.0  }
 0x3c2   : > { %5160 = vmatprep.subr.bf16.mxu1 %v5270_v4 }
 0x3c8   : > { %5042 = vmatmul.mubr.msk.bf16.gmra.mrb[28].mxu1 %vm1480_vm0, %v12135_v63 }
 0x3c9   : > { %5045 = vmatprep.mubr.msk.bf16.mxu1 %vm1480_vm0, %v12136_v0 }
 0x3d0   : > { %5046 = vmatmul.mubr.msk.bf16.gmra.mrb[32].mxu1 %vm1480_vm0, %v12137_v33 }
 0x3d1   : > { %5049 = vmatprep.mubr.msk.bf16.mxu1 %vm1480_vm0, %v9993_v19  ;;  %v4423_v19 = vld [vmem:[%s10476_s9 + $0x8] sm:$0xff] }
 0x3d8   : > { %5050 = vmatmul.mubr.msk.bf16.gmra.mrb[36].mxu1 %vm1480_vm0, %v9995_v43 }
 0x3d9   : > { %5053 = vmatprep.mubr.msk.bf16.mxu1 %vm1480_vm0, %v9999_v22  ;;  %v4422_v22 = vld [vmem:[%s10476_s9] sm:$0xff] }
 0x3da   : > { %v5161_v43 = vpack.c.bf16 %v4423_v19, %v4422_v22 }
 0x3dc   : > { %5162 = vmatpush3.bf16.msra.mxu1 %v5161_v43 }
 0x3dd   : > { %5163 = vmatprep.subr.bf16.mxu1 %v5270_v4 }
 0x3e0   : > { %5054 = vmatmul.mubr.msk.bf16.gmra.mrb[40].mxu1 %vm1480_vm0, %v10005_v31  ;;  %v4424_v31 = vld [vmem:[%s10476_s9 + $0x10] sm:$0xff] }
 0x3e1   : > { %5057 = vmatprep.mubr.msk.bf16.mxu1 %vm1480_vm0, %v10012_v54  ;;  %v4425_v54 = vld [vmem:[%s10476_s9 + $0x18] sm:$0xff] }
 0x3e8   : > { %5058 = vmatmul.mubr.msk.bf16.gmra.mrb[44].mxu1 %vm1480_vm0, %v10014_v52  ;;  %v5164_v52 = vpack.c.bf16 %v4425_v54, %v4424_v31 }
 0x3e9   : > { %5061 = vmatprep.mubr.msk.bf16.mxu1 %vm1480_vm0, %v10018_v8 }
 0x3ea   : > { %5165 = vmatpush3.bf16.msra.mxu1 %v5164_v52 }
 0x3eb   : > { %5166 = vmatprep.subr.bf16.mxu1 %v5270_v4 }
 0x3f0   : > { %5062 = vmatmul.mubr.msk.bf16.gmra.mrb[48].mxu1 %vm1480_vm0, %v10023_v49 }
 0x3f1   : > { %5065 = vmatprep.mubr.msk.bf16.mxu1 %vm1480_vm0, %v10028_v34 }
 0x3f8   : > { %5066 = vmatmul.mubr.msk.bf16.gmra.mrb[52].mxu1 %vm1480_vm0, %v10030_v61 }
 0x3f9   : > { %5069 = vmatprep.mubr.msk.bf16.mxu1 %vm1480_vm0, %v10034_v62 }
 0x400   : > { %5070 = vmatmul.mubr.msk.bf16.gmra.mrb[56].mxu1 %vm1480_vm0, %v10039_v36 }
 0x401   : > { %5073 = vmatprep.mubr.msk.bf16.mxu1 %vm1480_vm0, %v10044_v24 }
 0x408   : > { %5074 = vmatmul.mubr.msk.bf16.gmra.mrb[60].mxu1 %vm1480_vm0, %v10046_v21 }
 0x409   : > { %5077 = vmatprep.mubr.msk.bf16.mxu1 %vm1480_vm0, %v10052_v55 }
 0x410   : > { %5078 = vmatmul.mubr.msk.bf16.gmra.mrb[64].mxu1 %vm1480_vm0, %v10059_v16 }
 0x411   : > { %5081 = vmatprep.mubr.msk.bf16.mxu1 %vm1480_vm0, %v10064_v10 }
 0x418   : > { %5082 = vmatmul.mubr.msk.bf16.gmra.mrb[68].mxu1 %vm1480_vm0, %v10066_v20 }
 0x419   : > { %5085 = vmatprep.mubr.msk.bf16.mxu1 %vm1480_vm0, %v10070_v53 }
 0x420   : > { %5086 = vmatmul.mubr.msk.bf16.gmra.mrb[72].mxu1 %vm1480_vm0, %v10075_v15 }
 0x421   : > { %5089 = vmatprep.mubr.msk.bf16.mxu1 %vm1480_vm0, %v10080_v17 }
 0x428   : > { %5090 = vmatmul.mubr.msk.bf16.gmra.mrb[76].mxu1 %vm1480_vm0, %v10082_v30 }
 0x429   : > { %5093 = vmatprep.mubr.msk.bf16.mxu1 %vm1480_vm0, %v10086_v50 }
 0x430   : > { %5094 = vmatmul.mubr.msk.bf16.gmra.mrb[80].mxu1 %vm1480_vm0, %v10091_v41 }
 0x431   : > { %5097 = vmatprep.mubr.msk.bf16.mxu1 %vm1480_vm0, %v10098_v28 }
 0x438   : > { %5098 = vmatmul.mubr.msk.bf16.gmra.mrb[84].mxu1 %vm1480_vm0, %v10100_v9 }
 0x439   : > { %5101 = vmatprep.mubr.msk.bf16.mxu1 %vm1480_vm0, %v10106_v56 }
 0x440   : > { %5102 = vmatmul.mubr.msk.bf16.gmra.mrb[88].mxu1 %vm1480_vm0, %v10111_v48 }
 0x441   : > { %5105 = vmatprep.mubr.msk.bf16.mxu1 %vm1480_vm0, %v10116_v39 }
 0x448   : > { %5106 = vmatmul.mubr.msk.bf16.gmra.mrb[92].mxu1 %vm1480_vm0, %v10118_v25 }
 0x449   : > { %5109 = vmatprep.mubr.msk.bf16.mxu1 %vm1480_vm0, %v10122_v26 }
 0x450   : > { %5110 = vmatmul.mubr.msk.bf16.gmra.mrb[96].mxu1 %vm1480_vm0, %v10127_v6 }
 0x451   : > { %5113 = vmatprep.mubr.msk.bf16.mxu1 %vm1480_vm0, %v10132_v32 }
 0x458   : > { %5114 = vmatmul.mubr.msk.bf16.gmra.mrb[100].mxu1 %vm1480_vm0, %v10134_v58 }
 0x459   : > { %5117 = vmatprep.mubr.msk.bf16.mxu1 %vm1480_vm0, %v10138_v1 }
 0x460   : > { %5118 = vmatmul.mubr.msk.bf16.gmra.mrb[104].mxu1 %vm1480_vm0, %v10145_v59 }
 0x461   : > { %5121 = vmatprep.mubr.msk.bf16.mxu1 %vm1480_vm0, %v10152_v51 }
 0x463   : > { %v5015_v8 = vpop.f32.mrb[0].mxu1 }
 0x464   : > { %v3496_v49 = vpop.f32.mrb[1].mxu1  ;;  %v4009_v36 = vmax.f32 %v5015_v8, 0.0 }
 0x465   : > { %v4007_v34 = vmax.f32 %v3496_v49, 0.0  ;;  %v5016_v61 = vpop.f32.mrb[2].mxu1 }
 0x466   : > { %v3499_v62 = vpop.f32.mrb[3].mxu1  ;;  %v4010_v55 = vmax.f32 %v5016_v61, 0.0  ;;  %v4139_v20 = vsel %vm4135_vm1, %v4009_v36, 0.0 }
 0x467   : > { %v4008_v24 = vmax.f32 %v3499_v62, 0.0  ;;  %v4136_v21 = vsel %vm4135_vm1, %v4007_v34, 0.0 }
 0x468   : > { %5122 = vmatmul.mubr.msk.bf16.gmra.mrb[108].mxu1 %vm1480_vm0, %v10154_v13  ;;  %v4141_v30 = vsel %vm4135_vm1, %v4010_v55, 0.0 }
 0x469   : > { %v4137_v16 = vsel %vm4135_vm1, %v4008_v24, 0.0  ;;  %5125 = vmatprep.mubr.msk.bf16.mxu1 %vm1480_vm0, %v10158_v35 }
 0x46a   : > { %v4138_v10 = vadd.f32 %v4137_v16, %v4136_v21 }
 0x46b   : > { %v5019_v53 = vpop.f32.mrb[4].mxu1 }
 0x46c   : > { %v4140_v15 = vadd.f32 %v4139_v20, %v4138_v10  ;;  %v3512_v17 = vpop.f32.mrb[5].mxu1  ;;  %v4013_v56 = vmax.f32 %v5019_v53, 0.0 }
 0x46d   : > { %v4011_v50 = vmax.f32 %v3512_v17, 0.0  ;;  %v5020_v41 = vpop.f32.mrb[6].mxu1 }
 0x46e   : > { %v4142_v28 = vadd.f32 %v4141_v30, %v4140_v15  ;;  %v3515_v9 = vpop.f32.mrb[7].mxu1  ;;  %v4014_v26 = vmax.f32 %v5020_v41, 0.0  ;;  %v4147_v58 = vsel %vm4135_vm1, %v4013_v56, 0.0 }
 0x46f   : > { %v4143_v48 = vsel %vm4135_vm1, %v4011_v50, 0.0  ;;  %v4012_v39 = vmax.f32 %v3515_v9, 0.0 }
 0x470   : > { %v4144_v25 = vadd.f32 %v4143_v48, %v4142_v28  ;;  %5126 = vmatmul.mubr.msk.bf16.gmra.mrb[112].mxu1 %vm1480_vm0, %v10163_v46  ;;  %v4149_v13 = vsel %vm4135_vm1, %v4014_v26, 0.0 }
 0x471   : > { %v4145_v6 = vsel %vm4135_vm1, %v4012_v39, 0.0  ;;  %5129 = vmatprep.mubr.msk.bf16.mxu1 %vm1480_vm0, %v10168_v27 }
 0x472   : > { %v4146_v32 = vadd.f32 %v4145_v6, %v4144_v25 }
 0x473   : > { %v5023_v1 = vpop.f32.mrb[8].mxu1 }
 0x474   : > { %v4148_v59 = vadd.f32 %v4147_v58, %v4146_v32  ;;  %v3528_v51 = vpop.f32.mrb[9].mxu1  ;;  %v4017_v47 = vmax.f32 %v5023_v1, 0.0 }
 0x475   : > { %v4015_v35 = vmax.f32 %v3528_v51, 0.0  ;;  %v5024_v3 = vpop.f32.mrb[10].mxu1 }
 0x476   : > { %v4150_v37 = vadd.f32 %v4149_v13, %v4148_v59  ;;  %v3531_v7 = vpop.f32.mrb[11].mxu1  ;;  %v4018_v27 = vmax.f32 %v5024_v3, 0.0  ;;  %v4155_v44 = vsel %vm4135_vm1, %v4017_v47, 0.0 }
 0x477   : > { %v4151_v46 = vsel %vm4135_vm1, %v4015_v35, 0.0  ;;  %v4016_v38 = vmax.f32 %v3531_v7, 0.0 }
 0x478   : > { %v4152_v12 = vadd.f32 %v4151_v46, %v4150_v37  ;;  %5130 = vmatmul.mubr.msk.bf16.gmra.mrb[116].mxu1 %vm1480_vm0, %v10170_v45  ;;  %v4157_v57 = vsel %vm4135_vm1, %v4018_v27, 0.0  ;;  %v4426_v45 = vld [vmem:[%s10476_s9 + $0x20] sm:$0xff] }
 0x479   : > { %v4153_v14 = vsel %vm4135_vm1, %v4016_v38, 0.0  ;;  %5133 = vmatprep.mubr.msk.bf16.mxu1 %vm1480_vm0, %v10174_v18  ;;  %v4427_v18 = vld [vmem:[%s10476_s9 + $0x28] sm:$0xff] }
 0x47a   : > { %v4154_v29 = vadd.f32 %v4153_v14, %v4152_v12  ;;  %v5167_v31 = vpack.c.bf16 %v4427_v18, %v4426_v45 }
 0x47b   : > { %v5027_v11 = vpop.f32.mrb[12].mxu1 }
 0x47c   : > { %v4156_v40 = vadd.f32 %v4155_v44, %v4154_v29  ;;  %v3544_v42 = vpop.f32.mrb[13].mxu1  ;;  %v4021_v22 = vmax.f32 %v5027_v11, 0.0  ;;  %5168 = vmatpush3.bf16.msra.mxu1 %v5167_v31 }
 0x47d   : > { %v4019_v23 = vmax.f32 %v3544_v42, 0.0  ;;  %v5028_v63 = vpop.f32.mrb[14].mxu1  ;;  %5169 = vmatprep.subr.bf16.mxu1 %v5270_v4 }
 0x47e   : > { %v4158_v0 = vadd.f32 %v4157_v57, %v4156_v40  ;;  %v3547_v33 = vpop.f32.mrb[15].mxu1  ;;  %v4022_v52 = vmax.f32 %v5028_v63, 0.0  ;;  %v4163_v34 = vsel %vm4135_vm1, %v4021_v22, 0.0 }
 0x47f   : > { %v4159_v19 = vsel %vm4135_vm1, %v4019_v23, 0.0  ;;  %v4020_v43 = vmax.f32 %v3547_v33, 0.0 }
 0x480   : > { %v4160_v54 = vadd.f32 %v4159_v19, %v4158_v0  ;;  %5134 = vmatmul.mubr.msk.bf16.gmra.mrb[120].mxu1 %vm1480_vm0, %v10178_v5  ;;  %v4165_v24 = vsel %vm4135_vm1, %v4022_v52, 0.0 }
 0x481   : > { %v4161_v8 = vsel %vm4135_vm1, %v4020_v43, 0.0  ;;  %5137 = vmatprep.mubr.msk.bf16.mxu1 %vm1480_vm0, %v10182_v2 }
 0x482   : > { %v4162_v49 = vadd.f32 %v4161_v8, %v4160_v54 }
 0x483   : > { %v5031_v61 = vpop.f32.mrb[16].mxu1 }
 0x484   : > { %v4164_v62 = vadd.f32 %v4163_v34, %v4162_v49  ;;  %v3560_v36 = vpop.f32.mrb[17].mxu1  ;;  %v4025_v10 = vmax.f32 %v5031_v61, 0.0 }
 0x485   : > { %v4023_v21 = vmax.f32 %v3560_v36, 0.0  ;;  %v5032_v55 = vpop.f32.mrb[18].mxu1 }
 0x486   : > { %v4166_v5 = vadd.f32 %v4165_v24, %v4164_v62  ;;  %v3563_v16 = vpop.f32.mrb[19].mxu1  ;;  %v4026_v4 = vmax.f32 %v5032_v55, 0.0  ;;  %v4171_v30 = vsel %vm4135_vm1, %v4025_v10, 0.0 }
 0x487   : > { %v4167_v20 = vsel %vm4135_vm1, %v4023_v21, 0.0  ;;  %v4024_v53 = vmax.f32 %v3563_v16, 0.0 }
 0x488   : > { %v4168_v2 = vadd.f32 %v4167_v20, %v4166_v5  ;;  %5138 = vmatmul.mubr.msk.bf16.gmra.mrb[124].mxu1 %vm1480_vm0, %v10184_v60  ;;  %v4173_v9 = vsel %vm4135_vm1, %v4026_v4, 0.0 }
 0x489   : > { %v4169_v15 = vsel %vm4135_vm1, %v4024_v53, 0.0 }
 0x48a   : > { %v4170_v17 = vadd.f32 %v4169_v15, %v4168_v2 }
 0x48b   : > { %v5035_v50 = vpop.f32.mrb[20].mxu1 }
 0x48c   : > { %v4172_v41 = vadd.f32 %v4171_v30, %v4170_v17  ;;  %v3576_v28 = vpop.f32.mrb[21].mxu1  ;;  %v4029_v26 = vmax.f32 %v5035_v50, 0.0 }
 0x48d   : > { %v4027_v56 = vmax.f32 %v3576_v28, 0.0  ;;  %v5036_v48 = vpop.f32.mrb[22].mxu1 }
 0x48e   : > { %v4174_v39 = vadd.f32 %v4173_v9, %v4172_v41  ;;  %v3579_v25 = vpop.f32.mrb[23].mxu1  ;;  %v4030_v58 = vmax.f32 %v5036_v48, 0.0  ;;  %v4179_v51 = vsel %vm4135_vm1, %v4029_v26, 0.0 }
 0x48f   : > { %v4175_v6 = vsel %vm4135_vm1, %v4027_v56, 0.0  ;;  %v4028_v32 = vmax.f32 %v3579_v25, 0.0 }
 0x490   : > { %v4176_v60 = vadd.f32 %v4175_v6, %v4174_v39  ;;  %v4181_v37 = vsel %vm4135_vm1, %v4030_v58, 0.0 }
 0x491   : > { %v4177_v1 = vsel %vm4135_vm1, %v4028_v32, 0.0 }
 0x492   : > { %v4178_v59 = vadd.f32 %v4177_v1, %v4176_v60 }
 0x493   : > { %v5039_v13 = vpop.f32.mrb[24].mxu1 }
 0x494   : > { %v4180_v35 = vadd.f32 %v4179_v51, %v4178_v59  ;;  %v3592_v3 = vpop.f32.mrb[25].mxu1  ;;  %v4033_v12 = vmax.f32 %v5039_v13, 0.0 }
 0x495   : > { %v4031_v7 = vmax.f32 %v3592_v3, 0.0  ;;  %v5040_v47 = vpop.f32.mrb[26].mxu1 }
 0x496   : > { %v4182_v46 = vadd.f32 %v4181_v37, %v4180_v35  ;;  %v3595_v38 = vpop.f32.mrb[27].mxu1  ;;  %v4034_v44 = vmax.f32 %v5040_v47, 0.0  ;;  %v4187_v42 = vsel %vm4135_vm1, %v4033_v12, 0.0 }
 0x497   : > { %v4183_v27 = vsel %vm4135_vm1, %v4031_v7, 0.0  ;;  %v4032_v14 = vmax.f32 %v3595_v38, 0.0 }
 0x498   : > { %v4184_v29 = vadd.f32 %v4183_v27, %v4182_v46  ;;  %v4189_v0 = vsel %vm4135_vm1, %v4034_v44, 0.0 }
 0x499   : > { %v4185_v11 = vsel %vm4135_vm1, %v4032_v14, 0.0 }
 0x49a   : > { %v4186_v40 = vadd.f32 %v4185_v11, %v4184_v29 }
 0x49b   : > { %v5043_v57 = vpop.f32.mrb[28].mxu1 }
 0x49c   : > { %v4188_v23 = vadd.f32 %v4187_v42, %v4186_v40  ;;  %v3608_v63 = vpop.f32.mrb[29].mxu1  ;;  %v4037_v19 = vmax.f32 %v5043_v57, 0.0 }
 0x49d   : > { %v4035_v33 = vmax.f32 %v3608_v63, 0.0  ;;  %v5044_v45 = vpop.f32.mrb[30].mxu1 }
 0x49e   : > { %v4190_v18 = vadd.f32 %v4189_v0, %v4188_v23  ;;  %v3611_v22 = vpop.f32.mrb[31].mxu1  ;;  %v4038_v52 = vmax.f32 %v5044_v45, 0.0  ;;  %v4195_v34 = vsel %vm4135_vm1, %v4037_v19, 0.0  ;;  %v4428_v19 = vld [vmem:[%s10476_s9 + $0x30] sm:$0xff] }
 0x49f   : > { %v4191_v43 = vsel %vm4135_vm1, %v4035_v33, 0.0  ;;  %v4036_v31 = vmax.f32 %v3611_v22, 0.0 }
 0x4a0   : > { %v4192_v54 = vadd.f32 %v4191_v43, %v4190_v18  ;;  %v4197_v24 = vsel %vm4135_vm1, %v4038_v52, 0.0  ;;  %v4429_v43 = vld [vmem:[%s10476_s9 + $0x38] sm:$0xff] }
 0x4a1   : > { %v4193_v8 = vsel %vm4135_vm1, %v4036_v31, 0.0 }
 0x4a2   : > { %v4194_v49 = vadd.f32 %v4193_v8, %v4192_v54  ;;  %v5170_v8 = vpack.c.bf16 %v4429_v43, %v4428_v19 }
 0x4a3   : > { %v5047_v61 = vpop.f32.mrb[32].mxu1 }
 0x4a4   : > { %v4196_v62 = vadd.f32 %v4195_v34, %v4194_v49  ;;  %v3624_v36 = vpop.f32.mrb[33].mxu1  ;;  %v4041_v10 = vmax.f32 %v5047_v61, 0.0  ;;  %5171 = vmatpush3.bf16.msra.mxu1 %v5170_v8 }
 0x4a5   : > { %v4039_v21 = vmax.f32 %v3624_v36, 0.0  ;;  %v5048_v55 = vpop.f32.mrb[34].mxu1 }
 0x4a6   : > { %v4198_v5 = vadd.f32 %v4197_v24, %v4196_v62  ;;  %v3627_v16 = vpop.f32.mrb[35].mxu1  ;;  %v4042_v4 = vmax.f32 %v5048_v55, 0.0  ;;  %v4203_v30 = vsel %vm4135_vm1, %v4041_v10, 0.0 }
 0x4a7   : > { %v4199_v20 = vsel %vm4135_vm1, %v4039_v21, 0.0  ;;  %v4040_v53 = vmax.f32 %v3627_v16, 0.0 }
 0x4a8   : > { %v4200_v2 = vadd.f32 %v4199_v20, %v4198_v5  ;;  %v4205_v9 = vsel %vm4135_vm1, %v4042_v4, 0.0 }
 0x4a9   : > { %v4201_v15 = vsel %vm4135_vm1, %v4040_v53, 0.0 }
 0x4aa   : > { %v4202_v17 = vadd.f32 %v4201_v15, %v4200_v2 }
 0x4ab   : > { %v5051_v50 = vpop.f32.mrb[36].mxu1 }
 0x4ac   : > { %v4204_v41 = vadd.f32 %v4203_v30, %v4202_v17  ;;  %v3640_v28 = vpop.f32.mrb[37].mxu1  ;;  %v4045_v26 = vmax.f32 %v5051_v50, 0.0 }
 0x4ad   : > { %v4043_v56 = vmax.f32 %v3640_v28, 0.0  ;;  %v5052_v48 = vpop.f32.mrb[38].mxu1 }
 0x4ae   : > { %v4206_v39 = vadd.f32 %v4205_v9, %v4204_v41  ;;  %v3643_v25 = vpop.f32.mrb[39].mxu1  ;;  %v4046_v58 = vmax.f32 %v5052_v48, 0.0  ;;  %v4211_v51 = vsel %vm4135_vm1, %v4045_v26, 0.0 }
 0x4af   : > { %v4207_v6 = vsel %vm4135_vm1, %v4043_v56, 0.0  ;;  %v4044_v32 = vmax.f32 %v3643_v25, 0.0 }
 0x4b0   : > { %v4208_v60 = vadd.f32 %v4207_v6, %v4206_v39  ;;  %v4213_v37 = vsel %vm4135_vm1, %v4046_v58, 0.0 }
 0x4b1   : > { %v4209_v1 = vsel %vm4135_vm1, %v4044_v32, 0.0 }
 0x4b2   : > { %v4210_v59 = vadd.f32 %v4209_v1, %v4208_v60 }
 0x4b3   : > { %v5055_v13 = vpop.f32.mrb[40].mxu1 }
 0x4b4   : > { %v4212_v35 = vadd.f32 %v4211_v51, %v4210_v59  ;;  %v3656_v3 = vpop.f32.mrb[41].mxu1  ;;  %v4049_v12 = vmax.f32 %v5055_v13, 0.0 }
 0x4b5   : > { %v4047_v7 = vmax.f32 %v3656_v3, 0.0  ;;  %v5056_v47 = vpop.f32.mrb[42].mxu1 }
 0x4b6   : > { %v4214_v46 = vadd.f32 %v4213_v37, %v4212_v35  ;;  %v3659_v38 = vpop.f32.mrb[43].mxu1  ;;  %v4050_v44 = vmax.f32 %v5056_v47, 0.0  ;;  %v4219_v42 = vsel %vm4135_vm1, %v4049_v12, 0.0 }
 0x4b7   : > { %v4215_v27 = vsel %vm4135_vm1, %v4047_v7, 0.0  ;;  %v4048_v14 = vmax.f32 %v3659_v38, 0.0 }
 0x4b8   : > { %v4216_v29 = vadd.f32 %v4215_v27, %v4214_v46  ;;  %v4221_v0 = vsel %vm4135_vm1, %v4050_v44, 0.0 }
 0x4b9   : > { %v4217_v11 = vsel %vm4135_vm1, %v4048_v14, 0.0 }
 0x4ba   : > { %v4218_v40 = vadd.f32 %v4217_v11, %v4216_v29 }
 0x4bb   : > { %v5059_v57 = vpop.f32.mrb[44].mxu1 }
 0x4bc   : > { %v4220_v23 = vadd.f32 %v4219_v42, %v4218_v40  ;;  %v3672_v63 = vpop.f32.mrb[45].mxu1  ;;  %v4053_v31 = vmax.f32 %v5059_v57, 0.0 }
 0x4bd   : > { %v4051_v33 = vmax.f32 %v3672_v63, 0.0  ;;  %v5060_v45 = vpop.f32.mrb[46].mxu1 }
 0x4be   : > { %v4222_v18 = vadd.f32 %v4221_v0, %v4220_v23  ;;  %v3675_v22 = vpop.f32.mrb[47].mxu1  ;;  %v4054_v34 = vmax.f32 %v5060_v45, 0.0  ;;  %v4227_v36 = vsel %vm4135_vm1, %v4053_v31, 0.0 }
 0x4bf   : > { %v4223_v54 = vsel %vm4135_vm1, %v4051_v33, 0.0  ;;  %v4052_v52 = vmax.f32 %v3675_v22, 0.0 }
 0x4c0   : > { %v4224_v49 = vadd.f32 %v4223_v54, %v4222_v18  ;;  %v4229_v5 = vsel %vm4135_vm1, %v4054_v34, 0.0 }
 0x4c1   : > { %v4225_v61 = vsel %vm4135_vm1, %v4052_v52, 0.0 }
 0x4c2   : > { %v4226_v62 = vadd.f32 %v4225_v61, %v4224_v49 }
 0x4c3   : > { %v5063_v24 = vpop.f32.mrb[48].mxu1 }
 0x4c4   : > { %v4228_v21 = vadd.f32 %v4227_v36, %v4226_v62  ;;  %v3688_v55 = vpop.f32.mrb[49].mxu1  ;;  %v4057_v2 = vmax.f32 %v5063_v24, 0.0 }
 0x4c5   : > { %v4055_v16 = vmax.f32 %v3688_v55, 0.0  ;;  %v5064_v10 = vpop.f32.mrb[50].mxu1 }
 0x4c6   : > { %v4230_v20 = vadd.f32 %v4229_v5, %v4228_v21  ;;  %v3691_v53 = vpop.f32.mrb[51].mxu1  ;;  %v4058_v30 = vmax.f32 %v5064_v10, 0.0  ;;  %v4235_v28 = vsel %vm4135_vm1, %v4057_v2, 0.0 }
 0x4c7   : > { %v4231_v4 = vsel %vm4135_vm1, %v4055_v16, 0.0  ;;  %v4056_v15 = vmax.f32 %v3691_v53, 0.0 }
 0x4c8   : > { %v4232_v17 = vadd.f32 %v4231_v4, %v4230_v20  ;;  %v4237_v39 = vsel %vm4135_vm1, %v4058_v30, 0.0 }
 0x4c9   : > { %v4233_v50 = vsel %vm4135_vm1, %v4056_v15, 0.0 }
 0x4ca   : > { %v4234_v41 = vadd.f32 %v4233_v50, %v4232_v17 }
 0x4cb   : > { %v5067_v9 = vpop.f32.mrb[52].mxu1 }
 0x4cc   : > { %v4236_v56 = vadd.f32 %v4235_v28, %v4234_v41  ;;  %v3704_v48 = vpop.f32.mrb[53].mxu1  ;;  %v4061_v60 = vmax.f32 %v5067_v9, 0.0 }
 0x4cd   : > { %v4059_v25 = vmax.f32 %v3704_v48, 0.0  ;;  %v5068_v26 = vpop.f32.mrb[54].mxu1 }
 0x4ce   : > { %v4238_v6 = vadd.f32 %v4237_v39, %v4236_v56  ;;  %v3707_v32 = vpop.f32.mrb[55].mxu1  ;;  %v4062_v51 = vmax.f32 %v5068_v26, 0.0  ;;  %v4243_v3 = vsel %vm4135_vm1, %v4061_v60, 0.0 }
 0x4cf   : > { %v4239_v58 = vsel %vm4135_vm1, %v4059_v25, 0.0  ;;  %v4060_v1 = vmax.f32 %v3707_v32, 0.0 }
 0x4d0   : > { %v4240_v59 = vadd.f32 %v4239_v58, %v4238_v6  ;;  %v4245_v46 = vsel %vm4135_vm1, %v4062_v51, 0.0 }
 0x4d1   : > { %v4241_v13 = vsel %vm4135_vm1, %v4060_v1, 0.0 }
 0x4d2   : > { %v4242_v35 = vadd.f32 %v4241_v13, %v4240_v59 }
 0x4d3   : > { %v5071_v37 = vpop.f32.mrb[56].mxu1 }
 0x4d4   : > { %v4244_v7 = vadd.f32 %v4243_v3, %v4242_v35  ;;  %v3720_v47 = vpop.f32.mrb[57].mxu1  ;;  %v4065_v29 = vmax.f32 %v5071_v37, 0.0 }
 0x4d5   : > { %v4063_v38 = vmax.f32 %v3720_v47, 0.0  ;;  %v5072_v12 = vpop.f32.mrb[58].mxu1 }
 0x4d6   : > { %v4246_v27 = vadd.f32 %v4245_v46, %v4244_v7  ;;  %v3723_v14 = vpop.f32.mrb[59].mxu1  ;;  %v4066_v42 = vmax.f32 %v5072_v12, 0.0  ;;  %v4251_v63 = vsel %vm4135_vm1, %v4065_v29, 0.0 }
 0x4d7   : > { %v4247_v44 = vsel %vm4135_vm1, %v4063_v38, 0.0  ;;  %v4064_v11 = vmax.f32 %v3723_v14, 0.0 }
 0x4d8   : > { %v4248_v40 = vadd.f32 %v4247_v44, %v4246_v27  ;;  %v4253_v18 = vsel %vm4135_vm1, %v4066_v42, 0.0 }
 0x4d9   : > { %v4249_v57 = vsel %vm4135_vm1, %v4064_v11, 0.0 }
 0x4da   : > { %v4250_v23 = vadd.f32 %v4249_v57, %v4248_v40  ;;  %v5272_v40 = vmov 0.0  }
 0x4db   : > { %v5075_v0 = vpop.f32.mrb[60].mxu1  ;;  %5157 = vmatprep.mubr.msk.f32.mxu1 %vm5271_vm2, %v5272_v40 }
 0x4dc   : > { %v4252_v33 = vadd.f32 %v4251_v63, %v4250_v23  ;;  %v3736_v45 = vpop.f32.mrb[61].mxu1  ;;  %v4069_v54 = vmax.f32 %v5075_v0, 0.0 }
 0x4dd   : > { %v4067_v22 = vmax.f32 %v3736_v45, 0.0  ;;  %v5076_v19 = vpop.f32.mrb[62].mxu1 }
 0x4de   : > { %v4254_v43 = vadd.f32 %v4253_v18, %v4252_v33  ;;  %v3739_v31 = vpop.f32.mrb[63].mxu1  ;;  %v4070_v34 = vmax.f32 %v5076_v19, 0.0  ;;  %v4259_v36 = vsel %vm4135_vm1, %v4069_v54, 0.0 }
 0x4df   : > { %v4255_v52 = vsel %vm4135_vm1, %v4067_v22, 0.0  ;;  %v4068_v8 = vmax.f32 %v3739_v31, 0.0 }
 0x4e0   : > { %v4256_v49 = vadd.f32 %v4255_v52, %v4254_v43  ;;  %v4261_v5 = vsel %vm4135_vm1, %v4070_v34, 0.0 }
 0x4e1   : > { %v4257_v61 = vsel %vm4135_vm1, %v4068_v8, 0.0 }
 0x4e2   : > { %v4258_v62 = vadd.f32 %v4257_v61, %v4256_v49 }
 0x4e3   : > { %v5079_v24 = vpop.f32.mrb[64].mxu1 }
 0x4e4   : > { %v4260_v21 = vadd.f32 %v4259_v36, %v4258_v62  ;;  %v3752_v55 = vpop.f32.mrb[65].mxu1  ;;  %v4073_v2 = vmax.f32 %v5079_v24, 0.0 }
 0x4e5   : > { %v4071_v16 = vmax.f32 %v3752_v55, 0.0  ;;  %v5080_v10 = vpop.f32.mrb[66].mxu1 }
 0x4e6   : > { %v10384_v20 = vadd.f32 %v4261_v5, %v4260_v21  ;;  %v3755_v53 = vpop.f32.mrb[67].mxu1  ;;  %v4074_v17 = vmax.f32 %v5080_v10, 0.0  ;;  %v4273_v41 = vsel %vm4135_vm1, %v4073_v2, 0.0 }
 0x4e7   : > { %v4072_v4 = vmax.f32 %v3755_v53, 0.0  ;;  %v4270_v15 = vsel %vm4135_vm1, %v4071_v16, 0.0 }
 0x4e8   : > { %v4275_v48 = vsel %vm4135_vm1, %v4074_v17, 0.0 }
 0x4e9   : > { %v4271_v30 = vsel %vm4135_vm1, %v4072_v4, 0.0 }
 0x4ea   : > { %v4272_v50 = vadd.f32 %v4271_v30, %v4270_v15 }
 0x4eb   : > { %v5083_v28 = vpop.f32.mrb[68].mxu1 }
 0x4ec   : > { %v4274_v9 = vadd.f32 %v4273_v41, %v4272_v50  ;;  %v3768_v56 = vpop.f32.mrb[69].mxu1  ;;  %v4077_v32 = vmax.f32 %v5083_v28, 0.0 }
 0x4ed   : > { %v4075_v39 = vmax.f32 %v3768_v56, 0.0  ;;  %v5084_v25 = vpop.f32.mrb[70].mxu1 }
 0x4ee   : > { %v4276_v26 = vadd.f32 %v4275_v48, %v4274_v9  ;;  %v3771_v6 = vpop.f32.mrb[71].mxu1  ;;  %v4078_v59 = vmax.f32 %v5084_v25, 0.0  ;;  %v4281_v35 = vsel %vm4135_vm1, %v4077_v32, 0.0 }
 0x4ef   : > { %v4277_v60 = vsel %vm4135_vm1, %v4075_v39, 0.0  ;;  %v4076_v58 = vmax.f32 %v3771_v6, 0.0 }
 0x4f0   : > { %v4278_v1 = vadd.f32 %v4277_v60, %v4276_v26  ;;  %v4283_v47 = vsel %vm4135_vm1, %v4078_v59, 0.0 }
 0x4f1   : > { %v4279_v51 = vsel %vm4135_vm1, %v4076_v58, 0.0 }
 0x4f2   : > { %v4280_v13 = vadd.f32 %v4279_v51, %v4278_v1 }
 0x4f3   : > { %v5087_v3 = vpop.f32.mrb[72].mxu1 }
 0x4f4   : > { %v4282_v37 = vadd.f32 %v4281_v35, %v4280_v13  ;;  %v3784_v7 = vpop.f32.mrb[73].mxu1  ;;  %v4081_v14 = vmax.f32 %v5087_v3, 0.0 }
 0x4f5   : > { %v4079_v46 = vmax.f32 %v3784_v7, 0.0  ;;  %v5088_v38 = vpop.f32.mrb[74].mxu1 }
 0x4f6   : > { %v4284_v12 = vadd.f32 %v4283_v47, %v4282_v37  ;;  %v3787_v27 = vpop.f32.mrb[75].mxu1  ;;  %v4082_v42 = vmax.f32 %v5088_v38, 0.0  ;;  %v4289_v63 = vsel %vm4135_vm1, %v4081_v14, 0.0 }
 0x4f7   : > { %v4285_v29 = vsel %vm4135_vm1, %v4079_v46, 0.0  ;;  %v4080_v44 = vmax.f32 %v3787_v27, 0.0 }
 0x4f8   : > { %v4286_v11 = vadd.f32 %v4285_v29, %v4284_v12  ;;  %v4291_v18 = vsel %vm4135_vm1, %v4082_v42, 0.0 }
 0x4f9   : > { %v4287_v57 = vsel %vm4135_vm1, %v4080_v44, 0.0 }
 0x4fa   : > { %v4288_v23 = vadd.f32 %v4287_v57, %v4286_v11 }
 0x4fb   : > { %v5091_v0 = vpop.f32.mrb[76].mxu1 }
 0x4fc   : > { %v4290_v33 = vadd.f32 %v4289_v63, %v4288_v23  ;;  %v3800_v45 = vpop.f32.mrb[77].mxu1  ;;  %v4085_v54 = vmax.f32 %v5091_v0, 0.0 }
 0x4fd   : > { %v4083_v22 = vmax.f32 %v3800_v45, 0.0  ;;  %v5092_v19 = vpop.f32.mrb[78].mxu1 }
 0x4fe   : > { %v4292_v43 = vadd.f32 %v4291_v18, %v4290_v33  ;;  %v3803_v31 = vpop.f32.mrb[79].mxu1  ;;  %v4086_v34 = vmax.f32 %v5092_v19, 0.0  ;;  %v4297_v36 = vsel %vm4135_vm1, %v4085_v54, 0.0 }
 0x4ff   : > { %v4293_v52 = vsel %vm4135_vm1, %v4083_v22, 0.0  ;;  %v4084_v8 = vmax.f32 %v3803_v31, 0.0 }
 0x500   : > { %v4294_v49 = vadd.f32 %v4293_v52, %v4292_v43  ;;  %v4299_v5 = vsel %vm4135_vm1, %v4086_v34, 0.0 }
 0x501   : > { %v4295_v61 = vsel %vm4135_vm1, %v4084_v8, 0.0 }
 0x502   : > { %v4296_v62 = vadd.f32 %v4295_v61, %v4294_v49 }
 0x503   : > { %v5095_v24 = vpop.f32.mrb[80].mxu1 }
 0x504   : > { %v4298_v21 = vadd.f32 %v4297_v36, %v4296_v62  ;;  %v3816_v55 = vpop.f32.mrb[81].mxu1  ;;  %v4089_v4 = vmax.f32 %v5095_v24, 0.0 }
 0x505   : > { %v4087_v16 = vmax.f32 %v3816_v55, 0.0  ;;  %v5096_v10 = vpop.f32.mrb[82].mxu1 }
 0x506   : > { %v4300_v53 = vadd.f32 %v4299_v5, %v4298_v21  ;;  %v3819_v2 = vpop.f32.mrb[83].mxu1  ;;  %v4090_v50 = vmax.f32 %v5096_v10, 0.0  ;;  %v4305_v9 = vsel %vm4135_vm1, %v4089_v4, 0.0 }
 0x507   : > { %v4301_v15 = vsel %vm4135_vm1, %v4087_v16, 0.0  ;;  %v4088_v17 = vmax.f32 %v3819_v2, 0.0 }
 0x508   : > { %v4302_v30 = vadd.f32 %v4301_v15, %v4300_v53  ;;  %v4307_v25 = vsel %vm4135_vm1, %v4090_v50, 0.0 }
 0x509   : > { %v4303_v41 = vsel %vm4135_vm1, %v4088_v17, 0.0 }
 0x50a   : > { %v4304_v28 = vadd.f32 %v4303_v41, %v4302_v30 }
 0x50b   : > { %v5099_v56 = vpop.f32.mrb[84].mxu1 }
 0x50c   : > { %v4306_v48 = vadd.f32 %v4305_v9, %v4304_v28  ;;  %v3832_v39 = vpop.f32.mrb[85].mxu1  ;;  %v4093_v58 = vmax.f32 %v5099_v56, 0.0 }
 0x50d   : > { %v4091_v26 = vmax.f32 %v3832_v39, 0.0  ;;  %v5100_v6 = vpop.f32.mrb[86].mxu1 }
 0x50e   : > { %v4308_v32 = vadd.f32 %v4307_v25, %v4306_v48  ;;  %v3835_v60 = vpop.f32.mrb[87].mxu1  ;;  %v4094_v13 = vmax.f32 %v5100_v6, 0.0  ;;  %v4313_v37 = vsel %vm4135_vm1, %v4093_v58, 0.0 }
 0x50f   : > { %v4309_v1 = vsel %vm4135_vm1, %v4091_v26, 0.0  ;;  %v4092_v59 = vmax.f32 %v3835_v60, 0.0 }
 0x510   : > { %v4310_v51 = vadd.f32 %v4309_v1, %v4308_v32  ;;  %v4315_v38 = vsel %vm4135_vm1, %v4094_v13, 0.0 }
 0x511   : > { %v4311_v35 = vsel %vm4135_vm1, %v4092_v59, 0.0 }
 0x512   : > { %v4312_v3 = vadd.f32 %v4311_v35, %v4310_v51 }
 0x513   : > { %v5103_v7 = vpop.f32.mrb[88].mxu1 }
 0x514   : > { %v4314_v47 = vadd.f32 %v4313_v37, %v4312_v3  ;;  %v3848_v46 = vpop.f32.mrb[89].mxu1  ;;  %v4097_v44 = vmax.f32 %v5103_v7, 0.0 }
 0x515   : > { %v4095_v12 = vmax.f32 %v3848_v46, 0.0  ;;  %v5104_v27 = vpop.f32.mrb[90].mxu1 }
 0x516   : > { %v4316_v14 = vadd.f32 %v4315_v38, %v4314_v47  ;;  %v3851_v29 = vpop.f32.mrb[91].mxu1  ;;  %v4098_v57 = vmax.f32 %v5104_v27, 0.0  ;;  %v4321_v0 = vsel %vm4135_vm1, %v4097_v44, 0.0 }
 0x517   : > { %v4317_v11 = vsel %vm4135_vm1, %v4095_v12, 0.0  ;;  %v4096_v40 = vmax.f32 %v3851_v29, 0.0 }
 0x518   : > { %v4318_v42 = vadd.f32 %v4317_v11, %v4316_v14  ;;  %v4323_v22 = vsel %vm4135_vm1, %v4098_v57, 0.0 }
 0x519   : > { %v4319_v23 = vsel %vm4135_vm1, %v4096_v40, 0.0 }
 0x51a   : > { %v4320_v63 = vadd.f32 %v4319_v23, %v4318_v42 }
 0x51b   : > { %v5107_v33 = vpop.f32.mrb[92].mxu1 }
 0x51c   : > { %v4322_v45 = vadd.f32 %v4321_v0, %v4320_v63  ;;  %v3864_v18 = vpop.f32.mrb[93].mxu1  ;;  %v4101_v52 = vmax.f32 %v5107_v33, 0.0 }
 0x51d   : > { %v4099_v19 = vmax.f32 %v3864_v18, 0.0  ;;  %v5108_v43 = vpop.f32.mrb[94].mxu1 }
 0x51e   : > { %v4324_v31 = vadd.f32 %v4323_v22, %v4322_v45  ;;  %v3867_v54 = vpop.f32.mrb[95].mxu1  ;;  %v4102_v61 = vmax.f32 %v5108_v43, 0.0  ;;  %v4329_v24 = vsel %vm4135_vm1, %v4101_v52, 0.0 }
 0x51f   : > { %v4325_v8 = vsel %vm4135_vm1, %v4099_v19, 0.0  ;;  %v4100_v49 = vmax.f32 %v3867_v54, 0.0 }
 0x520   : > { %v4326_v34 = vadd.f32 %v4325_v8, %v4324_v31  ;;  %v4331_v16 = vsel %vm4135_vm1, %v4102_v61, 0.0 }
 0x521   : > { %v4327_v62 = vsel %vm4135_vm1, %v4100_v49, 0.0 }
 0x522   : > { %v4328_v36 = vadd.f32 %v4327_v62, %v4326_v34 }
 0x523   : > { %v5111_v21 = vpop.f32.mrb[96].mxu1 }
 0x524   : > { %v4330_v55 = vadd.f32 %v4329_v24, %v4328_v36  ;;  %v3880_v5 = vpop.f32.mrb[97].mxu1  ;;  %v4105_v15 = vmax.f32 %v5111_v21, 0.0 }
 0x525   : > { %v4103_v10 = vmax.f32 %v3880_v5, 0.0  ;;  %v5112_v53 = vpop.f32.mrb[98].mxu1 }
 0x526   : > { %v4332_v2 = vadd.f32 %v4331_v16, %v4330_v55  ;;  %v3883_v4 = vpop.f32.mrb[99].mxu1  ;;  %v4106_v41 = vmax.f32 %v5112_v53, 0.0  ;;  %v4337_v56 = vsel %vm4135_vm1, %v4105_v15, 0.0 }
 0x527   : > { %v4333_v17 = vsel %vm4135_vm1, %v4103_v10, 0.0  ;;  %v4104_v30 = vmax.f32 %v3883_v4, 0.0 }
 0x528   : > { %v4334_v50 = vadd.f32 %v4333_v17, %v4332_v2  ;;  %v4339_v26 = vsel %vm4135_vm1, %v4106_v41, 0.0 }
 0x529   : > { %v4335_v28 = vsel %vm4135_vm1, %v4104_v30, 0.0 }
 0x52a   : > { %v4336_v9 = vadd.f32 %v4335_v28, %v4334_v50 }
 0x52b   : > { %v5115_v48 = vpop.f32.mrb[100].mxu1 }
 0x52c   : > { %v4338_v39 = vadd.f32 %v4337_v56, %v4336_v9  ;;  %v3896_v25 = vpop.f32.mrb[101].mxu1  ;;  %v4109_v1 = vmax.f32 %v5115_v48, 0.0 }
 0x52d   : > { %v4107_v6 = vmax.f32 %v3896_v25, 0.0  ;;  %v5116_v32 = vpop.f32.mrb[102].mxu1 }
 0x52e   : > { %v4340_v60 = vadd.f32 %v4339_v26, %v4338_v39  ;;  %v3899_v58 = vpop.f32.mrb[103].mxu1  ;;  %v4110_v35 = vmax.f32 %v5116_v32, 0.0  ;;  %v4345_v7 = vsel %vm4135_vm1, %v4109_v1, 0.0 }
 0x52f   : > { %v4341_v59 = vsel %vm4135_vm1, %v4107_v6, 0.0  ;;  %v4108_v51 = vmax.f32 %v3899_v58, 0.0 }
 0x530   : > { %v4342_v13 = vadd.f32 %v4341_v59, %v4340_v60  ;;  %v4347_v12 = vsel %vm4135_vm1, %v4110_v35, 0.0 }
 0x531   : > { %v4343_v3 = vsel %vm4135_vm1, %v4108_v51, 0.0 }
 0x532   : > { %v4344_v37 = vadd.f32 %v4343_v3, %v4342_v13 }
 0x533   : > { %v5119_v47 = vpop.f32.mrb[104].mxu1 }
 0x534   : > { %v4346_v46 = vadd.f32 %v4345_v7, %v4344_v37  ;;  %v3912_v38 = vpop.f32.mrb[105].mxu1  ;;  %v4113_v11 = vmax.f32 %v5119_v47, 0.0 }
 0x535   : > { %v4111_v27 = vmax.f32 %v3912_v38, 0.0  ;;  %v5120_v14 = vpop.f32.mrb[106].mxu1 }
 0x536   : > { %v4348_v29 = vadd.f32 %v4347_v12, %v4346_v46  ;;  %v3915_v44 = vpop.f32.mrb[107].mxu1  ;;  %v4114_v23 = vmax.f32 %v5120_v14, 0.0  ;;  %v4353_v33 = vsel %vm4135_vm1, %v4113_v11, 0.0 }
 0x537   : > { %v4349_v40 = vsel %vm4135_vm1, %v4111_v27, 0.0  ;;  %v4112_v42 = vmax.f32 %v3915_v44, 0.0 }
 0x538   : > { %v4350_v57 = vadd.f32 %v4349_v40, %v4348_v29  ;;  %v4355_v19 = vsel %vm4135_vm1, %v4114_v23, 0.0 }
 0x539   : > { %v4351_v63 = vsel %vm4135_vm1, %v4112_v42, 0.0 }
 0x53a   : > { %v4352_v0 = vadd.f32 %v4351_v63, %v4350_v57 }
 0x53b   : > { %v5123_v45 = vpop.f32.mrb[108].mxu1 }
 0x53c   : > { %v4354_v18 = vadd.f32 %v4353_v33, %v4352_v0  ;;  %v3928_v22 = vpop.f32.mrb[109].mxu1  ;;  %v4117_v8 = vmax.f32 %v5123_v45, 0.0 }
 0x53d   : > { %v4115_v43 = vmax.f32 %v3928_v22, 0.0  ;;  %v5124_v31 = vpop.f32.mrb[110].mxu1  ;;  %v4263_v22 = vrot.slane %v10384_v20, 4 }
 0x53e   : > { %v4356_v54 = vadd.f32 %v4355_v19, %v4354_v18  ;;  %v3931_v52 = vpop.f32.mrb[111].mxu1  ;;  %v4118_v62 = vmax.f32 %v5124_v31, 0.0  ;;  %v4361_v21 = vsel %vm4135_vm1, %v4117_v8, 0.0 }
 0x53f   : > { %v4357_v49 = vsel %vm4135_vm1, %v4115_v43, 0.0  ;;  %v4116_v34 = vmax.f32 %v3931_v52, 0.0 }
 0x540   : > { %v4358_v61 = vadd.f32 %v4357_v49, %v4356_v54  ;;  %v4363_v10 = vsel %vm4135_vm1, %v4118_v62, 0.0 }
 0x541   : > { %v4359_v36 = vsel %vm4135_vm1, %v4116_v34, 0.0 }
 0x542   : > { %v4360_v24 = vadd.f32 %v4359_v36, %v4358_v61  ;;  %v4264_v36 = vadd.f32 %v4263_v22, %v10384_v20 }
 0x543   : > { %v5127_v55 = vpop.f32.mrb[112].mxu1 }
 0x544   : > { %v4362_v5 = vadd.f32 %v4361_v21, %v4360_v24  ;;  %v3944_v16 = vpop.f32.mrb[113].mxu1  ;;  %v4121_v17 = vmax.f32 %v5127_v55, 0.0 }
 0x545   : > { %v4119_v53 = vmax.f32 %v3944_v16, 0.0  ;;  %v5128_v2 = vpop.f32.mrb[114].mxu1 }
 0x546   : > { %v4364_v4 = vadd.f32 %v4363_v10, %v4362_v5  ;;  %v3947_v15 = vpop.f32.mrb[115].mxu1  ;;  %v4122_v28 = vmax.f32 %v5128_v2, 0.0  ;;  %v4369_v48 = vsel %vm4135_vm1, %v4121_v17, 0.0  ;;  %v4265_v10 = vrot.slane %v4264_v36, 2 }
 0x547   : > { %v4365_v30 = vsel %vm4135_vm1, %v4119_v53, 0.0  ;;  %v4120_v50 = vmax.f32 %v3947_v15, 0.0 }
 0x548   : > { %v4366_v41 = vadd.f32 %v4365_v30, %v4364_v4  ;;  %v4371_v6 = vsel %vm4135_vm1, %v4122_v28, 0.0  ;;  %v4266_v15 = vadd.f32 %v4265_v10, %v4264_v36 }
 0x549   : > { %v4367_v9 = vsel %vm4135_vm1, %v4120_v50, 0.0 }
 0x54a   : > { %v4368_v56 = vadd.f32 %v4367_v9, %v4366_v41  ;;  %v4267_v50 = vrot.slane %v4266_v15, 1 }
 0x54b   : > { %v5131_v39 = vpop.f32.mrb[116].mxu1 }
 0x54c   : > { %v4370_v25 = vadd.f32 %v4369_v48, %v4368_v56  ;;  %v3960_v26 = vpop.f32.mrb[117].mxu1  ;;  %v4125_v59 = vmax.f32 %v5131_v39, 0.0  ;;  %v4268_v9 = vadd.f32 %v4267_v50, %v4266_v15 }
 0x54d   : > { %v4123_v32 = vmax.f32 %v3960_v26, 0.0  ;;  %v5132_v60 = vpop.f32.mrb[118].mxu1 }
 0x54e   : > { %v4372_v58 = vadd.f32 %v4371_v6, %v4370_v25  ;;  %v3963_v1 = vpop.f32.mrb[119].mxu1  ;;  %v4126_v3 = vmax.f32 %v5132_v60, 0.0  ;;  %v4377_v47 = vsel %vm4135_vm1, %v4125_v59, 0.0  ;;  %v4269_v48 = vmul.f32 0.001953125, %v4268_v9  ;;  %v4712_v25 = vld [vmem:[%s10474_s7] ss:$0 sm:$0xff] }
 0x54f   : > { %v4373_v51 = vsel %vm4135_vm1, %v4123_v32, 0.0  ;;  %v4124_v13 = vmax.f32 %v3963_v1, 0.0  ;;  %v4713_v6 = vld [vmem:[%s10475_s8] ss:$0 sm:$0xff] }
 0x550   : > { %v4374_v35 = vadd.f32 %v4373_v51, %v4372_v58  ;;  %v4379_v27 = vsel %vm4135_vm1, %v4126_v3, 0.0 }
 0x551   : > { %v4375_v37 = vsel %vm4135_vm1, %v4124_v13, 0.0 }
 0x552   : > { %v4376_v7 = vadd.f32 %v4375_v37, %v4374_v35 }
 0x553   : > { %v5135_v46 = vpop.f32.mrb[120].mxu1 }
 0x554   : > { %v4378_v38 = vadd.f32 %v4377_v47, %v4376_v7  ;;  %v3976_v12 = vpop.f32.mrb[121].mxu1  ;;  %v4129_v40 = vmax.f32 %v5135_v46, 0.0 }
 0x555   : > { %v4127_v14 = vmax.f32 %v3976_v12, 0.0  ;;  %v5136_v29 = vpop.f32.mrb[122].mxu1 }
 0x556   : > { %v4380_v44 = vadd.f32 %v4379_v27, %v4378_v38  ;;  %v3979_v11 = vpop.f32.mrb[123].mxu1  ;;  %v4130_v63 = vmax.f32 %v5136_v29, 0.0  ;;  %v4385_v45 = vsel %vm4135_vm1, %v4129_v40, 0.0 }
 0x557   : > { %v4381_v42 = vsel %vm4135_vm1, %v4127_v14, 0.0  ;;  %v4128_v57 = vmax.f32 %v3979_v11, 0.0 }
 0x558   : > { %v4382_v23 = vadd.f32 %v4381_v42, %v4380_v44  ;;  %v4387_v31 = vsel %vm4135_vm1, %v4130_v63, 0.0 }
 0x559   : > { %v4383_v0 = vsel %vm4135_vm1, %v4128_v57, 0.0 }
 0x55a   : > { %v4384_v33 = vadd.f32 %v4383_v0, %v4382_v23 }
 0x55b   : > { %v5139_v18 = vpop.f32.mrb[124].mxu1 }
 0x55c   : > { %v4386_v19 = vadd.f32 %v4385_v45, %v4384_v33  ;;  %v3992_v43 = vpop.f32.mrb[125].mxu1  ;;  %v4133_v34 = vmax.f32 %v5139_v18, 0.0 }
 0x55d   : > { %v4131_v54 = vmax.f32 %v3992_v43, 0.0  ;;  %v5140_v52 = vpop.f32.mrb[126].mxu1 }
 0x55e   : > { %v4388_v8 = vadd.f32 %v4387_v31, %v4386_v19  ;;  %v3995_v49 = vpop.f32.mrb[127].mxu1  ;;  %v4134_v21 = vmax.f32 %v5140_v52, 0.0  ;;  %v4393_v16 = vsel %vm4135_vm1, %v4133_v34, 0.0 }
 0x55f   : > { %v4389_v61 = vsel %vm4135_vm1, %v4131_v54, 0.0  ;;  %v4132_v62 = vmax.f32 %v3995_v49, 0.0 }
 0x560   : > { %v4390_v24 = vadd.f32 %v4389_v61, %v4388_v8  ;;  %v4395_v2 = vsel %vm4135_vm1, %v4134_v21, 0.0 }
 0x561   : > { %v4391_v55 = vsel %vm4135_vm1, %v4132_v62, 0.0 }
 0x562   : > { %v4392_v5 = vadd.f32 %v4391_v55, %v4390_v24 }
 0x564   : > { %v4394_v53 = vadd.f32 %v4393_v16, %v4392_v5 }
 0x566   : > { %v4396_v4 = vadd.f32 %v4395_v2, %v4394_v53 }
 0x568   : > { %v4397_v17 = vrot.slane %v4396_v4, 4 }
 0x56a   : > { %v4398_v30 = vadd.f32 %v4397_v17, %v4396_v4 }
 0x56c   : > { %v4399_v41 = vrot.slane %v4398_v30, 2 }
 0x56e   : > { %v4400_v28 = vadd.f32 %v4399_v41, %v4398_v30 }
 0x570   : > { %v4401_v20 = vrot.slane %v4400_v28, 1 }
 0x572   : > { %v4402_v56 = vadd.f32 %v4401_v20, %v4400_v28 }
 0x574   : > { %v4403_v39 = vmul.f32 0.001953125, %v4402_v56 }
 0x576   : > { %v4405_v26 = vsel %vm4404_vm3, %v4269_v48, %v4403_v39 }
 0x577   : > { %v4413_v32 = vmul.f32 %v4712_v25, %v4405_v26 }
 0x579   : > { %v4421_v60 = vadd.f32 %v4713_v6, %v4413_v32 }
 0x57b   : > { %5158 = vmatmul.mubr.msk.f32.vlgmr.msra.gmra.mrb[128].mxu1 %vm4135_vm1, %v4421_v60 }
 0x64e   : > { %v4499_v58 = vpop.f32.mrb[128].mxu1 }
 0x64f   : > { %v5159_v1 = vpop.f32.mrb[129].mxu1  ;;  %4504 = vrot.lane.b32.xlu0 %v4499_v58, %s5273_s17 }
 0x6c1   : > { %v4505_v59 = vpop.permute.xlu0 %4504 }
 0x6c2   : > { %v4507_v51 = vsel %vm4135_vm1, %v4405_v26, %v4505_v59 }
 0x6c3   : > { %4508 = vst [vmem:[%s357_s21] sm:$0x3] %v4507_v51 }
 0x6c4 PF: > { %s20_s13 = sadd.s32 1, %s5268_s13  }
 0x6c5   : > { %p17_p4 = scmp.ge.s32.totalorder %s20_s13, 4  }
 0x6c7   :  { %19 = sbr.rel (!%p17_p4) target bundleno = 1 (0x1), region = 90 }

</bundles_post_ra>
